<compile_context>
chip_gen: v7x
topology: tpu7x:2x2x1
jax: 0.10.0
libtpu: 0.0.40
codegen_flags: <defaults>
</compile_context>

<pallas_src>
import numpy as np
import jax
import jax.numpy as jnp
from jax.experimental import pallas as pl
from jax.experimental.pallas import tpu as pltpu


# ---------------------------------------------------------------------------
# Geometry fixed by the module (fc1 expects 32 * 16 * 16 inputs).
# ---------------------------------------------------------------------------
H = 16
W = 16
C_IN, C1, C2 = 3, 16, 32
D1, D2 = 256, 4
P = H * W                       # spatial positions per image


# ---------------------------------------------------------------------------
# In-kernel helpers (operate on values; all 2D, channels on sublanes,
# (batch, h, w) on lanes).
# ---------------------------------------------------------------------------
def _lane_shift(x, dr, n):
    """shifted[:, q] = x[:, (q + dr) % n]  (wrap-around; callers mask it)."""
    s = dr % n
    if s == 0:
        return x
    return jnp.concatenate([x[:, s:], x[:, :s]], axis=1)


def _conv3x3_t(src_t, taps, bias, masks, n_cols):
    """3x3 'same' conv in transposed layout, bias + ReLU fused.

    src_t : (Cin, B*P)  f32   columns ordered (b, h, w)
    taps  : (9, Cout, Cin) bf16,  tap t = (dh + 1) * 3 + (dw + 1)
    bias  : (Cout, 1)   f32
    masks : (9, B*P)    f32   per-tap validity of the shifted source column
    returns (Cout, B*P) f32
    """
    cout = taps.shape[1]
    acc = jnp.zeros((cout, n_cols), dtype=jnp.float32)
    t = 0
    for dh in (-1, 0, 1):
        for dw in (-1, 0, 1):
            dr = dh * W + dw
            shifted = _lane_shift(src_t, dr, n_cols)
            src = (shifted * masks[t:t + 1, :]).astype(jnp.bfloat16)
            acc += jnp.dot(taps[t], src, preferred_element_type=jnp.float32)
            t += 1
    return jnp.maximum(acc + bias, 0.0)


def _make_kernel(batch):
    n_cols = batch * P

    def kernel(masks_ref, x_t_ref, w1t_ref, b1_ref, w2t_ref, b2_ref,
               wf1_hbm_ref, bf1_ref, wf2_ref, bf2_ref,
               o_ref, wf1_vmem, dma_sem):
        # Start the 4 MiB fc1 weight fetch immediately; the conv stage below
        # runs while it is in flight (the weight stream is the roofline).
        wf1_copy = pltpu.make_async_copy(wf1_hbm_ref, wf1_vmem, dma_sem.at[0])
        wf1_copy.start()

        masks = masks_ref[...]                                    # (9, B*P)

        # conv1 + ReLU, then conv2 + ReLU (channels on sublanes).
        y1_t = _conv3x3_t(x_t_ref[...], w1t_ref[...], b1_ref[...],
                          masks, n_cols)                          # (16, B*P)
        y2_t = _conv3x3_t(y1_t, w2t_ref[...], b2_ref[...],
                          masks, n_cols)                          # (32, B*P)

        # Flatten to (B, C2*H*W) in CHW (PyTorch) order via aligned
        # lane-block concatenation — no minor-dim reshape needed.
        rows = []
        for b in range(batch):
            pieces = [y2_t[c:c + 1, b * P:(b + 1) * P] for c in range(C2)]
            rows.append(jnp.concatenate(pieces, axis=1))          # (1, 8192)
        act = jnp.concatenate(rows, axis=0).astype(jnp.bfloat16)  # (B, 8192)

        # fc1 (+bias+ReLU) and fc2 (+bias) on the DMA'd weight.
        wf1_copy.wait()
        h1 = jnp.dot(act, wf1_vmem[...],
                     preferred_element_type=jnp.float32)          # (B, 256)
        h1 = jnp.maximum(h1 + bf1_ref[...], 0.0)
        out = jnp.dot(h1, wf2_ref[...],
                      preferred_element_type=jnp.float32)         # (B, 4)
        o_ref[...] = out + bf2_ref[...]

    return kernel


# ---------------------------------------------------------------------------
# Forward pass (matches ImageCNN.forward semantics).
# ---------------------------------------------------------------------------
@jax.jit
def image_cnn_forward(x_nchw, prep):
    batch = x_nchw.shape[0]
    assert x_nchw.shape[1:] == (C_IN, H, W), x_nchw.shape
    n_cols = batch * P

    # NCHW -> (Cin, B*H*W): channels on sublanes, (b, h, w) on lanes.
    x_t = jnp.transpose(x_nchw, (1, 0, 2, 3)).reshape(C_IN, n_cols)
    x_t = x_t.astype(jnp.float32)

    # Per-tap validity masks (trace-time constants).
    q = np.arange(n_cols)
    hh = (q // W) % H
    ww = q % W
    masks = np.stack(
        [((hh + dh >= 0) & (hh + dh < H) & (ww + dw >= 0) & (ww + dw < W))
         for dh in (-1, 0, 1) for dw in (-1, 0, 1)]).astype(np.float32)
    masks = jnp.asarray(masks)                                    # (9, B*P)

    din = C2 * P
    vmem = pl.BlockSpec(memory_space=pltpu.MemorySpace.VMEM)
    cost = pl.CostEstimate(
        flops=2 * n_cols * 9 * (C_IN * C1 + C1 * C2)
              + 2 * batch * (din * D1 + D1 * D2),
        transcendentals=0,
        bytes_accessed=din * D1 * 2 + n_cols * (C_IN + 9) * 4
                       + (D1 + D1 * D2 + D2 + batch * D2) * 4,
    )

    return pl.pallas_call(
        _make_kernel(batch),
        out_shape=jax.ShapeDtypeStruct((batch, D2), jnp.float32),
        in_specs=[vmem, vmem, vmem, vmem, vmem, vmem,
                  pl.BlockSpec(memory_space=pl.ANY),   # fc1 weight stays in HBM
                  vmem, vmem, vmem],
        out_specs=vmem,
        scratch_shapes=[pltpu.VMEM((din, D1), jnp.bfloat16),
                        pltpu.SemaphoreType.DMA((1,))],
        cost_estimate=cost,
    )(masks, x_t,
      prep["w_c1"], prep["b_c1"], prep["w_c2"], prep["b_c2"],
      prep["w_f1"], prep["b_f1"], prep["w_f2"], prep["b_f2"])


# ---------------------------------------------------------------------------
# Parameter construction (PyTorch-convention shapes) + one-time layout prep.
# ---------------------------------------------------------------------------
def init_params(key):
    ks = jax.random.split(key, 8)

    def scaled(k, shape, fan_in):
        return (jax.random.normal(k, shape, dtype=jnp.float32)
                * (1.0 / np.sqrt(fan_in)))

    return dict(
        w_c1=scaled(ks[0], (C1, C_IN, 3, 3), C_IN * 9),   # OIHW
        b_c1=scaled(ks[1], (C1,), C_IN * 9),
        w_c2=scaled(ks[2], (C2, C1, 3, 3), C1 * 9),
        b_c2=scaled(ks[3], (C2,), C1 * 9),
        w_f1=scaled(ks[4], (D1, C2 * H * W), C2 * H * W),  # (out, in)
        b_f1=scaled(ks[5], (D1,), C2 * H * W),
        w_f2=scaled(ks[6], (D2, D1), D1),
        b_f2=scaled(ks[7], (D2,), D1),
    )


def prepare_params(params):
    """One-time layout prep (outside jit): per-tap conv weights (9, Cout, Cin)
    in bf16, fc1 weight transposed to (8192, 256) bf16 with rows in the CHW
    flatten order the kernel produces, fc2 transposed.  No per-call work."""
    def taps(w_oihw):
        o, i, kh, kw = w_oihw.shape
        return (jnp.transpose(w_oihw, (2, 3, 0, 1))
                .reshape(kh * kw, o, i).astype(jnp.bfloat16))

    return dict(
        w_c1=taps(params["w_c1"]),                       # (9, 16, 3)  bf16
        b_c1=params["b_c1"].reshape(-1, 1),              # (16, 1) f32
        w_c2=taps(params["w_c2"]),                       # (9, 32, 16) bf16
        b_c2=params["b_c2"].reshape(-1, 1),              # (32, 1) f32
        w_f1=params["w_f1"].T.astype(jnp.bfloat16),      # (8192, 256) bf16
        b_f1=params["b_f1"].reshape(1, -1),              # (1, 256) f32
        w_f2=params["w_f2"].T,                           # (256, 4) f32
        b_f2=params["b_f2"].reshape(1, -1),              # (1, 4) f32
    )


# ---------------------------------------------------------------------------
# Reference (pure JAX).  Mirrors the kernel's documented bf16 quantization of
# the conv / fc1 matmul operands (accumulation and epilogues stay f32).
# ---------------------------------------------------------------------------
def reference_forward(x_nchw, params):
    hp = jax.lax.Precision.HIGHEST

    def conv(x, w, b):
        y = jax.lax.conv_general_dilated(
            x.astype(jnp.bfloat16), w.astype(jnp.bfloat16),
            window_strides=(1, 1), padding="SAME",
            dimension_numbers=("NCHW", "OIHW", "NCHW"),
            precision=hp, preferred_element_type=jnp.float32)
        return jax.nn.relu(y + b[None, :, None, None])

    x = conv(x_nchw, params["w_c1"], params["b_c1"])
    x = conv(x, params["w_c2"], params["b_c2"])
    x = x.reshape(x.shape[0], -1)
    h = jnp.dot(x.astype(jnp.bfloat16),
                params["w_f1"].T.astype(jnp.bfloat16),
                preferred_element_type=jnp.float32)
    x = jax.nn.relu(h + params["b_f1"])
    return jnp.dot(x, params["w_f2"].T, precision=hp,
                   preferred_element_type=jnp.float32) + params["b_f2"]


if __name__ == "__main__":
    key = jax.random.PRNGKey(0)
    k_x, k_p = jax.random.split(key)

    # fc1 expects 32*16*16 features -> spatial must be 16x16, channels 3.
    x = jax.random.normal(k_x, (2, C_IN, H, W), dtype=jnp.float32)
    params = init_params(k_p)
    prep = prepare_params(params)          # one-time layout prep, outside jit

    out = jax.block_until_ready(image_cnn_forward(x, prep))
    ref = reference_forward(x, params)

    assert out.shape == (2, D2), out.shape
    err = float(jnp.max(jnp.abs(out - ref)))
    assert jnp.allclose(out, ref, atol=1e-2, rtol=1e-2), f"max err {err}"
    print("KERNEL_OK")
</pallas_src>

<mosaic_0001>
module attributes {stable_mosaic.version = 11 : i64} {
  func.func @kernel(%arg0: memref<9x512xf32, #tpu.memory_space<vmem>>, %arg1: memref<3x512xf32, #tpu.memory_space<vmem>>, %arg2: memref<9x16x3xbf16, #tpu.memory_space<vmem>>, %arg3: memref<16x1xf32, #tpu.memory_space<vmem>>, %arg4: memref<9x32x16xbf16, #tpu.memory_space<vmem>>, %arg5: memref<32x1xf32, #tpu.memory_space<vmem>>, %arg6: memref<8192x256xbf16, #tpu.memory_space<any>>, %arg7: memref<1x256xf32, #tpu.memory_space<vmem>>, %arg8: memref<256x4xf32, #tpu.memory_space<vmem>>, %arg9: memref<1x4xf32, #tpu.memory_space<vmem>>, %arg10: memref<2x4xf32, #tpu.memory_space<vmem>>, %arg11: memref<8192x256xbf16, #tpu.memory_space<vmem>>, %arg12: memref<1x!tpu.dma_semaphore, #tpu.memory_space<semaphore_mem>>) attributes {dimension_semantics = [], scalar_prefetch = 0 : i64, scratch_operands = 2 : i64, tpu.core_type = #tpu.core_type<tc>} {
    %c0_i32 = arith.constant 0 : i32
    %0 = tpu.memref_slice %arg12[%c0_i32] : memref<1x!tpu.dma_semaphore, #tpu.memory_space<semaphore_mem>> -> memref<1x!tpu.dma_semaphore, #tpu.memory_space<semaphore_mem>>
    %1 = tpu.memref_squeeze %0 : memref<1x!tpu.dma_semaphore, #tpu.memory_space<semaphore_mem>> -> memref<!tpu.dma_semaphore, #tpu.memory_space<semaphore_mem>>
    tpu.enqueue_dma source(%arg6 : memref<8192x256xbf16, #tpu.memory_space<any>>) target(%arg11 : memref<8192x256xbf16, #tpu.memory_space<vmem>>) target_semaphore(%1 : memref<!tpu.dma_semaphore, #tpu.memory_space<semaphore_mem>>)
    %c0 = arith.constant 0 : index
    %c0_0 = arith.constant 0 : index
    %2 = vector.load %arg0[%c0, %c0_0] : memref<9x512xf32, #tpu.memory_space<vmem>>, vector<9x512xf32>
    %c0_1 = arith.constant 0 : index
    %c0_2 = arith.constant 0 : index
    %3 = vector.load %arg1[%c0_1, %c0_2] : memref<3x512xf32, #tpu.memory_space<vmem>>, vector<3x512xf32>
    %c0_3 = arith.constant 0 : index
    %c0_4 = arith.constant 0 : index
    %c0_5 = arith.constant 0 : index
    %4 = vector.load %arg2[%c0_3, %c0_4, %c0_5] : memref<9x16x3xbf16, #tpu.memory_space<vmem>>, vector<9x16x3xbf16>
    %c0_6 = arith.constant 0 : index
    %c0_7 = arith.constant 0 : index
    %5 = vector.load %arg3[%c0_6, %c0_7] : memref<16x1xf32, #tpu.memory_space<vmem>>, vector<16x1xf32>
    %cst = arith.constant 0.000000e+00 : f32
    %6 = vector.broadcast %cst : f32 to vector<16x512xf32>
    %7 = vector.extract_strided_slice %3 {offsets = [0, 495], sizes = [3, 17], strides = [1, 1]} : vector<3x512xf32> to vector<3x17xf32>
    %8 = vector.extract_strided_slice %3 {offsets = [0, 0], sizes = [3, 495], strides = [1, 1]} : vector<3x512xf32> to vector<3x495xf32>
    %9 = tpu.concatenate %7, %8 in 1 : vector<3x17xf32>, vector<3x495xf32> -> vector<3x512xf32>
    %10 = vector.extract_strided_slice %2 {offsets = [0, 0], sizes = [1, 512], strides = [1, 1]} : vector<9x512xf32> to vector<1x512xf32>
    %11 = vector.broadcast %10 : vector<1x512xf32> to vector<3x512xf32>
    %12 = arith.mulf %9, %11 : vector<3x512xf32>
    %13 = arith.truncf %12 : vector<3x512xf32> to vector<3x512xbf16>
    %14 = vector.extract_strided_slice %4 {offsets = [0, 0, 0], sizes = [1, 16, 3], strides = [1, 1, 1]} : vector<9x16x3xbf16> to vector<1x16x3xbf16>
    %15 = vector.shape_cast %14 : vector<1x16x3xbf16> to vector<16x3xbf16>
    %cst_8 = arith.constant dense<0.000000e+00> : vector<16x512xf32>
    %16 = tpu.matmul %15, %13, %cst_8 {dimension_numbers = #tpu.dot_dimension_numbers<[1], [0], [0], [1], [0, 0, 1, 1], [], []>} : vector<16x3xbf16>, vector<3x512xbf16>, vector<16x512xf32> -> vector<16x512xf32>
    %17 = arith.addf %6, %16 : vector<16x512xf32>
    %18 = vector.extract_strided_slice %3 {offsets = [0, 496], sizes = [3, 16], strides = [1, 1]} : vector<3x512xf32> to vector<3x16xf32>
    %19 = vector.extract_strided_slice %3 {offsets = [0, 0], sizes = [3, 496], strides = [1, 1]} : vector<3x512xf32> to vector<3x496xf32>
    %20 = tpu.concatenate %18, %19 in 1 : vector<3x16xf32>, vector<3x496xf32> -> vector<3x512xf32>
    %21 = vector.extract_strided_slice %2 {offsets = [1, 0], sizes = [1, 512], strides = [1, 1]} : vector<9x512xf32> to vector<1x512xf32>
    %22 = vector.broadcast %21 : vector<1x512xf32> to vector<3x512xf32>
    %23 = arith.mulf %20, %22 : vector<3x512xf32>
    %24 = arith.truncf %23 : vector<3x512xf32> to vector<3x512xbf16>
    %25 = vector.extract_strided_slice %4 {offsets = [1, 0, 0], sizes = [1, 16, 3], strides = [1, 1, 1]} : vector<9x16x3xbf16> to vector<1x16x3xbf16>
    %26 = vector.shape_cast %25 : vector<1x16x3xbf16> to vector<16x3xbf16>
    %cst_9 = arith.constant dense<0.000000e+00> : vector<16x512xf32>
    %27 = tpu.matmul %26, %24, %cst_9 {dimension_numbers = #tpu.dot_dimension_numbers<[1], [0], [0], [1], [0, 0, 1, 1], [], []>} : vector<16x3xbf16>, vector<3x512xbf16>, vector<16x512xf32> -> vector<16x512xf32>
    %28 = arith.addf %17, %27 : vector<16x512xf32>
    %29 = vector.extract_strided_slice %3 {offsets = [0, 497], sizes = [3, 15], strides = [1, 1]} : vector<3x512xf32> to vector<3x15xf32>
    %30 = vector.extract_strided_slice %3 {offsets = [0, 0], sizes = [3, 497], strides = [1, 1]} : vector<3x512xf32> to vector<3x497xf32>
    %31 = tpu.concatenate %29, %30 in 1 : vector<3x15xf32>, vector<3x497xf32> -> vector<3x512xf32>
    %32 = vector.extract_strided_slice %2 {offsets = [2, 0], sizes = [1, 512], strides = [1, 1]} : vector<9x512xf32> to vector<1x512xf32>
    %33 = vector.broadcast %32 : vector<1x512xf32> to vector<3x512xf32>
    %34 = arith.mulf %31, %33 : vector<3x512xf32>
    %35 = arith.truncf %34 : vector<3x512xf32> to vector<3x512xbf16>
    %36 = vector.extract_strided_slice %4 {offsets = [2, 0, 0], sizes = [1, 16, 3], strides = [1, 1, 1]} : vector<9x16x3xbf16> to vector<1x16x3xbf16>
    %37 = vector.shape_cast %36 : vector<1x16x3xbf16> to vector<16x3xbf16>
    %cst_10 = arith.constant dense<0.000000e+00> : vector<16x512xf32>
    %38 = tpu.matmul %37, %35, %cst_10 {dimension_numbers = #tpu.dot_dimension_numbers<[1], [0], [0], [1], [0, 0, 1, 1], [], []>} : vector<16x3xbf16>, vector<3x512xbf16>, vector<16x512xf32> -> vector<16x512xf32>
    %39 = arith.addf %28, %38 : vector<16x512xf32>
    %40 = vector.extract_strided_slice %3 {offsets = [0, 511], sizes = [3, 1], strides = [1, 1]} : vector<3x512xf32> to vector<3x1xf32>
    %41 = vector.extract_strided_slice %3 {offsets = [0, 0], sizes = [3, 511], strides = [1, 1]} : vector<3x512xf32> to vector<3x511xf32>
    %42 = tpu.concatenate %40, %41 in 1 : vector<3x1xf32>, vector<3x511xf32> -> vector<3x512xf32>
    %43 = vector.extract_strided_slice %2 {offsets = [3, 0], sizes = [1, 512], strides = [1, 1]} : vector<9x512xf32> to vector<1x512xf32>
    %44 = vector.broadcast %43 : vector<1x512xf32> to vector<3x512xf32>
    %45 = arith.mulf %42, %44 : vector<3x512xf32>
    %46 = arith.truncf %45 : vector<3x512xf32> to vector<3x512xbf16>
    %47 = vector.extract_strided_slice %4 {offsets = [3, 0, 0], sizes = [1, 16, 3], strides = [1, 1, 1]} : vector<9x16x3xbf16> to vector<1x16x3xbf16>
    %48 = vector.shape_cast %47 : vector<1x16x3xbf16> to vector<16x3xbf16>
    %cst_11 = arith.constant dense<0.000000e+00> : vector<16x512xf32>
    %49 = tpu.matmul %48, %46, %cst_11 {dimension_numbers = #tpu.dot_dimension_numbers<[1], [0], [0], [1], [0, 0, 1, 1], [], []>} : vector<16x3xbf16>, vector<3x512xbf16>, vector<16x512xf32> -> vector<16x512xf32>
    %50 = arith.addf %39, %49 : vector<16x512xf32>
    %51 = vector.extract_strided_slice %2 {offsets = [4, 0], sizes = [1, 512], strides = [1, 1]} : vector<9x512xf32> to vector<1x512xf32>
    %52 = vector.broadcast %51 : vector<1x512xf32> to vector<3x512xf32>
    %53 = arith.mulf %3, %52 : vector<3x512xf32>
    %54 = arith.truncf %53 : vector<3x512xf32> to vector<3x512xbf16>
    %55 = vector.extract_strided_slice %4 {offsets = [4, 0, 0], sizes = [1, 16, 3], strides = [1, 1, 1]} : vector<9x16x3xbf16> to vector<1x16x3xbf16>
    %56 = vector.shape_cast %55 : vector<1x16x3xbf16> to vector<16x3xbf16>
    %cst_12 = arith.constant dense<0.000000e+00> : vector<16x512xf32>
    %57 = tpu.matmul %56, %54, %cst_12 {dimension_numbers = #tpu.dot_dimension_numbers<[1], [0], [0], [1], [0, 0, 1, 1], [], []>} : vector<16x3xbf16>, vector<3x512xbf16>, vector<16x512xf32> -> vector<16x512xf32>
    %58 = arith.addf %50, %57 : vector<16x512xf32>
    %59 = vector.extract_strided_slice %3 {offsets = [0, 1], sizes = [3, 511], strides = [1, 1]} : vector<3x512xf32> to vector<3x511xf32>
    %60 = vector.extract_strided_slice %3 {offsets = [0, 0], sizes = [3, 1], strides = [1, 1]} : vector<3x512xf32> to vector<3x1xf32>
    %61 = tpu.concatenate %59, %60 in 1 : vector<3x511xf32>, vector<3x1xf32> -> vector<3x512xf32>
    %62 = vector.extract_strided_slice %2 {offsets = [5, 0], sizes = [1, 512], strides = [1, 1]} : vector<9x512xf32> to vector<1x512xf32>
    %63 = vector.broadcast %62 : vector<1x512xf32> to vector<3x512xf32>
    %64 = arith.mulf %61, %63 : vector<3x512xf32>
    %65 = arith.truncf %64 : vector<3x512xf32> to vector<3x512xbf16>
    %66 = vector.extract_strided_slice %4 {offsets = [5, 0, 0], sizes = [1, 16, 3], strides = [1, 1, 1]} : vector<9x16x3xbf16> to vector<1x16x3xbf16>
    %67 = vector.shape_cast %66 : vector<1x16x3xbf16> to vector<16x3xbf16>
    %cst_13 = arith.constant dense<0.000000e+00> : vector<16x512xf32>
    %68 = tpu.matmul %67, %65, %cst_13 {dimension_numbers = #tpu.dot_dimension_numbers<[1], [0], [0], [1], [0, 0, 1, 1], [], []>} : vector<16x3xbf16>, vector<3x512xbf16>, vector<16x512xf32> -> vector<16x512xf32>
    %69 = arith.addf %58, %68 : vector<16x512xf32>
    %70 = vector.extract_strided_slice %3 {offsets = [0, 15], sizes = [3, 497], strides = [1, 1]} : vector<3x512xf32> to vector<3x497xf32>
    %71 = vector.extract_strided_slice %3 {offsets = [0, 0], sizes = [3, 15], strides = [1, 1]} : vector<3x512xf32> to vector<3x15xf32>
    %72 = tpu.concatenate %70, %71 in 1 : vector<3x497xf32>, vector<3x15xf32> -> vector<3x512xf32>
    %73 = vector.extract_strided_slice %2 {offsets = [6, 0], sizes = [1, 512], strides = [1, 1]} : vector<9x512xf32> to vector<1x512xf32>
    %74 = vector.broadcast %73 : vector<1x512xf32> to vector<3x512xf32>
    %75 = arith.mulf %72, %74 : vector<3x512xf32>
    %76 = arith.truncf %75 : vector<3x512xf32> to vector<3x512xbf16>
    %77 = vector.extract_strided_slice %4 {offsets = [6, 0, 0], sizes = [1, 16, 3], strides = [1, 1, 1]} : vector<9x16x3xbf16> to vector<1x16x3xbf16>
    %78 = vector.shape_cast %77 : vector<1x16x3xbf16> to vector<16x3xbf16>
    %cst_14 = arith.constant dense<0.000000e+00> : vector<16x512xf32>
    %79 = tpu.matmul %78, %76, %cst_14 {dimension_numbers = #tpu.dot_dimension_numbers<[1], [0], [0], [1], [0, 0, 1, 1], [], []>} : vector<16x3xbf16>, vector<3x512xbf16>, vector<16x512xf32> -> vector<16x512xf32>
    %80 = arith.addf %69, %79 : vector<16x512xf32>
    %81 = vector.extract_strided_slice %3 {offsets = [0, 16], sizes = [3, 496], strides = [1, 1]} : vector<3x512xf32> to vector<3x496xf32>
    %82 = vector.extract_strided_slice %3 {offsets = [0, 0], sizes = [3, 16], strides = [1, 1]} : vector<3x512xf32> to vector<3x16xf32>
    %83 = tpu.concatenate %81, %82 in 1 : vector<3x496xf32>, vector<3x16xf32> -> vector<3x512xf32>
    %84 = vector.extract_strided_slice %2 {offsets = [7, 0], sizes = [1, 512], strides = [1, 1]} : vector<9x512xf32> to vector<1x512xf32>
    %85 = vector.broadcast %84 : vector<1x512xf32> to vector<3x512xf32>
    %86 = arith.mulf %83, %85 : vector<3x512xf32>
    %87 = arith.truncf %86 : vector<3x512xf32> to vector<3x512xbf16>
    %88 = vector.extract_strided_slice %4 {offsets = [7, 0, 0], sizes = [1, 16, 3], strides = [1, 1, 1]} : vector<9x16x3xbf16> to vector<1x16x3xbf16>
    %89 = vector.shape_cast %88 : vector<1x16x3xbf16> to vector<16x3xbf16>
    %cst_15 = arith.constant dense<0.000000e+00> : vector<16x512xf32>
    %90 = tpu.matmul %89, %87, %cst_15 {dimension_numbers = #tpu.dot_dimension_numbers<[1], [0], [0], [1], [0, 0, 1, 1], [], []>} : vector<16x3xbf16>, vector<3x512xbf16>, vector<16x512xf32> -> vector<16x512xf32>
    %91 = arith.addf %80, %90 : vector<16x512xf32>
    %92 = vector.extract_strided_slice %3 {offsets = [0, 17], sizes = [3, 495], strides = [1, 1]} : vector<3x512xf32> to vector<3x495xf32>
    %93 = vector.extract_strided_slice %3 {offsets = [0, 0], sizes = [3, 17], strides = [1, 1]} : vector<3x512xf32> to vector<3x17xf32>
    %94 = tpu.concatenate %92, %93 in 1 : vector<3x495xf32>, vector<3x17xf32> -> vector<3x512xf32>
    %95 = vector.extract_strided_slice %2 {offsets = [8, 0], sizes = [1, 512], strides = [1, 1]} : vector<9x512xf32> to vector<1x512xf32>
    %96 = vector.broadcast %95 : vector<1x512xf32> to vector<3x512xf32>
    %97 = arith.mulf %94, %96 : vector<3x512xf32>
    %98 = arith.truncf %97 : vector<3x512xf32> to vector<3x512xbf16>
    %99 = vector.extract_strided_slice %4 {offsets = [8, 0, 0], sizes = [1, 16, 3], strides = [1, 1, 1]} : vector<9x16x3xbf16> to vector<1x16x3xbf16>
    %100 = vector.shape_cast %99 : vector<1x16x3xbf16> to vector<16x3xbf16>
    %cst_16 = arith.constant dense<0.000000e+00> : vector<16x512xf32>
    %101 = tpu.matmul %100, %98, %cst_16 {dimension_numbers = #tpu.dot_dimension_numbers<[1], [0], [0], [1], [0, 0, 1, 1], [], []>} : vector<16x3xbf16>, vector<3x512xbf16>, vector<16x512xf32> -> vector<16x512xf32>
    %102 = arith.addf %91, %101 : vector<16x512xf32>
    %103 = vector.broadcast %5 : vector<16x1xf32> to vector<16x512xf32>
    %104 = arith.addf %102, %103 : vector<16x512xf32>
    %cst_17 = arith.constant 0.000000e+00 : f32
    %105 = vector.broadcast %cst_17 : f32 to vector<16x512xf32>
    %106 = arith.maximumf %104, %105 : vector<16x512xf32>
    %c0_18 = arith.constant 0 : index
    %c0_19 = arith.constant 0 : index
    %c0_20 = arith.constant 0 : index
    %107 = vector.load %arg4[%c0_18, %c0_19, %c0_20] : memref<9x32x16xbf16, #tpu.memory_space<vmem>>, vector<9x32x16xbf16>
    %c0_21 = arith.constant 0 : index
    %c0_22 = arith.constant 0 : index
    %108 = vector.load %arg5[%c0_21, %c0_22] : memref<32x1xf32, #tpu.memory_space<vmem>>, vector<32x1xf32>
    %cst_23 = arith.constant 0.000000e+00 : f32
    %109 = vector.broadcast %cst_23 : f32 to vector<32x512xf32>
    %110 = vector.extract_strided_slice %106 {offsets = [0, 495], sizes = [16, 17], strides = [1, 1]} : vector<16x512xf32> to vector<16x17xf32>
    %111 = vector.extract_strided_slice %106 {offsets = [0, 0], sizes = [16, 495], strides = [1, 1]} : vector<16x512xf32> to vector<16x495xf32>
    %112 = tpu.concatenate %110, %111 in 1 : vector<16x17xf32>, vector<16x495xf32> -> vector<16x512xf32>
    %113 = vector.extract_strided_slice %2 {offsets = [0, 0], sizes = [1, 512], strides = [1, 1]} : vector<9x512xf32> to vector<1x512xf32>
    %114 = vector.broadcast %113 : vector<1x512xf32> to vector<16x512xf32>
    %115 = arith.mulf %112, %114 : vector<16x512xf32>
    %116 = arith.truncf %115 : vector<16x512xf32> to vector<16x512xbf16>
    %117 = vector.extract_strided_slice %107 {offsets = [0, 0, 0], sizes = [1, 32, 16], strides = [1, 1, 1]} : vector<9x32x16xbf16> to vector<1x32x16xbf16>
    %118 = vector.shape_cast %117 : vector<1x32x16xbf16> to vector<32x16xbf16>
    %cst_24 = arith.constant dense<0.000000e+00> : vector<32x512xf32>
    %119 = tpu.matmul %118, %116, %cst_24 {dimension_numbers = #tpu.dot_dimension_numbers<[1], [0], [0], [1], [0, 0, 1, 1], [], []>} : vector<32x16xbf16>, vector<16x512xbf16>, vector<32x512xf32> -> vector<32x512xf32>
    %120 = arith.addf %109, %119 : vector<32x512xf32>
    %121 = vector.extract_strided_slice %106 {offsets = [0, 496], sizes = [16, 16], strides = [1, 1]} : vector<16x512xf32> to vector<16x16xf32>
    %122 = vector.extract_strided_slice %106 {offsets = [0, 0], sizes = [16, 496], strides = [1, 1]} : vector<16x512xf32> to vector<16x496xf32>
    %123 = tpu.concatenate %121, %122 in 1 : vector<16x16xf32>, vector<16x496xf32> -> vector<16x512xf32>
    %124 = vector.extract_strided_slice %2 {offsets = [1, 0], sizes = [1, 512], strides = [1, 1]} : vector<9x512xf32> to vector<1x512xf32>
    %125 = vector.broadcast %124 : vector<1x512xf32> to vector<16x512xf32>
    %126 = arith.mulf %123, %125 : vector<16x512xf32>
    %127 = arith.truncf %126 : vector<16x512xf32> to vector<16x512xbf16>
    %128 = vector.extract_strided_slice %107 {offsets = [1, 0, 0], sizes = [1, 32, 16], strides = [1, 1, 1]} : vector<9x32x16xbf16> to vector<1x32x16xbf16>
    %129 = vector.shape_cast %128 : vector<1x32x16xbf16> to vector<32x16xbf16>
    %cst_25 = arith.constant dense<0.000000e+00> : vector<32x512xf32>
    %130 = tpu.matmul %129, %127, %cst_25 {dimension_numbers = #tpu.dot_dimension_numbers<[1], [0], [0], [1], [0, 0, 1, 1], [], []>} : vector<32x16xbf16>, vector<16x512xbf16>, vector<32x512xf32> -> vector<32x512xf32>
    %131 = arith.addf %120, %130 : vector<32x512xf32>
    %132 = vector.extract_strided_slice %106 {offsets = [0, 497], sizes = [16, 15], strides = [1, 1]} : vector<16x512xf32> to vector<16x15xf32>
    %133 = vector.extract_strided_slice %106 {offsets = [0, 0], sizes = [16, 497], strides = [1, 1]} : vector<16x512xf32> to vector<16x497xf32>
    %134 = tpu.concatenate %132, %133 in 1 : vector<16x15xf32>, vector<16x497xf32> -> vector<16x512xf32>
    %135 = vector.extract_strided_slice %2 {offsets = [2, 0], sizes = [1, 512], strides = [1, 1]} : vector<9x512xf32> to vector<1x512xf32>
    %136 = vector.broadcast %135 : vector<1x512xf32> to vector<16x512xf32>
    %137 = arith.mulf %134, %136 : vector<16x512xf32>
    %138 = arith.truncf %137 : vector<16x512xf32> to vector<16x512xbf16>
    %139 = vector.extract_strided_slice %107 {offsets = [2, 0, 0], sizes = [1, 32, 16], strides = [1, 1, 1]} : vector<9x32x16xbf16> to vector<1x32x16xbf16>
    %140 = vector.shape_cast %139 : vector<1x32x16xbf16> to vector<32x16xbf16>
    %cst_26 = arith.constant dense<0.000000e+00> : vector<32x512xf32>
    %141 = tpu.matmul %140, %138, %cst_26 {dimension_numbers = #tpu.dot_dimension_numbers<[1], [0], [0], [1], [0, 0, 1, 1], [], []>} : vector<32x16xbf16>, vector<16x512xbf16>, vector<32x512xf32> -> vector<32x512xf32>
    %142 = arith.addf %131, %141 : vector<32x512xf32>
    %143 = vector.extract_strided_slice %106 {offsets = [0, 511], sizes = [16, 1], strides = [1, 1]} : vector<16x512xf32> to vector<16x1xf32>
    %144 = vector.extract_strided_slice %106 {offsets = [0, 0], sizes = [16, 511], strides = [1, 1]} : vector<16x512xf32> to vector<16x511xf32>
    %145 = tpu.concatenate %143, %144 in 1 : vector<16x1xf32>, vector<16x511xf32> -> vector<16x512xf32>
    %146 = vector.extract_strided_slice %2 {offsets = [3, 0], sizes = [1, 512], strides = [1, 1]} : vector<9x512xf32> to vector<1x512xf32>
    %147 = vector.broadcast %146 : vector<1x512xf32> to vector<16x512xf32>
    %148 = arith.mulf %145, %147 : vector<16x512xf32>
    %149 = arith.truncf %148 : vector<16x512xf32> to vector<16x512xbf16>
    %150 = vector.extract_strided_slice %107 {offsets = [3, 0, 0], sizes = [1, 32, 16], strides = [1, 1, 1]} : vector<9x32x16xbf16> to vector<1x32x16xbf16>
    %151 = vector.shape_cast %150 : vector<1x32x16xbf16> to vector<32x16xbf16>
    %cst_27 = arith.constant dense<0.000000e+00> : vector<32x512xf32>
    %152 = tpu.matmul %151, %149, %cst_27 {dimension_numbers = #tpu.dot_dimension_numbers<[1], [0], [0], [1], [0, 0, 1, 1], [], []>} : vector<32x16xbf16>, vector<16x512xbf16>, vector<32x512xf32> -> vector<32x512xf32>
    %153 = arith.addf %142, %152 : vector<32x512xf32>
    %154 = vector.extract_strided_slice %2 {offsets = [4, 0], sizes = [1, 512], strides = [1, 1]} : vector<9x512xf32> to vector<1x512xf32>
    %155 = vector.broadcast %154 : vector<1x512xf32> to vector<16x512xf32>
    %156 = arith.mulf %106, %155 : vector<16x512xf32>
    %157 = arith.truncf %156 : vector<16x512xf32> to vector<16x512xbf16>
    %158 = vector.extract_strided_slice %107 {offsets = [4, 0, 0], sizes = [1, 32, 16], strides = [1, 1, 1]} : vector<9x32x16xbf16> to vector<1x32x16xbf16>
    %159 = vector.shape_cast %158 : vector<1x32x16xbf16> to vector<32x16xbf16>
    %cst_28 = arith.constant dense<0.000000e+00> : vector<32x512xf32>
    %160 = tpu.matmul %159, %157, %cst_28 {dimension_numbers = #tpu.dot_dimension_numbers<[1], [0], [0], [1], [0, 0, 1, 1], [], []>} : vector<32x16xbf16>, vector<16x512xbf16>, vector<32x512xf32> -> vector<32x512xf32>
    %161 = arith.addf %153, %160 : vector<32x512xf32>
    %162 = vector.extract_strided_slice %106 {offsets = [0, 1], sizes = [16, 511], strides = [1, 1]} : vector<16x512xf32> to vector<16x511xf32>
    %163 = vector.extract_strided_slice %106 {offsets = [0, 0], sizes = [16, 1], strides = [1, 1]} : vector<16x512xf32> to vector<16x1xf32>
    %164 = tpu.concatenate %162, %163 in 1 : vector<16x511xf32>, vector<16x1xf32> -> vector<16x512xf32>
    %165 = vector.extract_strided_slice %2 {offsets = [5, 0], sizes = [1, 512], strides = [1, 1]} : vector<9x512xf32> to vector<1x512xf32>
    %166 = vector.broadcast %165 : vector<1x512xf32> to vector<16x512xf32>
    %167 = arith.mulf %164, %166 : vector<16x512xf32>
    %168 = arith.truncf %167 : vector<16x512xf32> to vector<16x512xbf16>
    %169 = vector.extract_strided_slice %107 {offsets = [5, 0, 0], sizes = [1, 32, 16], strides = [1, 1, 1]} : vector<9x32x16xbf16> to vector<1x32x16xbf16>
    %170 = vector.shape_cast %169 : vector<1x32x16xbf16> to vector<32x16xbf16>
    %cst_29 = arith.constant dense<0.000000e+00> : vector<32x512xf32>
    %171 = tpu.matmul %170, %168, %cst_29 {dimension_numbers = #tpu.dot_dimension_numbers<[1], [0], [0], [1], [0, 0, 1, 1], [], []>} : vector<32x16xbf16>, vector<16x512xbf16>, vector<32x512xf32> -> vector<32x512xf32>
    %172 = arith.addf %161, %171 : vector<32x512xf32>
    %173 = vector.extract_strided_slice %106 {offsets = [0, 15], sizes = [16, 497], strides = [1, 1]} : vector<16x512xf32> to vector<16x497xf32>
    %174 = vector.extract_strided_slice %106 {offsets = [0, 0], sizes = [16, 15], strides = [1, 1]} : vector<16x512xf32> to vector<16x15xf32>
    %175 = tpu.concatenate %173, %174 in 1 : vector<16x497xf32>, vector<16x15xf32> -> vector<16x512xf32>
    %176 = vector.extract_strided_slice %2 {offsets = [6, 0], sizes = [1, 512], strides = [1, 1]} : vector<9x512xf32> to vector<1x512xf32>
    %177 = vector.broadcast %176 : vector<1x512xf32> to vector<16x512xf32>
    %178 = arith.mulf %175, %177 : vector<16x512xf32>
    %179 = arith.truncf %178 : vector<16x512xf32> to vector<16x512xbf16>
    %180 = vector.extract_strided_slice %107 {offsets = [6, 0, 0], sizes = [1, 32, 16], strides = [1, 1, 1]} : vector<9x32x16xbf16> to vector<1x32x16xbf16>
    %181 = vector.shape_cast %180 : vector<1x32x16xbf16> to vector<32x16xbf16>
    %cst_30 = arith.constant dense<0.000000e+00> : vector<32x512xf32>
    %182 = tpu.matmul %181, %179, %cst_30 {dimension_numbers = #tpu.dot_dimension_numbers<[1], [0], [0], [1], [0, 0, 1, 1], [], []>} : vector<32x16xbf16>, vector<16x512xbf16>, vector<32x512xf32> -> vector<32x512xf32>
    %183 = arith.addf %172, %182 : vector<32x512xf32>
    %184 = vector.extract_strided_slice %106 {offsets = [0, 16], sizes = [16, 496], strides = [1, 1]} : vector<16x512xf32> to vector<16x496xf32>
    %185 = vector.extract_strided_slice %106 {offsets = [0, 0], sizes = [16, 16], strides = [1, 1]} : vector<16x512xf32> to vector<16x16xf32>
    %186 = tpu.concatenate %184, %185 in 1 : vector<16x496xf32>, vector<16x16xf32> -> vector<16x512xf32>
    %187 = vector.extract_strided_slice %2 {offsets = [7, 0], sizes = [1, 512], strides = [1, 1]} : vector<9x512xf32> to vector<1x512xf32>
    %188 = vector.broadcast %187 : vector<1x512xf32> to vector<16x512xf32>
    %189 = arith.mulf %186, %188 : vector<16x512xf32>
    %190 = arith.truncf %189 : vector<16x512xf32> to vector<16x512xbf16>
    %191 = vector.extract_strided_slice %107 {offsets = [7, 0, 0], sizes = [1, 32, 16], strides = [1, 1, 1]} : vector<9x32x16xbf16> to vector<1x32x16xbf16>
    %192 = vector.shape_cast %191 : vector<1x32x16xbf16> to vector<32x16xbf16>
    %cst_31 = arith.constant dense<0.000000e+00> : vector<32x512xf32>
    %193 = tpu.matmul %192, %190, %cst_31 {dimension_numbers = #tpu.dot_dimension_numbers<[1], [0], [0], [1], [0, 0, 1, 1], [], []>} : vector<32x16xbf16>, vector<16x512xbf16>, vector<32x512xf32> -> vector<32x512xf32>
    %194 = arith.addf %183, %193 : vector<32x512xf32>
    %195 = vector.extract_strided_slice %106 {offsets = [0, 17], sizes = [16, 495], strides = [1, 1]} : vector<16x512xf32> to vector<16x495xf32>
    %196 = vector.extract_strided_slice %106 {offsets = [0, 0], sizes = [16, 17], strides = [1, 1]} : vector<16x512xf32> to vector<16x17xf32>
    %197 = tpu.concatenate %195, %196 in 1 : vector<16x495xf32>, vector<16x17xf32> -> vector<16x512xf32>
    %198 = vector.extract_strided_slice %2 {offsets = [8, 0], sizes = [1, 512], strides = [1, 1]} : vector<9x512xf32> to vector<1x512xf32>
    %199 = vector.broadcast %198 : vector<1x512xf32> to vector<16x512xf32>
    %200 = arith.mulf %197, %199 : vector<16x512xf32>
    %201 = arith.truncf %200 : vector<16x512xf32> to vector<16x512xbf16>
    %202 = vector.extract_strided_slice %107 {offsets = [8, 0, 0], sizes = [1, 32, 16], strides = [1, 1, 1]} : vector<9x32x16xbf16> to vector<1x32x16xbf16>
    %203 = vector.shape_cast %202 : vector<1x32x16xbf16> to vector<32x16xbf16>
    %cst_32 = arith.constant dense<0.000000e+00> : vector<32x512xf32>
    %204 = tpu.matmul %203, %201, %cst_32 {dimension_numbers = #tpu.dot_dimension_numbers<[1], [0], [0], [1], [0, 0, 1, 1], [], []>} : vector<32x16xbf16>, vector<16x512xbf16>, vector<32x512xf32> -> vector<32x512xf32>
    %205 = arith.addf %194, %204 : vector<32x512xf32>
    %206 = vector.broadcast %108 : vector<32x1xf32> to vector<32x512xf32>
    %207 = arith.addf %205, %206 : vector<32x512xf32>
    %cst_33 = arith.constant 0.000000e+00 : f32
    %208 = vector.broadcast %cst_33 : f32 to vector<32x512xf32>
    %209 = arith.maximumf %207, %208 : vector<32x512xf32>
    %210 = vector.extract_strided_slice %209 {offsets = [0, 0], sizes = [1, 256], strides = [1, 1]} : vector<32x512xf32> to vector<1x256xf32>
    %211 = vector.extract_strided_slice %209 {offsets = [1, 0], sizes = [1, 256], strides = [1, 1]} : vector<32x512xf32> to vector<1x256xf32>
    %212 = vector.extract_strided_slice %209 {offsets = [2, 0], sizes = [1, 256], strides = [1, 1]} : vector<32x512xf32> to vector<1x256xf32>
    %213 = vector.extract_strided_slice %209 {offsets = [3, 0], sizes = [1, 256], strides = [1, 1]} : vector<32x512xf32> to vector<1x256xf32>
    %214 = vector.extract_strided_slice %209 {offsets = [4, 0], sizes = [1, 256], strides = [1, 1]} : vector<32x512xf32> to vector<1x256xf32>
    %215 = vector.extract_strided_slice %209 {offsets = [5, 0], sizes = [1, 256], strides = [1, 1]} : vector<32x512xf32> to vector<1x256xf32>
    %216 = vector.extract_strided_slice %209 {offsets = [6, 0], sizes = [1, 256], strides = [1, 1]} : vector<32x512xf32> to vector<1x256xf32>
    %217 = vector.extract_strided_slice %209 {offsets = [7, 0], sizes = [1, 256], strides = [1, 1]} : vector<32x512xf32> to vector<1x256xf32>
    %218 = vector.extract_strided_slice %209 {offsets = [8, 0], sizes = [1, 256], strides = [1, 1]} : vector<32x512xf32> to vector<1x256xf32>
    %219 = vector.extract_strided_slice %209 {offsets = [9, 0], sizes = [1, 256], strides = [1, 1]} : vector<32x512xf32> to vector<1x256xf32>
    %220 = vector.extract_strided_slice %209 {offsets = [10, 0], sizes = [1, 256], strides = [1, 1]} : vector<32x512xf32> to vector<1x256xf32>
    %221 = vector.extract_strided_slice %209 {offsets = [11, 0], sizes = [1, 256], strides = [1, 1]} : vector<32x512xf32> to vector<1x256xf32>
    %222 = vector.extract_strided_slice %209 {offsets = [12, 0], sizes = [1, 256], strides = [1, 1]} : vector<32x512xf32> to vector<1x256xf32>
    %223 = vector.extract_strided_slice %209 {offsets = [13, 0], sizes = [1, 256], strides = [1, 1]} : vector<32x512xf32> to vector<1x256xf32>
    %224 = vector.extract_strided_slice %209 {offsets = [14, 0], sizes = [1, 256], strides = [1, 1]} : vector<32x512xf32> to vector<1x256xf32>
    %225 = vector.extract_strided_slice %209 {offsets = [15, 0], sizes = [1, 256], strides = [1, 1]} : vector<32x512xf32> to vector<1x256xf32>
    %226 = vector.extract_strided_slice %209 {offsets = [16, 0], sizes = [1, 256], strides = [1, 1]} : vector<32x512xf32> to vector<1x256xf32>
    %227 = vector.extract_strided_slice %209 {offsets = [17, 0], sizes = [1, 256], strides = [1, 1]} : vector<32x512xf32> to vector<1x256xf32>
    %228 = vector.extract_strided_slice %209 {offsets = [18, 0], sizes = [1, 256], strides = [1, 1]} : vector<32x512xf32> to vector<1x256xf32>
    %229 = vector.extract_strided_slice %209 {offsets = [19, 0], sizes = [1, 256], strides = [1, 1]} : vector<32x512xf32> to vector<1x256xf32>
    %230 = vector.extract_strided_slice %209 {offsets = [20, 0], sizes = [1, 256], strides = [1, 1]} : vector<32x512xf32> to vector<1x256xf32>
    %231 = vector.extract_strided_slice %209 {offsets = [21, 0], sizes = [1, 256], strides = [1, 1]} : vector<32x512xf32> to vector<1x256xf32>
    %232 = vector.extract_strided_slice %209 {offsets = [22, 0], sizes = [1, 256], strides = [1, 1]} : vector<32x512xf32> to vector<1x256xf32>
    %233 = vector.extract_strided_slice %209 {offsets = [23, 0], sizes = [1, 256], strides = [1, 1]} : vector<32x512xf32> to vector<1x256xf32>
    %234 = vector.extract_strided_slice %209 {offsets = [24, 0], sizes = [1, 256], strides = [1, 1]} : vector<32x512xf32> to vector<1x256xf32>
    %235 = vector.extract_strided_slice %209 {offsets = [25, 0], sizes = [1, 256], strides = [1, 1]} : vector<32x512xf32> to vector<1x256xf32>
    %236 = vector.extract_strided_slice %209 {offsets = [26, 0], sizes = [1, 256], strides = [1, 1]} : vector<32x512xf32> to vector<1x256xf32>
    %237 = vector.extract_strided_slice %209 {offsets = [27, 0], sizes = [1, 256], strides = [1, 1]} : vector<32x512xf32> to vector<1x256xf32>
    %238 = vector.extract_strided_slice %209 {offsets = [28, 0], sizes = [1, 256], strides = [1, 1]} : vector<32x512xf32> to vector<1x256xf32>
    %239 = vector.extract_strided_slice %209 {offsets = [29, 0], sizes = [1, 256], strides = [1, 1]} : vector<32x512xf32> to vector<1x256xf32>
    %240 = vector.extract_strided_slice %209 {offsets = [30, 0], sizes = [1, 256], strides = [1, 1]} : vector<32x512xf32> to vector<1x256xf32>
    %241 = vector.extract_strided_slice %209 {offsets = [31, 0], sizes = [1, 256], strides = [1, 1]} : vector<32x512xf32> to vector<1x256xf32>
    %242 = tpu.concatenate %210, %211, %212, %213, %214, %215, %216, %217, %218, %219, %220, %221, %222, %223, %224, %225 in 1 : vector<1x256xf32>, vector<1x256xf32>, vector<1x256xf32>, vector<1x256xf32>, vector<1x256xf32>, vector<1x256xf32>, vector<1x256xf32>, vector<1x256xf32>, vector<1x256xf32>, vector<1x256xf32>, vector<1x256xf32>, vector<1x256xf32>, vector<1x256xf32>, vector<1x256xf32>, vector<1x256xf32>, vector<1x256xf32> -> vector<1x4096xf32>
    %243 = tpu.concatenate %226, %227, %228, %229, %230, %231, %232, %233, %234, %235, %236, %237, %238, %239, %240, %241 in 1 : vector<1x256xf32>, vector<1x256xf32>, vector<1x256xf32>, vector<1x256xf32>, vector<1x256xf32>, vector<1x256xf32>, vector<1x256xf32>, vector<1x256xf32>, vector<1x256xf32>, vector<1x256xf32>, vector<1x256xf32>, vector<1x256xf32>, vector<1x256xf32>, vector<1x256xf32>, vector<1x256xf32>, vector<1x256xf32> -> vector<1x4096xf32>
    %244 = tpu.concatenate %242, %243 in 1 : vector<1x4096xf32>, vector<1x4096xf32> -> vector<1x8192xf32>
    %245 = vector.extract_strided_slice %209 {offsets = [0, 256], sizes = [1, 256], strides = [1, 1]} : vector<32x512xf32> to vector<1x256xf32>
    %246 = vector.extract_strided_slice %209 {offsets = [1, 256], sizes = [1, 256], strides = [1, 1]} : vector<32x512xf32> to vector<1x256xf32>
    %247 = vector.extract_strided_slice %209 {offsets = [2, 256], sizes = [1, 256], strides = [1, 1]} : vector<32x512xf32> to vector<1x256xf32>
    %248 = vector.extract_strided_slice %209 {offsets = [3, 256], sizes = [1, 256], strides = [1, 1]} : vector<32x512xf32> to vector<1x256xf32>
    %249 = vector.extract_strided_slice %209 {offsets = [4, 256], sizes = [1, 256], strides = [1, 1]} : vector<32x512xf32> to vector<1x256xf32>
    %250 = vector.extract_strided_slice %209 {offsets = [5, 256], sizes = [1, 256], strides = [1, 1]} : vector<32x512xf32> to vector<1x256xf32>
    %251 = vector.extract_strided_slice %209 {offsets = [6, 256], sizes = [1, 256], strides = [1, 1]} : vector<32x512xf32> to vector<1x256xf32>
    %252 = vector.extract_strided_slice %209 {offsets = [7, 256], sizes = [1, 256], strides = [1, 1]} : vector<32x512xf32> to vector<1x256xf32>
    %253 = vector.extract_strided_slice %209 {offsets = [8, 256], sizes = [1, 256], strides = [1, 1]} : vector<32x512xf32> to vector<1x256xf32>
    %254 = vector.extract_strided_slice %209 {offsets = [9, 256], sizes = [1, 256], strides = [1, 1]} : vector<32x512xf32> to vector<1x256xf32>
    %255 = vector.extract_strided_slice %209 {offsets = [10, 256], sizes = [1, 256], strides = [1, 1]} : vector<32x512xf32> to vector<1x256xf32>
    %256 = vector.extract_strided_slice %209 {offsets = [11, 256], sizes = [1, 256], strides = [1, 1]} : vector<32x512xf32> to vector<1x256xf32>
    %257 = vector.extract_strided_slice %209 {offsets = [12, 256], sizes = [1, 256], strides = [1, 1]} : vector<32x512xf32> to vector<1x256xf32>
    %258 = vector.extract_strided_slice %209 {offsets = [13, 256], sizes = [1, 256], strides = [1, 1]} : vector<32x512xf32> to vector<1x256xf32>
    %259 = vector.extract_strided_slice %209 {offsets = [14, 256], sizes = [1, 256], strides = [1, 1]} : vector<32x512xf32> to vector<1x256xf32>
    %260 = vector.extract_strided_slice %209 {offsets = [15, 256], sizes = [1, 256], strides = [1, 1]} : vector<32x512xf32> to vector<1x256xf32>
    %261 = vector.extract_strided_slice %209 {offsets = [16, 256], sizes = [1, 256], strides = [1, 1]} : vector<32x512xf32> to vector<1x256xf32>
    %262 = vector.extract_strided_slice %209 {offsets = [17, 256], sizes = [1, 256], strides = [1, 1]} : vector<32x512xf32> to vector<1x256xf32>
    %263 = vector.extract_strided_slice %209 {offsets = [18, 256], sizes = [1, 256], strides = [1, 1]} : vector<32x512xf32> to vector<1x256xf32>
    %264 = vector.extract_strided_slice %209 {offsets = [19, 256], sizes = [1, 256], strides = [1, 1]} : vector<32x512xf32> to vector<1x256xf32>
    %265 = vector.extract_strided_slice %209 {offsets = [20, 256], sizes = [1, 256], strides = [1, 1]} : vector<32x512xf32> to vector<1x256xf32>
    %266 = vector.extract_strided_slice %209 {offsets = [21, 256], sizes = [1, 256], strides = [1, 1]} : vector<32x512xf32> to vector<1x256xf32>
    %267 = vector.extract_strided_slice %209 {offsets = [22, 256], sizes = [1, 256], strides = [1, 1]} : vector<32x512xf32> to vector<1x256xf32>
    %268 = vector.extract_strided_slice %209 {offsets = [23, 256], sizes = [1, 256], strides = [1, 1]} : vector<32x512xf32> to vector<1x256xf32>
    %269 = vector.extract_strided_slice %209 {offsets = [24, 256], sizes = [1, 256], strides = [1, 1]} : vector<32x512xf32> to vector<1x256xf32>
    %270 = vector.extract_strided_slice %209 {offsets = [25, 256], sizes = [1, 256], strides = [1, 1]} : vector<32x512xf32> to vector<1x256xf32>
    %271 = vector.extract_strided_slice %209 {offsets = [26, 256], sizes = [1, 256], strides = [1, 1]} : vector<32x512xf32> to vector<1x256xf32>
    %272 = vector.extract_strided_slice %209 {offsets = [27, 256], sizes = [1, 256], strides = [1, 1]} : vector<32x512xf32> to vector<1x256xf32>
    %273 = vector.extract_strided_slice %209 {offsets = [28, 256], sizes = [1, 256], strides = [1, 1]} : vector<32x512xf32> to vector<1x256xf32>
    %274 = vector.extract_strided_slice %209 {offsets = [29, 256], sizes = [1, 256], strides = [1, 1]} : vector<32x512xf32> to vector<1x256xf32>
    %275 = vector.extract_strided_slice %209 {offsets = [30, 256], sizes = [1, 256], strides = [1, 1]} : vector<32x512xf32> to vector<1x256xf32>
    %276 = vector.extract_strided_slice %209 {offsets = [31, 256], sizes = [1, 256], strides = [1, 1]} : vector<32x512xf32> to vector<1x256xf32>
    %277 = tpu.concatenate %245, %246, %247, %248, %249, %250, %251, %252, %253, %254, %255, %256, %257, %258, %259, %260 in 1 : vector<1x256xf32>, vector<1x256xf32>, vector<1x256xf32>, vector<1x256xf32>, vector<1x256xf32>, vector<1x256xf32>, vector<1x256xf32>, vector<1x256xf32>, vector<1x256xf32>, vector<1x256xf32>, vector<1x256xf32>, vector<1x256xf32>, vector<1x256xf32>, vector<1x256xf32>, vector<1x256xf32>, vector<1x256xf32> -> vector<1x4096xf32>
    %278 = tpu.concatenate %261, %262, %263, %264, %265, %266, %267, %268, %269, %270, %271, %272, %273, %274, %275, %276 in 1 : vector<1x256xf32>, vector<1x256xf32>, vector<1x256xf32>, vector<1x256xf32>, vector<1x256xf32>, vector<1x256xf32>, vector<1x256xf32>, vector<1x256xf32>, vector<1x256xf32>, vector<1x256xf32>, vector<1x256xf32>, vector<1x256xf32>, vector<1x256xf32>, vector<1x256xf32>, vector<1x256xf32>, vector<1x256xf32> -> vector<1x4096xf32>
    %279 = tpu.concatenate %277, %278 in 1 : vector<1x4096xf32>, vector<1x4096xf32> -> vector<1x8192xf32>
    %280 = tpu.concatenate %244, %279 in 0 : vector<1x8192xf32>, vector<1x8192xf32> -> vector<2x8192xf32>
    %281 = arith.truncf %280 : vector<2x8192xf32> to vector<2x8192xbf16>
    %c0_i32_34 = arith.constant 0 : i32
    %282 = tpu.memref_slice %arg12[%c0_i32_34] : memref<1x!tpu.dma_semaphore, #tpu.memory_space<semaphore_mem>> -> memref<1x!tpu.dma_semaphore, #tpu.memory_space<semaphore_mem>>
    %283 = tpu.memref_squeeze %282 : memref<1x!tpu.dma_semaphore, #tpu.memory_space<semaphore_mem>> -> memref<!tpu.dma_semaphore, #tpu.memory_space<semaphore_mem>>
    tpu.wait_dma2 semaphore(%283 : memref<!tpu.dma_semaphore, #tpu.memory_space<semaphore_mem>>) src(%arg6 : memref<8192x256xbf16, #tpu.memory_space<any>>) dst(%arg11 : memref<8192x256xbf16, #tpu.memory_space<vmem>>)
    %c0_35 = arith.constant 0 : index
    %c0_36 = arith.constant 0 : index
    %284 = vector.load %arg11[%c0_35, %c0_36] : memref<8192x256xbf16, #tpu.memory_space<vmem>>, vector<8192x256xbf16>
    %cst_37 = arith.constant dense<0.000000e+00> : vector<2x256xf32>
    %285 = tpu.matmul %281, %284, %cst_37 {dimension_numbers = #tpu.dot_dimension_numbers<[1], [0], [0], [1], [0, 0, 1, 1], [], []>} : vector<2x8192xbf16>, vector<8192x256xbf16>, vector<2x256xf32> -> vector<2x256xf32>
    %c0_38 = arith.constant 0 : index
    %c0_39 = arith.constant 0 : index
    %286 = vector.load %arg7[%c0_38, %c0_39] : memref<1x256xf32, #tpu.memory_space<vmem>>, vector<1x256xf32>
    %287 = vector.broadcast %286 : vector<1x256xf32> to vector<2x256xf32>
    %288 = arith.addf %285, %287 : vector<2x256xf32>
    %cst_40 = arith.constant 0.000000e+00 : f32
    %289 = vector.broadcast %cst_40 : f32 to vector<2x256xf32>
    %290 = arith.maximumf %288, %289 : vector<2x256xf32>
    %c0_41 = arith.constant 0 : index
    %c0_42 = arith.constant 0 : index
    %291 = vector.load %arg8[%c0_41, %c0_42] : memref<256x4xf32, #tpu.memory_space<vmem>>, vector<256x4xf32>
    %cst_43 = arith.constant dense<0.000000e+00> : vector<2x4xf32>
    %292 = tpu.matmul %290, %291, %cst_43 {dimension_numbers = #tpu.dot_dimension_numbers<[1], [0], [0], [1], [0, 0, 1, 1], [], []>} : vector<2x256xf32>, vector<256x4xf32>, vector<2x4xf32> -> vector<2x4xf32>
    %c0_44 = arith.constant 0 : index
    %c0_45 = arith.constant 0 : index
    %293 = vector.load %arg9[%c0_44, %c0_45] : memref<1x4xf32, #tpu.memory_space<vmem>>, vector<1x4xf32>
    %294 = vector.broadcast %293 : vector<1x4xf32> to vector<2x4xf32>
    %295 = arith.addf %292, %294 : vector<2x4xf32>
    %c0_46 = arith.constant 0 : index
    %c0_47 = arith.constant 0 : index
    %296 = vector.load %arg10[%c0_46, %c0_47] : memref<2x4xf32, #tpu.memory_space<vmem>>, vector<2x4xf32>
    tpu.vector_store %arg10[%c0_46, %c0_47], %295 {strides = array<i32>} : memref<2x4xf32, #tpu.memory_space<vmem>>, vector<2x4xf32>,
    return
  }
}

</mosaic_0001>

<bundles_post_ra>
// kernel: image_cnn_forward.1
= control target key start
LH: loop header
LB: loop body
LE: loop exit
PB: predicated region body
PF: predicated region fallthrough
CT: control target
= control target key end

     0   :  { %15 = vsyncpa [#allocation5], 0  ;;  %s8653_s0 = inlined_call_operand.hbm [shape: f32[9,512], index: 0, kind: input, shape index: {}]   ;;  %s8654_s1 = inlined_call_operand.vmem [shape: f32[3,512], index: 1, kind: input, shape index: {}]   ;;  %s8655_s2 = inlined_call_operand.vmem [shape: bf16[9,16,3], index: 2, kind: input, shape index: {}]   ;;  %s8656_s3 = inlined_call_operand.vmem [shape: f32[16,1], index: 3, kind: input, shape index: {}]   ;;  %s8657_s4 = inlined_call_operand.vmem [shape: bf16[9,32,16], index: 4, kind: input, shape index: {}]   ;;  %s8658_s5 = inlined_call_operand.vmem [shape: f32[32,1], index: 5, kind: input, shape index: {}]   ;;  %s8659_s6 = inlined_call_operand.hbm [shape: bf16[8192,256], index: 6, kind: input, shape index: {}]   ;;  %s8660_s7 = inlined_call_operand.hbm [shape: f32[1,256], index: 7, kind: input, shape index: {}]   ;;  %s8661_s8 = inlined_call_operand.vmem [shape: f32[256,4], index: 8, kind: input, shape index: {}]   ;;  %s8662_s9 = inlined_call_operand.hbm [shape: f32[1,4], index: 9, kind: input, shape index: {}]   ;;  %s8663_s10 = inlined_call_operand.hbm [shape: f32[2,4], index: 10, kind: output, shape index: {}]  }
   0x1   :  { %16 = vsyncpa [#allocation8], 0 }
   0x2   :  { %17 = vsyncpa [#allocation6], 0  ;;  %s6834_s13 = smov [#allocation7]   ;;  %s6835_s15 = smov [#allocation4]  }
   0x3   :  { %s46_s14 = sshll.u32 %s6834_s13, 4  ;;  %s23_s16 = sshll.u32 %s6835_s15, 4  ;;  %s47_s14 = int_to_ptr.vmem [resolvable:$true] %s46_s14  ;;  %s6913_s16 = int_to_ptr.vmem [resolvable:$true] %s23_s16 }
   0x4   :  { %s6738_s19 = scalar_lea.hbm %s8660_s7, 32 }
   0x5   :  { %p6739_p0 = scmp.ne.s32.totalorder %s8660_s7, %s6738_s19  ;;  %p6742_p1 = scmp.lt.u32.totalorder %s6738_s19, %s8660_s7 }
   0x7   :  { %p6744_p2 = pnand %p6742_p1, %p6739_p0 }
   0x9   :  { %6747 = shalt.err (!%p6744_p2)
}
   0xa   :  { %s6748_s24 = scalar_lea.vmem %s47_s14, 32  ;;  %p6753_p4 = scmp.lt.s32.totalorder %s47_s14, %s47_s14 }
   0xb   :  { %p6749_p3 = scmp.ne.s32.totalorder %s47_s14, %s6748_s24  ;;  %p6754_p5 = scmp.lt.s32.totalorder %s6748_s24, %s6748_s24 }
   0xd   :  { %p6755_p6 = por %p6754_p5, %p6753_p4 }
   0xf   :  { %p6756_p7 = pnand %p6755_p6, %p6749_p3 }
  0x11   :  { %6759 = shalt.err (!%p6756_p7)
}
  0x12   :  { %49 = dma.hbm_to_vmem [thread:$0]  %s8660_s7, 32, %s47_s14, [#allocation8]  }
  0x13   :  { %s6760_s29 = scalar_lea.hbm %s8653_s0, 1024 }
  0x14   :  { %p6761_p8 = scmp.ne.s32.totalorder %s8653_s0, %s6760_s29  ;;  %p6764_p9 = scmp.lt.u32.totalorder %s6760_s29, %s8653_s0 }
  0x16   :  { %p6766_p10 = pnand %p6764_p9, %p6761_p8 }
  0x18   :  { %6769 = shalt.err (!%p6766_p10)
}
  0x19   :  { %s6770_s15 = scalar_lea.vmem %s6913_s16, 1024  ;;  %p6775_p12 = scmp.lt.s32.totalorder %s6913_s16, %s6913_s16 }
  0x1a   :  { %p6771_p11 = scmp.ne.s32.totalorder %s6913_s16, %s6770_s15  ;;  %p6776_p13 = scmp.lt.s32.totalorder %s6770_s15, %s6770_s15 }
  0x1c   :  { %p6777_p0 = por %p6776_p13, %p6775_p12 }
  0x1e   :  { %p6778_p1 = pnand %p6777_p0, %p6771_p11 }
  0x20   :  { %6781 = shalt.err (!%p6778_p1)
}
  0x21   :  { %s6836_s7 = smov 512   ;;  %s6837_s14 = smov 32  }
  0x22   :  { %29 = dma.hbm_to_vmem [thread:$0]  %s8653_s0, 1024, %s6913_s16, [#allocation5], %s6836_s7, %s6836_s7, %s6837_s14  }
  0x23   :  { %s6838_s19 = smov [#allocation9]   ;;  %s6782_s23 = scalar_lea.hbm %s8662_s9, 16 }
  0x24   :  { %s58_s20 = sshll.u32 %s6838_s19, 4  ;;  %p6783_p2 = scmp.ne.s32.totalorder %s8662_s9, %s6782_s23  ;;  %s59_s20 = int_to_ptr.vmem [resolvable:$true] %s58_s20 }
  0x25   :  { %p6786_p3 = scmp.lt.u32.totalorder %s6782_s23, %s8662_s9 }
  0x27   :  { %p6788_p4 = pnand %p6786_p3, %p6783_p2 }
  0x29   :  { %6791 = shalt.err (!%p6788_p4)
}
  0x2a   :  { %s6792_s28 = scalar_lea.vmem %s59_s20, 16  ;;  %s6796_s0 = scalar_lea.vmem %s59_s20, 32 }
  0x2b   :  { %p6793_p5 = scmp.ne.s32.totalorder %s59_s20, %s6792_s28  ;;  %p6797_p6 = scmp.lt.s32.totalorder %s59_s20, %s59_s20 }
  0x2c   :  { %p6798_p7 = scmp.lt.s32.totalorder %s6796_s0, %s6792_s28 }
  0x2e   :  { %p6799_p8 = por %p6798_p7, %p6797_p6 }
  0x30   :  { %p6800_p9 = pnand %p6799_p8, %p6793_p5 }
  0x32   :  { %6803 = shalt.err (!%p6800_p9)
}
  0x33   :  { %61 = dma.hbm_to_vmem [thread:$0]  %s8662_s9, 16, %s59_s20, [#allocation8]  }
  0x34   :  { %6826 = dma.done.wait [#allocation5], 1024  }
  0x35   :  { %6827 = vsyncadd [#allocation5], 4294966272 }
  0x36   :  { %6828 = dma.done.wait [#allocation8], 48  }
  0x37   :  { %6829 = vsyncadd [#allocation8], 4294967248  ;;  %s76_s30 = sld [smem:[#allocation0]]   ;;  %s6839_s11 = smov 256   ;;  %v6848_v4 = vmov 0   ;;  %v159_v7 = vlaneseq  ;;  %vm192_vm0 = vcmask 130048  }
  0x38   :  { %88 = sst [smem:[#allocation12]] %s6839_s11  ;;  %s6840_s12 = smov 2   ;;  %282 = vmatprep.mubr.bf16.mxu0 %v6848_v4  ;;  %325 = vmatprep.mubr.bf16.mxu1 %v6848_v4  ;;  %vm234_vm1 = vcmask 1040384   ;;  %vm235_vm2 = vcmask 1041408   ;;  %v6856_v19 = vmov 65535   ;;  %vm150_vm3 = vcmask 138240  }
  0x39   :  { %90 = sst [smem:[#allocation12 + $0x1]] %s6839_s11  ;;  %s6841_s13 = smov 64   ;;  %6708 = vset.pattern.permute.xlu1 %v6848_v4  ;;  %6707 = vset.pattern.permute.xlu0 %v6848_v4  ;;  %v7031_v8 = vshrl.u32 %v159_v7, 7  ;;  %v236_v20 = vsel %vm234_vm1, 4294967295, %v6856_v19  ;;  %vm230_vm4 = vcmask 23552   ;;  %vm451_vm5 = vcmask 121856  }
  0x3a   :  { %92 = sst [smem:[#allocation12 + $0x2]] %s6840_s12  ;;  %s6842_s15 = smov 128   ;;  %v7067_v28 = vsel %vm235_vm2, %v236_v20, 0  ;;  %vm607_vm6 = vcmask 7168   ;;  %vm912_vm7 = vcmask 1039360   ;;  %vm1068_vm8 = vcmask 924672  }
  0x3b   :  { %94 = sst [smem:[#allocation12 + $0x3]] %s6841_s13  ;;  %s6843_s7 = smov [#allocation2]   ;;  %v7034_v9 = vsub.s32 1, %v7031_v8  ;;  %v7055_v22 = vsub.s32 0, %v7031_v8  ;;  %v462_v46 = vsub.s32 2, %v7031_v8  ;;  %v756_v54 = vsub.s32 4, %v7031_v8 }
  0x3c   :  { %96 = sst [smem:[#allocation12 + $0x4]] %s6842_s15  ;;  %s84_s14 = sshll.u32 %s6843_s7, 4  ;;  %vm1224_vm9 = vcmask 916480   ;;  %vm1380_vm10 = vcmask 908288   ;;  %s85_s14 = int_to_ptr.vmem [resolvable:$true] %s84_s14 }
  0x3d   :  { %98 = sst [smem:[#allocation12 + $0x5]] %s6840_s12  ;;  %s6163_s17 = sshll.u32 %s76_s30, 26 }
  0x3e   :  { %100 = sst [smem:[#allocation12 + $0x6]] %s6842_s15  ;;  %s6164_s9 = sadd.s32 134217728, %s6163_s17 }
  0x3f   :  { %102 = sst [smem:[#allocation12 + $0x7]] %s6841_s13  ;;  %s6844_s18 = smov 4  }
  0x40   :  { %104 = sst [smem:[#allocation12 + $0x8]] %s6844_s18  ;;  %s6845_s19 = smov [#allocation3]  }
  0x41   :  { %s6846_s20 = smov [#allocation11]   ;;  %s6847_s27 = smov 16  }
  0x42   :  { %106 = dma.general %s8659_s6, 131072, %s85_s14, %s6845_s19, %s6846_s20, [#allocation12], %s6164_s9, 0  }
  0x43   :  { %v6962_v0 = vld [vmem:[%s8654_s1] sm:$0x77]  ;;  %v6967_v1 = vld [vmem:[%s8654_s1 + $0x8] sm:$0x77]  ;;  %s6849_s1 = smov 17   ;;  %s6850_s6 = smov 15  }
  0x44   :  { %186 = vrot.lane.b32.xlu0 %v6962_v0, %s6847_s27  ;;  %v138_v2 = vcombine.high %v6967_v1, %v6967_v1  ;;  %v143_v3 = vcombine.high %v6962_v0, %v6962_v0  ;;  %s6851_s28 = smov 1   ;;  %s6852_s0 = smov 127   ;;  %v135_v5 = vld [vmem:[%s8656_s3] sm:$0xff]  ;;  %v136_v6 = vld [vmem:[%s8656_s3 + $0x8] sm:$0xff]  ;;  %8692 = vst [vmem:[#allocation17_spill] sm:$0xff] %v7034_v9  ;;  %v7044_v14 = vld [vmem:[#allocation4 + $0x10] sm:$0xff] }
  0x45   :  { %s6853_s16 = smov 113   ;;  %s6854_s29 = smov 112   ;;  %v7036_v10 = vld [vmem:[#allocation4] sm:$0xff]  ;;  %v7038_v11 = vld [vmem:[#allocation4 + $0x8] sm:$0xff]  ;;  %v7046_v15 = vld [vmem:[#allocation4 + $0x18] sm:$0xff]  ;;  %8693 = vst [vmem:[#allocation18_spill] sm:$0xff] %v7055_v22  ;;  %v7064_v25 = vrot.slane %v7044_v14, %v7034_v9  ;;  %v7093_v49 = vrot.slane %v7044_v14, %v7055_v22 }
  0x46   :  { %183 = vrot.lane.b32.xlu1 %v138_v2, %s6847_s27  ;;  %s6855_s30 = smov 111   ;;  %v7042_v13 = vrot.slane %v7036_v10, %v7034_v9  ;;  %v7050_v17 = vrot.slane %v7038_v11, %v7034_v9  ;;  %v7060_v24 = vrot.slane %v7046_v15, %v7034_v9  ;;  %v7074_v34 = vrot.slane %v7038_v11, %v7055_v22  ;;  %v6711_v52 = vld [vmem:[%s8655_s2 + $0x8] sm:$0xff]  }
  0x47   :  { %v7080_v39 = vrot.slane %v7036_v10, %v7055_v22  ;;  %v7087_v45 = vrot.slane %v7046_v15, %v7055_v22  ;;  %v7106_v60 = vrot.slane %v7038_v11, %v462_v46  ;;  %v7120_v7 = vrot.slane %v7036_v10, %v756_v54 }
  0x48   :  { %188 = vrot.lane.b32.xlu0 %v143_v3, %s6847_s27 }
  0x4a   :  { %190 = vrot.lane.b32.xlu1 %v6967_v1, %s6847_s27 }
  0x4c   :  { %144 = vrot.lane.b32.xlu0 %v6962_v0, %s6849_s1 }
  0x4e   :  { %146 = vrot.lane.b32.xlu1 %v143_v3, %s6849_s1 }
  0x50   :  { %139 = vrot.lane.b32.xlu0 %v138_v2, %s6849_s1 }
  0x52   :  { %148 = vrot.lane.b32.xlu1 %v6967_v1, %s6849_s1 }
  0x54   :  { %445 = vrot.lane.b32.xlu0 %v6962_v0, %s6850_s6 }
  0x56   :  { %447 = vrot.lane.b32.xlu1 %v143_v3, %s6850_s6 }
  0x58   :  { %442 = vrot.lane.b32.xlu0 %v138_v2, %s6850_s6 }
  0x5a   :  { %449 = vrot.lane.b32.xlu1 %v6967_v1, %s6850_s6 }
  0x5c   :  { %601 = vrot.lane.b32.xlu0 %v6962_v0, %s6851_s28 }
  0x5e   :  { %603 = vrot.lane.b32.xlu1 %v143_v3, %s6851_s28 }
  0x60   :  { %598 = vrot.lane.b32.xlu0 %v138_v2, %s6851_s28 }
  0x62   :  { %605 = vrot.lane.b32.xlu1 %v6967_v1, %s6851_s28 }
  0x64   :  { %906 = vrot.lane.b32.xlu0 %v143_v3, %s6852_s0 }
  0x66   :  { %908 = vrot.lane.b32.xlu1 %v6967_v1, %s6852_s0 }
  0x68   :  { %904 = vrot.lane.b32.xlu0 %v6962_v0, %s6852_s0 }
  0x6a   :  { %910 = vrot.lane.b32.xlu1 %v138_v2, %s6852_s0 }
  0x6c   :  { %1062 = vrot.lane.b32.xlu0 %v143_v3, %s6853_s16 }
  0x6e   :  { %1064 = vrot.lane.b32.xlu1 %v6967_v1, %s6853_s16 }
  0x70   :  { %1060 = vrot.lane.b32.xlu0 %v6962_v0, %s6853_s16 }
  0x72   :  { %1066 = vrot.lane.b32.xlu1 %v138_v2, %s6853_s16 }
  0x74   :  { %1218 = vrot.lane.b32.xlu0 %v143_v3, %s6854_s29 }
  0x76   :  { %1220 = vrot.lane.b32.xlu1 %v6967_v1, %s6854_s29 }
  0x78   :  { %1216 = vrot.lane.b32.xlu0 %v6962_v0, %s6854_s29 }
  0x7a   :  { %1222 = vrot.lane.b32.xlu1 %v138_v2, %s6854_s29 }
  0x7c   :  { %1374 = vrot.lane.b32.xlu0 %v143_v3, %s6855_s30 }
  0x7e   :  { %1376 = vrot.lane.b32.xlu1 %v6967_v1, %s6855_s30 }
  0x80   :  { %1372 = vrot.lane.b32.xlu0 %v6962_v0, %s6855_s30 }
  0x82   :  { %1378 = vrot.lane.b32.xlu1 %v138_v2, %s6855_s30 }
  0x84   :  { %1530 = vperm.xlu0 %6707, %v135_v5   ;;  %v7113_v5 = vrot.slane %v7036_v10, %v462_v46 }
  0x86   :  { %1535 = vperm.xlu1 %6708, %v136_v6   ;;  %v7116_v6 = vrot.slane %v7044_v14, %v462_v46 }
  0xb6   :  { %v187_v12 = vpop.permute.xlu0 %186 }
  0xb8   :  { %v184_v16 = vpop.permute.xlu1 %183 }
  0xb9   :  { %v200_v18 = vsel %vm192_vm0, %v184_v16, %v187_v12 }
  0xba   :  { %v189_v21 = vpop.permute.xlu0 %188  ;;  %v217_v23 = vmul.f32 %v7042_v13, %v200_v18 }
  0xbb   :  { %v193_v26 = vsel %vm192_vm0, %v187_v12, %v189_v21  ;;  %v7123_v12 = vrot.slane %v7038_v11, %v756_v54 }
  0xbc   :  { %v191_v27 = vpop.permute.xlu1 %190  ;;  %v218_v29 = vmul.f32 %v7050_v17, %v193_v26  ;;  %v221_v31 = vpack.c.bf16 %v217_v23, %v217_v23  ;;  %v618_v23 = vsub.s32 3, %v7031_v8  ;;  %v7131_v26 = vrot.slane %v7044_v14, %v756_v54 }
  0xbd   :  { %v194_v30 = vsel %vm192_vm0, %v189_v21, %v191_v27  ;;  %v195_v32 = vsel %vm192_vm0, %v191_v27, %v184_v16  ;;  %v7134_v27 = vrot.slane %v7046_v15, %v756_v54 }
  0xbe   :  { %v145_v33 = vpop.permute.xlu0 %144  ;;  %v222_v35 = vpack.c.bf16 %v218_v29, %v218_v29  ;;  %v220_v36 = vmul.f32 %v7060_v24, %v195_v32  ;;  %v219_v37 = vmul.f32 %v7064_v25, %v194_v30  ;;  %v239_v44 = vand.u32 %v7067_v28, %v221_v31 }
  0xc0   :  { %v147_v38 = vpop.permute.xlu1 %146  ;;  %v242_v40 = vand.u32 %v7067_v28, %v222_v35  ;;  %v224_v41 = vpack.c.bf16 %v220_v36, %v220_v36  ;;  %v223_v42 = vpack.c.bf16 %v219_v37, %v219_v37 }
  0xc1   :  { %v151_v43 = vsel %vm150_vm3, %v145_v33, %v147_v38 }
  0xc2   :  { %v176_v47 = vmul.f32 %v7074_v34, %v151_v43  ;;  %v140_v48 = vpop.permute.xlu0 %139  ;;  %250 = vmatprep.subr.bf16.mxu0 %v242_v40  ;;  %v248_v50 = vand.u32 %v7067_v28, %v224_v41  ;;  %v245_v51 = vand.u32 %v7067_v28, %v223_v42  ;;  %v774_v40 = vcombine.low %v7120_v7, %v7123_v12 }
  0xc3   :  { %v158_v53 = vsel %vm150_vm3, %v140_v48, %v145_v33  ;;  %251 = vmatpush1.bf16.msra.mxu0 %v239_v44  ;;  %v7140_v33 = vrot.slane %v7046_v15, %v462_v46  ;;  %v7149_v43 = vrot.slane %v7038_v11, %v618_v23  ;;  %v775_v44 = vcombine.low %v7131_v26, %v7134_v27 }
  0xc4   :  { %v180_v55 = vpack.c.bf16 %v176_v47, %v176_v47  ;;  %v175_v56 = vmul.f32 %v7080_v39, %v158_v53  ;;  %v149_v57 = vpop.permute.xlu1 %148  ;;  %293 = vmatprep.subr.bf16.mxu1 %v248_v50  ;;  %v6712_v50 = vld [vmem:[%s8655_s2] sm:$0xff]   ;;  %v7160_v53 = vrot.slane %v7036_v10, %v618_v23 }
  0xc5   :  { %v152_v58 = vsel %vm150_vm3, %v147_v38, %v149_v57  ;;  %v153_v59 = vsel %vm150_vm3, %v149_v57, %v140_v48  ;;  %294 = vmatpush1.bf16.msra.mxu1 %v245_v51 }
  0xc6   :  { %v179_v61 = vpack.c.bf16 %v175_v56, %v175_v56  ;;  %v177_v62 = vmul.f32 %v7093_v49, %v152_v58  ;;  %v178_v63 = vmul.f32 %v7087_v45, %v153_v59  ;;  %6166 = vmatmul.mubr.msk.bf16.vlgmr.msra.gmra.mrb[0].mxu0 %vm230_vm4, %v6711_v52  ;;  %v446_v2 = vpop.permute.xlu0 %445  ;;  %v348_v3 = vand.u32 %v7067_v28, %v180_v55 }
  0xc7   :  { %388 = vmatprep.mubr.bf16.mxu0 %v6848_v4  ;;  %v7164_v58 = vmul.f32 %v774_v40, %v6962_v0  ;;  %v7178_v0 = vmul.f32 %v775_v44, %v6967_v1  ;;  %v924_v40 = vsub.s32 5, %v7031_v8 }
  0xc8   :  { %v345_v16 = vand.u32 %v7067_v28, %v179_v61  ;;  %v181_v18 = vpack.c.bf16 %v177_v62, %v177_v62  ;;  %v182_v19 = vpack.c.bf16 %v178_v63, %v178_v63  ;;  %6167 = vmatmul.mubr.msk.bf16.vlgmr.msra.gmra.mrb[0].mxu1 %vm230_vm4, %v6711_v52  ;;  %356 = vmatprep.subr.bf16.mxu0 %v348_v3  ;;  %v448_v20 = vpop.permute.xlu1 %447 }
  0xc9   :  { %v452_v21 = vsel %vm451_vm5, %v446_v2, %v448_v20  ;;  %431 = vmatprep.mubr.bf16.mxu1 %v6848_v4  ;;  %v7168_v61 = vrot.slane %v7044_v14, %v618_v23  ;;  %v7171_v62 = vrot.slane %v7046_v15, %v618_v23  ;;  %v782_v23 = vcombine.high %v7164_v58, %v7164_v58 }
  0xca   :  { %v351_v29 = vand.u32 %v7067_v28, %v181_v18  ;;  %v477_v30 = vmul.f32 %v7106_v60, %v452_v21  ;;  %357 = vmatpush1.bf16.msra.mxu0 %v345_v16  ;;  %v443_v31 = vpop.permute.xlu0 %442  ;;  %v354_v32 = vand.u32 %v7067_v28, %v182_v19 }
  0xcb   :  { %v459_v35 = vsel %vm451_vm5, %v443_v31, %v446_v2 }
  0xcc   :  { %v481_v36 = vpack.c.bf16 %v477_v30, %v477_v30  ;;  %v476_v37 = vmul.f32 %v7113_v5, %v459_v35  ;;  %399 = vmatprep.subr.bf16.mxu1 %v354_v32  ;;  %v450_v38 = vpop.permute.xlu1 %449  ;;  %v783_v35 = vcombine.high %v7178_v0, %v7178_v0 }
  0xcd   :  { %v453_v41 = vsel %vm451_vm5, %v448_v20, %v450_v38  ;;  %v454_v42 = vsel %vm451_vm5, %v450_v38, %v443_v31  ;;  %400 = vmatpush1.bf16.msra.mxu1 %v351_v29 }
  0xce   :  { %v480_v46 = vpack.c.bf16 %v476_v37, %v476_v37  ;;  %v478_v47 = vmul.f32 %v7116_v6, %v453_v41  ;;  %v479_v48 = vmul.f32 %v7140_v33, %v454_v42  ;;  %v496_v51 = vand.u32 %v481_v36, %v7067_v28  ;;  %v602_v52 = vpop.permute.xlu0 %601 }
  0xcf   :  { %v787_v42 = vpack.c.bf16 %v782_v23, %v782_v23  ;;  %v1080_v23 = vsub.s32 6, %v7031_v8 }
  0xd0   :  { %v493_v54 = vand.u32 %v480_v46, %v7067_v28  ;;  %v482_v55 = vpack.c.bf16 %v478_v47, %v478_v47  ;;  %v483_v56 = vpack.c.bf16 %v479_v48, %v479_v48  ;;  %504 = vmatprep.subr.bf16.mxu0 %v496_v51  ;;  %v604_v57 = vpop.permute.xlu1 %603  ;;  %v6713_v46 = vld [vmem:[%s8655_s2 + $0x10] sm:$0xff]   ;;  %v789_v48 = vpack.c.bf16 %v783_v35, %v783_v35 }
  0xd1   :  { %v608_v59 = vsel %vm607_vm6, %v602_v52, %v604_v57  ;;  %v7201_v51 = vrot.slane %v7038_v11, %v924_v40 }
  0xd2   :  { %v499_v63 = vand.u32 %v482_v55, %v7067_v28  ;;  %6169 = vmatmul.mubr.msk.bf16.vlgmr.msra.gmra.mrb[0].mxu0 %vm230_vm4, %v6712_v50  ;;  %v633_v2 = vmul.f32 %v7149_v43, %v608_v59  ;;  %v502_v3 = vand.u32 %v483_v56, %v7067_v28  ;;  %v599_v16 = vpop.permute.xlu0 %598  ;;  %v7208_v59 = vrot.slane %v7046_v15, %v924_v40 }
  0xd3   :  { %505 = vmatpush1.bf16.msra.mxu0 %v493_v54  ;;  %v615_v18 = vsel %vm607_vm6, %v599_v16, %v602_v52  ;;  %536 = vmatprep.mubr.bf16.mxu0 %v6848_v4  ;;  %v802_v52 = vand.u32 %v787_v42, %v7067_v28 }
  0xd4   :  { %6170 = vmatmul.mubr.msk.bf16.vlgmr.msra.gmra.mrb[0].mxu1 %vm230_vm4, %v6712_v50  ;;  %v637_v19 = vpack.c.bf16 %v633_v2, %v633_v2  ;;  %547 = vmatprep.subr.bf16.mxu1 %v502_v3  ;;  %v632_v20 = vmul.f32 %v7160_v53, %v615_v18  ;;  %v606_v21 = vpop.permute.xlu1 %605 }
  0xd5   :  { %548 = vmatpush1.bf16.msra.mxu1 %v499_v63  ;;  %v609_v29 = vsel %vm607_vm6, %v604_v57, %v606_v21  ;;  %v610_v1 = vsel %vm607_vm6, %v606_v21, %v599_v16  ;;  %579 = vmatprep.mubr.bf16.mxu1 %v6848_v4  ;;  %v808_v63 = vand.u32 %v789_v48, %v7067_v28 }
  0xd6   :  { %v634_v30 = vmul.f32 %v7168_v61, %v609_v29  ;;  %v635_v31 = vmul.f32 %v7171_v62, %v610_v1  ;;  %v652_v32 = vand.u32 %v637_v19, %v7067_v28  ;;  %v636_v36 = vpack.c.bf16 %v632_v20, %v632_v20  ;;  %v907_v38 = vpop.permute.xlu0 %906  ;;  %v6714_v1 = vld [vmem:[%s8655_s2 + $0x18] sm:$0xff]  }
  0xd7   :  { %v786_v19 = vpack.c.bf16 %v7164_v58, %v7164_v58  ;;  %v788_v29 = vpack.c.bf16 %v7178_v0, %v7178_v0  ;;  %v7235_v0 = vrot.slane %v7044_v14, %v924_v40  ;;  %v7243_v48 = vrot.slane %v7046_v15, %v1080_v23 }
  0xd8   :  { %v639_v37 = vpack.c.bf16 %v635_v31, %v635_v31  ;;  %660 = vmatprep.subr.bf16.mxu0 %v652_v32  ;;  %v909_v41 = vpop.permute.xlu1 %908  ;;  %v638_v44 = vpack.c.bf16 %v634_v30, %v634_v30  ;;  %v649_v50 = vand.u32 %v636_v36, %v7067_v28  ;;  %v7226_v31 = vrot.slane %v7036_v10, %v924_v40 }
  0xd9   :  { %v914_v56 = vsel %vm912_vm7, %v907_v38, %v909_v41  ;;  %v799_v32 = vand.u32 %v786_v19, %v7067_v28  ;;  %v7232_v36 = vrot.slane %v7038_v11, %v1080_v23  ;;  %v805_v42 = vand.u32 %v788_v29, %v7067_v28 }
  0xda   :  { %v658_v47 = vand.u32 %v639_v37, %v7067_v28  ;;  %v655_v55 = vand.u32 %v638_v44, %v7067_v28  ;;  %v905_v57 = vpop.permute.xlu0 %904  ;;  %v939_v3 = vmul.f32 %v7201_v51, %v914_v56  ;;  %v7259_v29 = vrot.slane %v7036_v10, %v1080_v23 }
  0xdb   :  { %v913_v58 = vsel %vm912_vm7, %v905_v57, %v907_v38 }
  0xdc   :  { %703 = vmatprep.subr.bf16.mxu1 %v658_v47  ;;  %v911_v54 = vpop.permute.xlu1 %910  ;;  %v943_v20 = vpack.c.bf16 %v939_v3, %v939_v3 }
  0xdd   :  { %v921_v2 = vsel %vm912_vm7, %v911_v54, %v905_v57 }
  0xde   :  { %6172 = vmatmul.mubr.msk.bf16.vlgmr.msra.gmra.mrb[0].mxu0 %vm230_vm4, %v6713_v46  ;;  %v941_v16 = vmul.f32 %v7208_v59, %v921_v2  ;;  %v1063_v21 = vpop.permute.xlu0 %1062  ;;  %v958_v35 = vand.u32 %v943_v20, %v7067_v28  ;;  %v1236_v2 = vsub.s32 7, %v7031_v8 }
  0xdf   :  { %661 = vmatpush1.bf16.msra.mxu0 %v649_v50  ;;  %692 = vmatprep.mubr.bf16.mxu0 %v6848_v4  ;;  %v938_v50 = vmul.f32 %v7226_v31, %v913_v58 }
  0xe0   :  { %6173 = vmatmul.mubr.msk.bf16.vlgmr.msra.gmra.mrb[0].mxu1 %vm230_vm4, %v6713_v46  ;;  %810 = vmatprep.subr.bf16.mxu0 %v802_v52  ;;  %v1065_v18 = vpop.permute.xlu1 %1064  ;;  %v945_v30 = vpack.c.bf16 %v941_v16, %v941_v16  ;;  %v915_v46 = vsel %vm912_vm7, %v909_v41, %v911_v54  ;;  %v6715_v16 = vld [vmem:[%s8655_s2 + $0x20] sm:$0xff]  }
  0xe1   :  { %704 = vmatpush1.bf16.msra.mxu1 %v655_v55  ;;  %735 = vmatprep.mubr.bf16.mxu1 %v6848_v4  ;;  %v1070_v44 = vsel %vm1068_vm8, %v1063_v21, %v1065_v18  ;;  %v940_v41 = vmul.f32 %v7235_v0, %v915_v46  ;;  %v942_v56 = vpack.c.bf16 %v938_v50, %v938_v50 }
  0xe2   :  { %853 = vmatprep.subr.bf16.mxu1 %v808_v63  ;;  %v964_v47 = vand.u32 %v945_v30, %v7067_v28  ;;  %v1061_v38 = vpop.permute.xlu0 %1060  ;;  %v1095_v52 = vmul.f32 %v7232_v36, %v1070_v44 }
  0xe3   :  { %v944_v3 = vpack.c.bf16 %v940_v41, %v940_v41  ;;  %v955_v20 = vand.u32 %v942_v56, %v7067_v28 }
  0xe4   :  { %v1067_v37 = vpop.permute.xlu1 %1066  ;;  %v1099_v57 = vpack.c.bf16 %v1095_v52, %v1095_v52 }
  0xe5   :  { %v1077_v40 = vsel %vm1068_vm8, %v1067_v37, %v1061_v38  ;;  %v961_v58 = vand.u32 %v944_v3, %v7067_v28  ;;  %v1071_v44 = vsel %vm1068_vm8, %v1065_v18, %v1067_v37  ;;  %v7290_v3 = vrot.slane %v7036_v10, %v1236_v2 }
  0xe6   :  { %v1097_v54 = vmul.f32 %v7243_v48, %v1077_v40  ;;  %v1219_v63 = vpop.permute.xlu0 %1218  ;;  %v1114_v30 = vand.u32 %v1099_v57, %v7067_v28 }
  0xe8   :  { %v1221_v55 = vpop.permute.xlu1 %1220  ;;  %v1101_v19 = vpack.c.bf16 %v1097_v54, %v1097_v54  ;;  %v6716_v54 = vld [vmem:[%s8655_s2 + $0x28] sm:$0xff]  }
  0xea   :  { %6175 = vmatmul.mubr.msk.bf16.vlgmr.msra.gmra.mrb[0].mxu0 %vm230_vm4, %v6714_v1  ;;  %v1120_v46 = vand.u32 %v1101_v19, %v7067_v28 }
  0xeb   :  { %811 = vmatpush1.bf16.msra.mxu0 %v799_v32  ;;  %842 = vmatprep.mubr.bf16.mxu0 %v6848_v4  ;;  %v7264_v32 = vrot.slane %v7038_v11, %v1236_v2 }
  0xec   :  { %6176 = vmatmul.mubr.msk.bf16.vlgmr.msra.gmra.mrb[0].mxu1 %vm230_vm4, %v6714_v1  ;;  %966 = vmatprep.subr.bf16.mxu0 %v958_v35  ;;  %v1069_v1 = vsel %vm1068_vm8, %v1061_v38, %v1063_v21  ;;  %v1223_v8 = vpop.permute.xlu1 %1222  ;;  %v7268_v35 = vrot.slane %v7044_v14, %v1080_v23  ;;  %v1217_v21 = vpop.permute.xlu0 %1216 }
  0xed   :  { %854 = vmatpush1.bf16.msra.mxu1 %v805_v42  ;;  %885 = vmatprep.mubr.bf16.mxu1 %v6848_v4  ;;  %v1226_v42 = vsel %vm1224_vm9, %v1219_v63, %v1221_v55  ;;  %v1094_v11 = vmul.f32 %v7259_v29, %v1069_v1  ;;  %v1233_v23 = vsel %vm1224_vm9, %v1223_v8, %v1217_v21 }
  0xee   :  { %1009 = vmatprep.subr.bf16.mxu1 %v964_v47  ;;  %v7275_v47 = vrot.slane %v7046_v15, %v1236_v2  ;;  %v1251_v38 = vmul.f32 %v7264_v32, %v1226_v42  ;;  %v1096_v18 = vmul.f32 %v7268_v35, %v1071_v44  ;;  %v1227_v44 = vsel %vm1224_vm9, %v1221_v55, %v1223_v8 }
  0xef   :  { %v1098_v50 = vpack.c.bf16 %v1094_v11, %v1094_v11 }
  0xf0   :  { %v1253_v15 = vmul.f32 %v7275_v47, %v1233_v23  ;;  %v1377_v37 = vpop.permute.xlu1 %1376  ;;  %v1255_v40 = vpack.c.bf16 %v1251_v38, %v1251_v38  ;;  %v1375_v52 = vpop.permute.xlu0 %1374  ;;  %v1100_v41 = vpack.c.bf16 %v1096_v18, %v1096_v18  ;;  %v6717_v18 = vld [vmem:[%s8655_s2 + $0x30] sm:$0xff]  }
  0xf1   :  { %v1111_v57 = vand.u32 %v1098_v50, %v7067_v28  ;;  %v1382_v42 = vsel %vm1380_vm10, %v1375_v52, %v1377_v37 }
  0xf2   :  { %v1257_v56 = vpack.c.bf16 %v1253_v15, %v1253_v15  ;;  %v1270_v19 = vand.u32 %v1255_v40, %v7067_v28  ;;  %v1117_v1 = vand.u32 %v1100_v41, %v7067_v28  ;;  %v7318_v40 = vld [vmem:[#allocation4 + $0x20] ss:$0 sm:$0xff] }
  0xf4   :  { %v1276_v10 = vand.u32 %v1257_v56, %v7067_v28 }
  0xf6   :  { %6178 = vmatmul.mubr.msk.bf16.vlgmr.msra.gmra.mrb[0].mxu0 %vm230_vm4, %v6715_v16 }
  0xf7   :  { %967 = vmatpush1.bf16.msra.mxu0 %v955_v20  ;;  %998 = vmatprep.mubr.bf16.mxu0 %v6848_v4  ;;  %v1379_v20 = vpop.permute.xlu1 %1378 }
  0xf8   :  { %6179 = vmatmul.mubr.msk.bf16.vlgmr.msra.gmra.mrb[0].mxu1 %vm230_vm4, %v6715_v16  ;;  %1122 = vmatprep.subr.bf16.mxu0 %v1114_v30  ;;  %v1225_v16 = vsel %vm1224_vm9, %v1217_v21, %v1219_v63  ;;  %v7296_v30 = vrot.slane %v7044_v14, %v1236_v2  ;;  %v7306_v21 = vld [vmem:[#allocation4 + $0x38] ss:$0 sm:$0xff] }
  0xf9   :  { %1010 = vmatpush1.bf16.msra.mxu1 %v961_v58  ;;  %1041 = vmatprep.mubr.bf16.mxu1 %v6848_v4  ;;  %v7298_v58 = vld [vmem:[#allocation4 + $0x28] ss:$0 sm:$0xff]  ;;  %v1250_v63 = vmul.f32 %v7290_v3, %v1225_v16  ;;  %v1383_v16 = vsel %vm1380_vm10, %v1377_v37, %v1379_v20  ;;  %v6718_v37 = vld [vmem:[%s8655_s2 + $0x38] sm:$0xff]  }
  0xfa   :  { %1165 = vmatprep.subr.bf16.mxu1 %v1120_v46  ;;  %v1373_v46 = vpop.permute.xlu0 %1372  ;;  %v1407_v2 = vmul.f32 %v7298_v58, %v1382_v42  ;;  %v1252_v55 = vmul.f32 %v7296_v30, %v1227_v44 }
  0xfb   :  { %v1389_v14 = vsel %vm1380_vm10, %v1379_v20, %v1373_v46  ;;  %v1254_v11 = vpack.c.bf16 %v1250_v63, %v1250_v63  ;;  %v1381_v41 = vsel %vm1380_vm10, %v1373_v46, %v1375_v52  ;;  %v6719_v46 = vld [vmem:[%s8655_s2 + $0x40] sm:$0xff]  }
  0xfc   :  { %v1409_v8 = vmul.f32 %v7306_v21, %v1389_v14  ;;  %v1411_v23 = vpack.c.bf16 %v1407_v2, %v1407_v2  ;;  %v1256_v38 = vpack.c.bf16 %v1252_v55, %v1252_v55 }
  0xfd   :  { %v1267_v50 = vand.u32 %v1254_v11, %v7067_v28 }
  0xfe   :  { %v1413_v15 = vpack.c.bf16 %v1409_v8, %v1409_v8  ;;  %v1273_v56 = vand.u32 %v1256_v38, %v7067_v28 }
 0x102   :  { %6181 = vmatmul.mubr.msk.bf16.vlgmr.msra.gmra.mrb[0].mxu0 %vm230_vm4, %v6716_v54 }
 0x103   :  { %1123 = vmatpush1.bf16.msra.mxu0 %v1111_v57  ;;  %1154 = vmatprep.mubr.bf16.mxu0 %v6848_v4  ;;  %v7324_v57 = vld [vmem:[#allocation4 + $0x30] ss:$0 sm:$0xff] }
 0x104   :  { %6182 = vmatmul.mubr.msk.bf16.vlgmr.msra.gmra.mrb[0].mxu1 %vm230_vm4, %v6716_v54  ;;  %1278 = vmatprep.subr.bf16.mxu0 %v1270_v19  ;;  %v1426_v54 = vand.u32 %v1411_v23, %v7067_v28  ;;  %v1432_v19 = vand.u32 %v1413_v15, %v7067_v28  ;;  %v1408_v52 = vmul.f32 %v7324_v57, %v1383_v16 }
 0x105   :  { %1166 = vmatpush1.bf16.msra.mxu1 %v1117_v1  ;;  %1197 = vmatprep.mubr.bf16.mxu1 %v6848_v4  ;;  %v1406_v1 = vmul.f32 %v7318_v40, %v1381_v41  ;;  %v1536_v14 = vpop.permute.xlu1 %1535 }
 0x106   :  { %1321 = vmatprep.subr.bf16.mxu1 %v1276_v10  ;;  %v1412_v44 = vpack.c.bf16 %v1408_v52, %v1408_v52 }
 0x107   :  { %v1410_v42 = vpack.c.bf16 %v1406_v1, %v1406_v1 }
 0x108   :  { %v1429_v10 = vand.u32 %v1412_v44, %v7067_v28 }
 0x109   :  { %v1423_v20 = vand.u32 %v1410_v42, %v7067_v28  ;;  %v1531_v28 = vpop.permute.xlu0 %1530 }
 0x10e   :  { %6184 = vmatmul.mubr.msk.bf16.vlgmr.msra.gmra.mrb[0].mxu0 %vm230_vm4, %v6717_v18 }
 0x10f   :  { %1279 = vmatpush1.bf16.msra.mxu0 %v1267_v50  ;;  %1310 = vmatprep.mubr.bf16.mxu0 %v6848_v4 }
 0x110   :  { %6185 = vmatmul.mubr.msk.bf16.vlgmr.msra.gmra.mrb[0].mxu1 %vm230_vm4, %v6717_v18  ;;  %1434 = vmatprep.subr.bf16.mxu0 %v1426_v54 }
 0x111   :  { %1322 = vmatpush1.bf16.msra.mxu1 %v1273_v56  ;;  %1353 = vmatprep.mubr.bf16.mxu1 %v6848_v4 }
 0x112   :  { %1477 = vmatprep.subr.bf16.mxu1 %v1432_v19 }
 0x11a   :  { %6187 = vmatmul.mubr.msk.bf16.vlgmr.msra.gmra.mrb[0].mxu0 %vm230_vm4, %v6718_v37 }
 0x11b   :  { %1435 = vmatpush1.bf16.msra.mxu0 %v1423_v20  ;;  %1466 = vmatprep.mubr.bf16.mxu0 %v6848_v4 }
 0x11c   :  { %6188 = vmatmul.mubr.msk.bf16.vlgmr.msra.gmra.mrb[0].mxu1 %vm230_vm4, %v6718_v37 }
 0x11d   :  { %1478 = vmatpush1.bf16.msra.mxu1 %v1429_v10  ;;  %1509 = vmatprep.mubr.bf16.mxu1 %v6848_v4 }
 0x126   :  { %6194 = vmatmul.mubr.msk.bf16.vlgmr.msra.gmra.mrb[0].mxu0 %vm230_vm4, %v6719_v46 }
 0x127   :  { %1742 = vmatprep.mubr.bf16.mxu0 %v6848_v4 }
 0x128   :  { %6195 = vmatmul.mubr.msk.bf16.vlgmr.msra.gmra.mrb[0].mxu1 %vm230_vm4, %v6719_v46 }
 0x129   :  { %1917 = vmatprep.mubr.bf16.mxu1 %v6848_v4 }
 0x1f9   :  { %v1468_v63 = vpop.f32.mrb[0].mxu0 }
 0x1fa   :  { %v1538_v2 = vadd.f32 %v1531_v28, %v1468_v63  ;;  %v1470_v55 = vpop.f32.mrb[1].mxu0 }
 0x1fb   :  { %v1539_v8 = vadd.f32 %v1531_v28, %v1470_v55  ;;  %v1472_v11 = vpop.f32.mrb[2].mxu0  ;;  %v1511_v23 = vpop.f32.mrb[0].mxu1 }
 0x1fc   :  { %v7349_v38 = vmax.f32 %v1538_v2, 0.0  ;;  %v1542_v18 = vadd.f32 %v1536_v14, %v1472_v11  ;;  %v1474_v15 = vpop.f32.mrb[3].mxu0  ;;  %v1513_v50 = vpop.f32.mrb[1].mxu1  ;;  %v1540_v44 = vadd.f32 %v1531_v28, %v1511_v23 }
 0x1fd   :  { %v7351_v41 = vmax.f32 %v1539_v8, 0.0  ;;  %v1543_v54 = vadd.f32 %v1536_v14, %v1474_v15  ;;  %v1515_v56 = vpop.f32.mrb[2].mxu1  ;;  %v1541_v1 = vadd.f32 %v1531_v28, %v1513_v50 }
 0x1fe   :  { %v1517_v16 = vpop.f32.mrb[3].mxu1  ;;  %1654 = vrot.lane.b32.xlu1 %v7349_v38, %s6847_s27  ;;  %v7357_v19 = vmax.f32 %v1542_v18, 0.0  ;;  %v1544_v20 = vadd.f32 %v1536_v14, %v1515_v56  ;;  %v7373_v46 = vmax.f32 %v1540_v44, 0.0 }
 0x1ff   :  { %1656 = vrot.lane.b32.xlu0 %v7351_v41, %s6847_s27  ;;  %v7359_v52 = vmax.f32 %v1543_v54, 0.0  ;;  %v1545_v42 = vadd.f32 %v1536_v14, %v1517_v16  ;;  %v7365_v37 = vmax.f32 %v1541_v1, 0.0 }
 0x200   :  { %v7375_v63 = vmax.f32 %v1544_v20, 0.0  ;;  %v1591_v20 = vld [vmem:[%s8658_s5 + $0x8] sm:$0xff] }
 0x201   :  { %v7367_v10 = vmax.f32 %v1545_v42, 0.0 }
 0x202   :  { %1660 = vrot.lane.b32.xlu1 %v7357_v19, %s6847_s27 }
 0x203   :  { %1662 = vrot.lane.b32.xlu0 %v7359_v52, %s6847_s27 }
 0x206   :  { %1648 = vrot.lane.b32.xlu1 %v7365_v37, %s6847_s27 }
 0x207   :  { %1650 = vrot.lane.b32.xlu0 %v7367_v10, %s6847_s27 }
 0x20a   :  { %1658 = vrot.lane.b32.xlu1 %v7373_v46, %s6847_s27 }
 0x20b   :  { %1664 = vrot.lane.b32.xlu0 %v7375_v63, %s6847_s27 }
 0x20e   :  { %1596 = vrot.lane.b32.xlu1 %v7365_v37, %s6849_s1 }
 0x20f   :  { %1618 = vrot.lane.b32.xlu0 %v7375_v63, %s6849_s1 }
 0x212   :  { %1612 = vrot.lane.b32.xlu1 %v7373_v46, %s6849_s1 }
 0x213   :  { %1598 = vrot.lane.b32.xlu0 %v7367_v10, %s6849_s1 }
 0x216   :  { %1610 = vrot.lane.b32.xlu1 %v7351_v41, %s6849_s1 }
 0x217   :  { %1616 = vrot.lane.b32.xlu0 %v7359_v52, %s6849_s1 }
 0x21a   :  { %1608 = vrot.lane.b32.xlu1 %v7349_v38, %s6849_s1 }
 0x21b   :  { %1614 = vrot.lane.b32.xlu0 %v7357_v19, %s6849_s1 }
 0x21e   :  { %1938 = vrot.lane.b32.xlu1 %v7365_v37, %s6850_s6 }
 0x21f   :  { %1954 = vrot.lane.b32.xlu0 %v7375_v63, %s6850_s6 }
 0x222   :  { %1948 = vrot.lane.b32.xlu1 %v7373_v46, %s6850_s6 }
 0x223   :  { %1940 = vrot.lane.b32.xlu0 %v7367_v10, %s6850_s6 }
 0x226   :  { %1946 = vrot.lane.b32.xlu1 %v7351_v41, %s6850_s6 }
 0x227   :  { %1952 = vrot.lane.b32.xlu0 %v7359_v52, %s6850_s6 }
 0x22a   :  { %1944 = vrot.lane.b32.xlu1 %v7349_v38, %s6850_s6 }
 0x22b   :  { %1950 = vrot.lane.b32.xlu0 %v7357_v19, %s6850_s6 }
 0x22e   :  { %2122 = vrot.lane.b32.xlu1 %v7365_v37, %s6851_s28 }
 0x22f   :  { %2138 = vrot.lane.b32.xlu0 %v7375_v63, %s6851_s28 }
 0x232   :  { %2132 = vrot.lane.b32.xlu1 %v7373_v46, %s6851_s28 }
 0x233   :  { %2124 = vrot.lane.b32.xlu0 %v7367_v10, %s6851_s28 }
 0x236   :  { %2130 = vrot.lane.b32.xlu1 %v7351_v41, %s6851_s28 }
 0x237   :  { %2136 = vrot.lane.b32.xlu0 %v7359_v52, %s6851_s28 }
 0x23a   :  { %2128 = vrot.lane.b32.xlu1 %v7349_v38, %s6851_s28 }
 0x23b   :  { %2134 = vrot.lane.b32.xlu0 %v7357_v19, %s6851_s28 }
 0x23e   :  { %2456 = vrot.lane.b32.xlu1 %v7349_v38, %s6852_s0 }
 0x23f   :  { %2462 = vrot.lane.b32.xlu0 %v7365_v37, %s6852_s0 }
 0x242   :  { %2464 = vrot.lane.b32.xlu1 %v7357_v19, %s6852_s0 }
 0x243   :  { %2468 = vrot.lane.b32.xlu0 %v7375_v63, %s6852_s0 }
 0x246   :  { %2460 = vrot.lane.b32.xlu1 %v7373_v46, %s6852_s0 }
 0x247   :  { %2470 = vrot.lane.b32.xlu0 %v7367_v10, %s6852_s0 }
 0x24a   :  { %2458 = vrot.lane.b32.xlu1 %v7351_v41, %s6852_s0 }
 0x24b   :  { %2466 = vrot.lane.b32.xlu0 %v7359_v52, %s6852_s0 }
 0x24e   :  { %2640 = vrot.lane.b32.xlu1 %v7349_v38, %s6853_s16 }
 0x24f   :  { %2646 = vrot.lane.b32.xlu0 %v7365_v37, %s6853_s16 }
 0x252   :  { %2648 = vrot.lane.b32.xlu1 %v7357_v19, %s6853_s16 }
 0x253   :  { %2652 = vrot.lane.b32.xlu0 %v7375_v63, %s6853_s16 }
 0x256   :  { %2644 = vrot.lane.b32.xlu1 %v7373_v46, %s6853_s16 }
 0x257   :  { %2654 = vrot.lane.b32.xlu0 %v7367_v10, %s6853_s16 }
 0x25a   :  { %2642 = vrot.lane.b32.xlu1 %v7351_v41, %s6853_s16 }
 0x25b   :  { %2650 = vrot.lane.b32.xlu0 %v7359_v52, %s6853_s16 }
 0x25e   :  { %2824 = vrot.lane.b32.xlu1 %v7349_v38, %s6854_s29 }
 0x25f   :  { %2830 = vrot.lane.b32.xlu0 %v7365_v37, %s6854_s29 }
 0x262   :  { %2832 = vrot.lane.b32.xlu1 %v7357_v19, %s6854_s29 }
 0x263   :  { %2836 = vrot.lane.b32.xlu0 %v7375_v63, %s6854_s29 }
 0x266   :  { %2828 = vrot.lane.b32.xlu1 %v7373_v46, %s6854_s29 }
 0x267   :  { %2838 = vrot.lane.b32.xlu0 %v7367_v10, %s6854_s29 }
 0x26a   :  { %2826 = vrot.lane.b32.xlu1 %v7351_v41, %s6854_s29 }
 0x26b   :  { %2834 = vrot.lane.b32.xlu0 %v7359_v52, %s6854_s29 }
 0x26e   :  { %3008 = vrot.lane.b32.xlu1 %v7349_v38, %s6855_s30 }
 0x26f   :  { %3014 = vrot.lane.b32.xlu0 %v7365_v37, %s6855_s30 }
 0x270   :  { %v1655_v28 = vpop.permute.xlu1 %1654 }
 0x271   :  { %v1657_v14 = vpop.permute.xlu0 %1656 }
 0x272   :  { %3016 = vrot.lane.b32.xlu1 %v7357_v19, %s6855_s30  ;;  %v1666_v2 = vsel %vm192_vm0, %v1655_v28, %v1657_v14 }
 0x273   :  { %3020 = vrot.lane.b32.xlu0 %v7375_v63, %s6855_s30  ;;  %v1683_v23 = vmul.f32 %v1666_v2, %v7050_v17 }
 0x274   :  { %v1661_v55 = vpop.permute.xlu1 %1660 }
 0x275   :  { %v1663_v8 = vpop.permute.xlu0 %1662 }
 0x276   :  { %v1669_v11 = vsel %vm192_vm0, %v1661_v55, %v1663_v8  ;;  %3012 = vrot.lane.b32.xlu1 %v7373_v46, %s6855_s30 }
 0x277   :  { %v1687_v18 = vmul.f32 %v1669_v11, %v7050_v17  ;;  %3022 = vrot.lane.b32.xlu0 %v7367_v10, %s6855_s30  ;;  %v1590_v17 = vld [vmem:[%s8658_s5] sm:$0xff] }
 0x278   :  { %v1649_v15 = vpop.permute.xlu1 %1648 }
 0x279   :  { %v1680_v50 = vsel %vm192_vm0, %v1649_v15, %v1655_v28  ;;  %v1651_v54 = vpop.permute.xlu0 %1650  ;;  %v1691_v56 = vpack.c.bf16 %v1687_v18, %v1683_v23 }
 0x27a   :  { %v1682_v16 = vmul.f32 %v1680_v50, %v7042_v13  ;;  %v1681_v1 = vsel %vm192_vm0, %v1651_v54, %v1661_v55  ;;  %3010 = vrot.lane.b32.xlu1 %v7351_v41, %s6855_s30 }
 0x27b   :  { %v1686_v42 = vmul.f32 %v1681_v1, %v7042_v13  ;;  %3018 = vrot.lane.b32.xlu0 %v7359_v52, %s6855_s30  ;;  %1710 = vmatprep.subr.bf16.mxu0 %v1691_v56  ;;  %v6720_v56 = vld [vmem:[%s8657_s4 + $0x10] sm:$0xff]  }
 0x27c   :  { %v1659_v44 = vpop.permute.xlu1 %1658 }
 0x27d   :  { %v1690_v28 = vpack.c.bf16 %v1686_v42, %v1682_v16  ;;  %v1667_v2 = vsel %vm192_vm0, %v1657_v14, %v1659_v44  ;;  %v1668_v55 = vsel %vm192_vm0, %v1659_v44, %v1649_v15  ;;  %v1665_v11 = vpop.permute.xlu0 %1664  ;;  %v1592_v15 = vld [vmem:[%s8658_s5 + $0x10] sm:$0xff] }
 0x27e   :  { %v1684_v13 = vmul.f32 %v1667_v2, %v7064_v25  ;;  %v1685_v23 = vmul.f32 %v1668_v55, %v7060_v24  ;;  %v1670_v18 = vsel %vm192_vm0, %v1663_v8, %v1665_v11  ;;  %v1671_v50 = vsel %vm192_vm0, %v1665_v11, %v1651_v54  ;;  %3194 = vperm.xlu1 %6708, %v1590_v17   ;;  %v1593_v8 = vld [vmem:[%s8658_s5 + $0x18] sm:$0xff] }
 0x27f   :  { %v1688_v16 = vmul.f32 %v1670_v18, %v7064_v25  ;;  %v1689_v14 = vmul.f32 %v1671_v50, %v7060_v24  ;;  %3199 = vperm.xlu0 %6707, %v1591_v20   ;;  %1711 = vmatpush1.bf16.msra.mxu0 %v1690_v28  ;;  %v6721_v2 = vld [vmem:[%s8657_s4 + $0x18] sm:$0xff]  }
 0x280   :  { %v1597_v1 = vpop.permute.xlu1 %1596 }
 0x281   :  { %v1692_v54 = vpack.c.bf16 %v1688_v16, %v1684_v13  ;;  %v1619_v42 = vpop.permute.xlu0 %1618  ;;  %v1693_v17 = vpack.c.bf16 %v1689_v14, %v1685_v23 }
 0x282   :  { %3204 = vperm.xlu1 %6708, %v1592_v15   ;;  %6198 = vmatmul.mubr.msk.bf16.vlgmr.msra.gmra.mrb[4].mxu0 %vm192_vm0, %v6720_v56 }
 0x283   :  { %3209 = vperm.xlu0 %6707, %v1593_v8   ;;  %1763 = vmatprep.subr.bf16.mxu0 %v1693_v17 }
 0x284   :  { %v1613_v24 = vpop.permute.xlu1 %1612  ;;  %1764 = vmatpush1.bf16.msra.mxu0 %v1692_v54  ;;  %1752 = vmatprep.mubr.bf16.mxu0 %v6848_v4 }
 0x285   :  { %v1622_v25 = vsel %vm150_vm3, %v1613_v24, %v1597_v1  ;;  %v1599_v44 = vpop.permute.xlu0 %1598 }
 0x286   :  { %v1639_v20 = vmul.f32 %v1622_v25, %v7087_v45  ;;  %v1625_v28 = vsel %vm150_vm3, %v1619_v42, %v1599_v44 }
 0x287   :  { %v1643_v55 = vmul.f32 %v1625_v28, %v7087_v45 }
 0x288   :  { %v1611_v11 = vpop.permute.xlu1 %1610 }
 0x289   :  { %v1621_v13 = vsel %vm150_vm3, %v1611_v11, %v1613_v24  ;;  %v1617_v23 = vpop.permute.xlu0 %1616  ;;  %v1647_v18 = vpack.c.bf16 %v1643_v55, %v1639_v20 }
 0x28a   :  { %v1638_v50 = vmul.f32 %v1621_v13, %v7093_v49  ;;  %v1624_v16 = vsel %vm150_vm3, %v1617_v23, %v1619_v42  ;;  %6199 = vmatmul.mubr.msk.bf16.gmra.mrb[8].mxu0 %vm192_vm0, %v6721_v2 }
 0x28b   :  { %v1642_v14 = vmul.f32 %v1624_v16, %v7093_v49  ;;  %1885 = vmatprep.subr.bf16.mxu1 %v1647_v18  ;;  %1795 = vmatprep.mubr.bf16.mxu0 %v6848_v4  ;;  %v6722_v49 = vld [vmem:[%s8657_s4] sm:$0xff]  }
 0x28c   :  { %v1609_v15 = vpop.permute.xlu1 %1608 }
 0x28d   :  { %v1646_v8 = vpack.c.bf16 %v1642_v14, %v1638_v50  ;;  %v1620_v45 = vsel %vm150_vm3, %v1609_v15, %v1611_v11  ;;  %v1634_v54 = vsel %vm150_vm3, %v1597_v1, %v1609_v15  ;;  %v1615_v17 = vpop.permute.xlu0 %1614 }
 0x28e   :  { %v1636_v24 = vmul.f32 %v1634_v54, %v7080_v39  ;;  %v1637_v25 = vmul.f32 %v1620_v45, %v7074_v34  ;;  %v1623_v42 = vsel %vm150_vm3, %v1615_v17, %v1617_v23  ;;  %v1635_v20 = vsel %vm150_vm3, %v1599_v44, %v1615_v17 }
 0x28f   :  { %v1640_v28 = vmul.f32 %v1635_v20, %v7080_v39  ;;  %v1641_v55 = vmul.f32 %v1623_v42, %v7074_v34  ;;  %1886 = vmatpush1.bf16.msra.mxu1 %v1646_v8 }
 0x290   :  { %v1939_v11 = vpop.permute.xlu1 %1938 }
 0x291   :  { %v1644_v1 = vpack.c.bf16 %v1640_v28, %v1636_v24  ;;  %v1955_v13 = vpop.permute.xlu0 %1954  ;;  %v1645_v18 = vpack.c.bf16 %v1641_v55, %v1637_v25 }
 0x292   :  { %6200 = vmatmul.mubr.msk.bf16.vlgmr.msra.gmra.mrb[12].mxu0 %vm192_vm0, %v6720_v56  ;;  %6206 = vmatmul.mubr.msk.bf16.vlgmr.msra.gmra.mrb[4].mxu1 %vm192_vm0, %v6722_v49  ;;  %v6723_v56 = vld [vmem:[%s8657_s4 + $0x8] sm:$0xff]  }
 0x293   :  { %1832 = vmatprep.subr.bf16.mxu0 %v1645_v18  ;;  %1805 = vmatprep.mubr.bf16.mxu0 %v6848_v4 }
 0x294   :  { %v1949_v44 = vpop.permute.xlu1 %1948  ;;  %1833 = vmatpush1.bf16.msra.mxu0 %v1644_v1  ;;  %1927 = vmatprep.mubr.bf16.mxu1 %v6848_v4 }
 0x295   :  { %v1958_v39 = vsel %vm451_vm5, %v1949_v44, %v1939_v11  ;;  %v1941_v23 = vpop.permute.xlu0 %1940 }
 0x296   :  { %v1975_v34 = vmul.f32 %v1958_v39, %v7140_v33  ;;  %v1961_v50 = vsel %vm451_vm5, %v1955_v13, %v1941_v23 }
 0x297   :  { %v1979_v16 = vmul.f32 %v1961_v50, %v7140_v33 }
 0x298   :  { %v1947_v14 = vpop.permute.xlu1 %1946 }
 0x299   :  { %v1957_v15 = vsel %vm451_vm5, %v1947_v14, %v1949_v44  ;;  %v1953_v8 = vpop.permute.xlu0 %1952  ;;  %v1983_v45 = vpack.c.bf16 %v1979_v16, %v1975_v34 }
 0x29a   :  { %v1974_v54 = vmul.f32 %v1957_v15, %v7116_v6  ;;  %v1960_v17 = vsel %vm451_vm5, %v1953_v8, %v1955_v13  ;;  %6201 = vmatmul.mubr.msk.bf16.gmra.mrb[16].mxu0 %vm192_vm0, %v6721_v2  ;;  %6207 = vmatmul.mubr.msk.bf16.gmra.mrb[8].mxu1 %vm192_vm0, %v6723_v56  ;;  %v6724_v13 = vld [vmem:[%s8657_s4 + $0x20] sm:$0xff]  }
 0x29b   :  { %v1978_v24 = vmul.f32 %v1960_v17, %v7116_v6  ;;  %2053 = vmatprep.subr.bf16.mxu1 %v1983_v45  ;;  %1864 = vmatprep.mubr.bf16.mxu0 %v6848_v4 }
 0x29c   :  { %v1945_v25 = vpop.permute.xlu1 %1944  ;;  %2085 = vmatprep.mubr.bf16.mxu1 %v6848_v4 }
 0x29d   :  { %v1982_v33 = vpack.c.bf16 %v1978_v24, %v1974_v54  ;;  %v1956_v42 = vsel %vm451_vm5, %v1945_v25, %v1947_v14  ;;  %v1970_v20 = vsel %vm451_vm5, %v1939_v11, %v1945_v25  ;;  %v1951_v28 = vpop.permute.xlu0 %1950  ;;  %v2313_v24 = vmul.f32 %v7367_v10, %v7134_v27 }
 0x29e   :  { %v1972_v55 = vmul.f32 %v1970_v20, %v7113_v5  ;;  %v1973_v2 = vmul.f32 %v1956_v42, %v7106_v60  ;;  %v1959_v1 = vsel %vm451_vm5, %v1951_v28, %v1953_v8  ;;  %v1971_v6 = vsel %vm451_vm5, %v1941_v23, %v1951_v28 }
 0x29f   :  { %v1976_v18 = vmul.f32 %v1971_v6, %v7113_v5  ;;  %v1977_v44 = vmul.f32 %v1959_v1, %v7106_v60  ;;  %2054 = vmatpush1.bf16.msra.mxu1 %v1982_v33  ;;  %v2312_v10 = vmul.f32 %v7375_v63, %v7131_v26 }
 0x2a0   :  { %v2123_v39 = vpop.permute.xlu1 %2122 }
 0x2a1   :  { %v1980_v11 = vpack.c.bf16 %v1976_v18, %v1972_v55  ;;  %v2139_v34 = vpop.permute.xlu0 %2138  ;;  %v1981_v50 = vpack.c.bf16 %v1977_v44, %v1973_v2  ;;  %v6726_v18 = vld [vmem:[%s8657_s4 + $0x30] sm:$0xff]  }
 0x2a2   :  { %6204 = vmatmul.mubr.msk.bf16.vlgmr.msra.gmra.mrb[4].mxu0 %vm192_vm0, %v6722_v49  ;;  %6212 = vmatmul.mubr.msk.bf16.vlgmr.msra.gmra.mrb[4].mxu1 %vm192_vm0, %v6724_v13  ;;  %v6725_v49 = vld [vmem:[%s8657_s4 + $0x28] sm:$0xff]  }
 0x2a3   :  { %2000 = vmatprep.subr.bf16.mxu0 %v1981_v50  ;;  %1874 = vmatprep.mubr.bf16.mxu0 %v6848_v4 }
 0x2a4   :  { %v2133_v23 = vpop.permute.xlu1 %2132  ;;  %2001 = vmatpush1.bf16.msra.mxu0 %v1980_v11  ;;  %2095 = vmatprep.mubr.bf16.mxu1 %v6848_v4  ;;  %v2311_v11 = vmul.f32 %v7359_v52, %v7123_v12  ;;  %v6727_v52 = vld [vmem:[%s8657_s4 + $0x38] sm:$0xff]  }
 0x2a5   :  { %v2142_v5 = vsel %vm607_vm6, %v2133_v23, %v2123_v39  ;;  %v2125_v16 = vpop.permute.xlu0 %2124 }
 0x2a6   :  { %v2159_v60 = vmul.f32 %v2142_v5, %v7171_v62  ;;  %v2145_v14 = vsel %vm607_vm6, %v2139_v34, %v2125_v16 }
 0x2a7   :  { %v2163_v15 = vmul.f32 %v2145_v14, %v7171_v62  ;;  %v2309_v62 = vmul.f32 %v7365_v37, %v7134_v27 }
 0x2a8   :  { %v2131_v8 = vpop.permute.xlu1 %2130 }
 0x2a9   :  { %v2141_v45 = vsel %vm607_vm6, %v2131_v8, %v2133_v23  ;;  %v2137_v54 = vpop.permute.xlu0 %2136  ;;  %v2167_v17 = vpack.c.bf16 %v2163_v15, %v2159_v60  ;;  %v2317_v1 = vpack.c.bf16 %v2313_v24, %v2309_v62  ;;  %v2307_v60 = vmul.f32 %v7351_v41, %v7123_v12 }
 0x2aa   :  { %v2158_v25 = vmul.f32 %v2141_v45, %v7168_v61  ;;  %v2144_v33 = vsel %vm607_vm6, %v2137_v54, %v2139_v34  ;;  %6205 = vmatmul.mubr.msk.bf16.gmra.mrb[8].mxu0 %vm192_vm0, %v6723_v56  ;;  %6213 = vmatmul.mubr.msk.bf16.gmra.mrb[8].mxu1 %vm192_vm0, %v6725_v49 }
 0x2ab   :  { %v2162_v42 = vmul.f32 %v2144_v33, %v7168_v61  ;;  %2237 = vmatprep.subr.bf16.mxu1 %v2167_v17  ;;  %2032 = vmatprep.mubr.bf16.mxu0 %v6848_v4  ;;  %v2310_v17 = vmul.f32 %v7357_v19, %v7120_v7  ;;  %v2306_v19 = vmul.f32 %v7349_v38, %v7120_v7  ;;  %v6729_v7 = vld [vmem:[%s8657_s4 + $0x48] sm:$0xff]  }
 0x2ac   :  { %v2129_v20 = vpop.permute.xlu1 %2128  ;;  %2269 = vmatprep.mubr.bf16.mxu1 %v6848_v4 }
 0x2ad   :  { %v2166_v28 = vpack.c.bf16 %v2162_v42, %v2158_v25  ;;  %v2140_v55 = vsel %vm607_vm6, %v2129_v20, %v2131_v8  ;;  %v2154_v56 = vsel %vm607_vm6, %v2123_v39, %v2129_v20  ;;  %v2135_v2 = vpop.permute.xlu0 %2134  ;;  %v2308_v39 = vmul.f32 %v7373_v46, %v7131_v26  ;;  %v6728_v20 = vld [vmem:[%s8657_s4 + $0x40] sm:$0xff]  }
 0x2ae   :  { %v2156_v61 = vmul.f32 %v2154_v56, %v7160_v53  ;;  %v2157_v6 = vmul.f32 %v2140_v55, %v7149_v43  ;;  %v2143_v27 = vsel %vm607_vm6, %v2135_v2, %v2137_v54  ;;  %v2155_v37 = vsel %vm607_vm6, %v2125_v16, %v2135_v2 }
 0x2af   :  { %v2160_v63 = vmul.f32 %v2155_v37, %v7160_v53  ;;  %v2161_v44 = vmul.f32 %v2143_v27, %v7149_v43  ;;  %2238 = vmatpush1.bf16.msra.mxu1 %v2166_v28  ;;  %v2316_v16 = vpack.c.bf16 %v2312_v10, %v2308_v39  ;;  %v2315_v43 = vpack.c.bf16 %v2311_v11, %v2307_v60 }
 0x2b0   :  { %v2457_v34 = vpop.permute.xlu1 %2456  ;;  %2387 = vmatprep.subr.bf16.mxu1 %v2317_v1  ;;  %v2314_v56 = vpack.c.bf16 %v2310_v17, %v2306_v19 }
 0x2b1   :  { %v2164_v50 = vpack.c.bf16 %v2160_v63, %v2156_v61  ;;  %v2463_v23 = vpop.permute.xlu0 %2462  ;;  %v2165_v5 = vpack.c.bf16 %v2161_v44, %v2157_v6 }
 0x2b2   :  { %6210 = vmatmul.mubr.msk.bf16.vlgmr.msra.gmra.mrb[4].mxu0 %vm192_vm0, %v6724_v13  ;;  %6218 = vmatmul.mubr.msk.bf16.vlgmr.msra.gmra.mrb[4].mxu1 %vm192_vm0, %v6726_v18  ;;  %v2488_v12 = vsel %vm912_vm7, %v2463_v23, %v2457_v34 }
 0x2b3   :  { %2184 = vmatprep.subr.bf16.mxu0 %v2165_v5  ;;  %2388 = vmatpush1.bf16.msra.mxu1 %v2316_v16  ;;  %v2493_v8 = vmul.f32 %v2488_v12, %v7208_v59 }
 0x2b4   :  { %v2465_v26 = vpop.permute.xlu1 %2464  ;;  %2185 = vmatpush1.bf16.msra.mxu0 %v2164_v50  ;;  %2042 = vmatprep.mubr.bf16.mxu0 %v6848_v4 }
 0x2b5   :  { %v2469_v53 = vpop.permute.xlu0 %2468  ;;  %2334 = vmatprep.subr.bf16.mxu0 %v2315_v43  ;;  %2279 = vmatprep.mubr.bf16.mxu1 %v6848_v4 }
 0x2b8   :  { %v2461_v41 = vpop.permute.xlu1 %2460 }
 0x2b9   :  { %v2471_v46 = vpop.permute.xlu0 %2470  ;;  %v2474_v13 = vsel %vm912_vm7, %v2461_v41, %v2463_v23 }
 0x2ba   :  { %v2477_v14 = vsel %vm912_vm7, %v2469_v53, %v2471_v46  ;;  %v2489_v15 = vsel %vm912_vm7, %v2471_v46, %v2465_v26  ;;  %6211 = vmatmul.mubr.msk.bf16.gmra.mrb[8].mxu0 %vm192_vm0, %v6725_v49  ;;  %6219 = vmatmul.mubr.msk.bf16.gmra.mrb[8].mxu1 %vm192_vm0, %v6727_v52  ;;  %v2492_v24 = vmul.f32 %v2474_v13, %v7235_v0 }
 0x2bb   :  { %v2497_v45 = vmul.f32 %v2489_v15, %v7208_v59  ;;  %2216 = vmatprep.mubr.bf16.mxu0 %v6848_v4  ;;  %2419 = vmatprep.mubr.bf16.mxu1 %v6848_v4  ;;  %v2496_v25 = vmul.f32 %v2477_v14, %v7235_v0 }
 0x2bc   :  { %v2459_v54 = vpop.permute.xlu1 %2458 }
 0x2bd   :  { %v2473_v49 = vsel %vm912_vm7, %v2459_v54, %v2461_v41  ;;  %v2467_v33 = vpop.permute.xlu0 %2466  ;;  %v2501_v42 = vpack.c.bf16 %v2497_v45, %v2493_v8  ;;  %v2500_v0 = vpack.c.bf16 %v2496_v25, %v2492_v24  ;;  %v2472_v6 = vsel %vm912_vm7, %v2457_v34, %v2459_v54 }
 0x2be   :  { %v2491_v62 = vmul.f32 %v2473_v49, %v7201_v51  ;;  %v2476_v59 = vsel %vm912_vm7, %v2467_v33, %v2469_v53  ;;  %v2475_v27 = vsel %vm912_vm7, %v2465_v26, %v2467_v33  ;;  %v2490_v34 = vmul.f32 %v2472_v6, %v7226_v31 }
 0x2bf   :  { %v2495_v10 = vmul.f32 %v2476_v59, %v7201_v51  ;;  %2571 = vmatprep.subr.bf16.mxu1 %v2501_v42  ;;  %v2494_v50 = vmul.f32 %v2475_v27, %v7226_v31 }
 0x2c0   :  { %v2641_v28 = vpop.permute.xlu1 %2640 }
 0x2c1   :  { %v2647_v55 = vpop.permute.xlu0 %2646  ;;  %v2499_v2 = vpack.c.bf16 %v2495_v10, %v2491_v62  ;;  %v2498_v41 = vpack.c.bf16 %v2494_v50, %v2490_v34 }
 0x2c2   :  { %6216 = vmatmul.mubr.msk.bf16.vlgmr.msra.gmra.mrb[4].mxu0 %vm192_vm0, %v6726_v18  ;;  %6224 = vmatmul.mubr.msk.bf16.vlgmr.msra.gmra.mrb[4].mxu1 %vm192_vm0, %v6728_v20  ;;  %v2672_v38 = vsel %vm1068_vm8, %v2647_v55, %v2641_v28 }
 0x2c3   :  { %2335 = vmatpush1.bf16.msra.mxu0 %v2314_v56  ;;  %2572 = vmatpush1.bf16.msra.mxu1 %v2500_v0  ;;  %v2677_v39 = vmul.f32 %v2672_v38, %v7243_v48 }
 0x2c4   :  { %2518 = vmatprep.subr.bf16.mxu0 %v2499_v2  ;;  %v2649_v1 = vpop.permute.xlu1 %2648  ;;  %2226 = vmatprep.mubr.bf16.mxu0 %v6848_v4 }
 0x2c5   :  { %v2653_v51 = vpop.permute.xlu0 %2652  ;;  %2429 = vmatprep.mubr.bf16.mxu1 %v6848_v4 }
 0x2c8   :  { %v2645_v61 = vpop.permute.xlu1 %2644 }
 0x2c9   :  { %v2655_v37 = vpop.permute.xlu0 %2654  ;;  %v2658_v18 = vsel %vm1068_vm8, %v2645_v61, %v2647_v55 }
 0x2ca   :  { %v2661_v63 = vsel %vm1068_vm8, %v2653_v51, %v2655_v37  ;;  %v2673_v44 = vsel %vm1068_vm8, %v2655_v37, %v2649_v1  ;;  %6217 = vmatmul.mubr.msk.bf16.gmra.mrb[8].mxu0 %vm192_vm0, %v6727_v52  ;;  %6225 = vmatmul.mubr.msk.bf16.gmra.mrb[8].mxu1 %vm192_vm0, %v6729_v7  ;;  %v2676_v5 = vmul.f32 %v2658_v18, %v7268_v35  ;;  %v6730_v52 = vld [vmem:[%s8657_s4 + $0x50] sm:$0xff]  }
 0x2cb   :  { %v2681_v11 = vmul.f32 %v2673_v44, %v7243_v48  ;;  %2366 = vmatprep.mubr.bf16.mxu0 %v6848_v4  ;;  %2603 = vmatprep.mubr.bf16.mxu1 %v6848_v4  ;;  %v2680_v16 = vmul.f32 %v2661_v63, %v7268_v35 }
 0x2cc   :  { %v2643_v23 = vpop.permute.xlu1 %2642 }
 0x2cd   :  { %v2657_v60 = vsel %vm1068_vm8, %v2643_v23, %v2645_v61  ;;  %v2651_v43 = vpop.permute.xlu0 %2650  ;;  %v2685_v26 = vpack.c.bf16 %v2681_v11, %v2677_v39  ;;  %v2684_v46 = vpack.c.bf16 %v2680_v16, %v2676_v5  ;;  %v2656_v54 = vsel %vm1068_vm8, %v2641_v28, %v2643_v23 }
 0x2ce   :  { %v2675_v53 = vmul.f32 %v2657_v60, %v7232_v36  ;;  %v2660_v48 = vsel %vm1068_vm8, %v2651_v43, %v2653_v51  ;;  %v2659_v17 = vsel %vm1068_vm8, %v2649_v1, %v2651_v43  ;;  %v2674_v59 = vmul.f32 %v2656_v54, %v7259_v29  ;;  %v6732_v1 = vld [vmem:[%s8657_s4 + $0x60] sm:$0xff]   ;;  %v6737_v54 = vld [vmem:[%s8657_s4 + $0x88] sm:$0xff]  }
 0x2cf   :  { %v2679_v12 = vmul.f32 %v2660_v48, %v7232_v36  ;;  %2755 = vmatprep.subr.bf16.mxu1 %v2685_v26  ;;  %v6731_v36 = vld [vmem:[%s8657_s4 + $0x58] sm:$0xff]  }
 0x2d0   :  { %v2825_v31 = vpop.permute.xlu1 %2824 }
 0x2d1   :  { %v2831_v13 = vpop.permute.xlu0 %2830  ;;  %v2683_v35 = vpack.c.bf16 %v2679_v12, %v2675_v53 }
 0x2d2   :  { %6222 = vmatmul.mubr.msk.bf16.vlgmr.msra.gmra.mrb[4].mxu0 %vm192_vm0, %v6728_v20  ;;  %6230 = vmatmul.mubr.msk.bf16.vlgmr.msra.gmra.mrb[4].mxu1 %vm192_vm0, %v6730_v52  ;;  %v2856_v8 = vsel %vm1224_vm9, %v2831_v13, %v2825_v31  ;;  %v2678_v20 = vmul.f32 %v2659_v17, %v7259_v29 }
 0x2d3   :  { %2519 = vmatpush1.bf16.msra.mxu0 %v2498_v41  ;;  %2756 = vmatpush1.bf16.msra.mxu1 %v2684_v46  ;;  %v2861_v42 = vmul.f32 %v2856_v8, %v7275_v47  ;;  %v6734_v41 = vld [vmem:[%s8657_s4 + $0x70] sm:$0xff]   ;;  %v6736_v8 = vld [vmem:[%s8657_s4 + $0x80] sm:$0xff]  }
 0x2d4   :  { %2702 = vmatprep.subr.bf16.mxu0 %v2683_v35  ;;  %v2833_v14 = vpop.permute.xlu1 %2832  ;;  %2613 = vmatprep.mubr.bf16.mxu1 %v6848_v4 }
 0x2d5   :  { %v2837_v15 = vpop.permute.xlu0 %2836  ;;  %2376 = vmatprep.mubr.bf16.mxu0 %v6848_v4 }
 0x2d8   :  { %v2829_v45 = vpop.permute.xlu1 %2828 }
 0x2d9   :  { %v2839_v24 = vpop.permute.xlu0 %2838  ;;  %v2842_v25 = vsel %vm1224_vm9, %v2829_v45, %v2831_v13 }
 0x2da   :  { %v2845_v49 = vsel %vm1224_vm9, %v2837_v15, %v2839_v24  ;;  %v2857_v33 = vsel %vm1224_vm9, %v2839_v24, %v2833_v14  ;;  %6223 = vmatmul.mubr.msk.bf16.gmra.mrb[8].mxu0 %vm192_vm0, %v6729_v7  ;;  %6231 = vmatmul.mubr.msk.bf16.gmra.mrb[8].mxu1 %vm192_vm0, %v6731_v36  ;;  %v2860_v19 = vmul.f32 %v2842_v25, %v7296_v30 }
 0x2db   :  { %v2865_v62 = vmul.f32 %v2857_v33, %v7275_v47  ;;  %2787 = vmatprep.mubr.bf16.mxu1 %v6848_v4  ;;  %2550 = vmatprep.mubr.bf16.mxu0 %v6848_v4  ;;  %v2864_v28 = vmul.f32 %v2845_v49, %v7296_v30  ;;  %v2682_v7 = vpack.c.bf16 %v2678_v20, %v2674_v59 }
 0x2dc   :  { %v2827_v10 = vpop.permute.xlu1 %2826 }
 0x2dd   :  { %v2841_v0 = vsel %vm1224_vm9, %v2827_v10, %v2829_v45  ;;  %v2835_v55 = vpop.permute.xlu0 %2834  ;;  %v2869_v56 = vpack.c.bf16 %v2865_v62, %v2861_v42  ;;  %v2868_v38 = vpack.c.bf16 %v2864_v28, %v2860_v19  ;;  %v2840_v63 = vsel %vm1224_vm9, %v2825_v31, %v2827_v10 }
 0x2de   :  { %v2859_v2 = vmul.f32 %v2841_v0, %v7264_v32  ;;  %v2844_v47 = vsel %vm1224_vm9, %v2835_v55, %v2837_v15  ;;  %v2843_v44 = vsel %vm1224_vm9, %v2833_v14, %v2835_v55  ;;  %v2858_v16 = vmul.f32 %v2840_v63, %v7290_v3 }
 0x2df   :  { %v2863_v51 = vmul.f32 %v2844_v47, %v7264_v32  ;;  %2939 = vmatprep.subr.bf16.mxu1 %v2869_v56  ;;  %v6733_v32 = vld [vmem:[%s8657_s4 + $0x68] sm:$0xff]   ;;  %v2862_v60 = vmul.f32 %v2843_v44, %v7290_v3 }
 0x2e0   :  { %v3009_v29 = vpop.permute.xlu1 %3008 }
 0x2e1   :  { %v3015_v61 = vpop.permute.xlu0 %3014  ;;  %v2867_v30 = vpack.c.bf16 %v2863_v51, %v2859_v2  ;;  %v2866_v3 = vpack.c.bf16 %v2862_v60, %v2858_v16 }
 0x2e2   :  { %6228 = vmatmul.mubr.msk.bf16.vlgmr.msra.gmra.mrb[4].mxu0 %vm192_vm0, %v6730_v52  ;;  %6236 = vmatmul.mubr.msk.bf16.vlgmr.msra.gmra.mrb[4].mxu1 %vm192_vm0, %v6732_v1  ;;  %v3040_v37 = vsel %vm1380_vm10, %v3015_v61, %v3009_v29 }
 0x2e3   :  { %2703 = vmatpush1.bf16.msra.mxu0 %v2682_v7  ;;  %2940 = vmatpush1.bf16.msra.mxu1 %v2868_v38  ;;  %v3045_v23 = vmul.f32 %v7306_v21, %v3040_v37 }
 0x2e4   :  { %2886 = vmatprep.subr.bf16.mxu0 %v2867_v30  ;;  %v3017_v6 = vpop.permute.xlu1 %3016  ;;  %2797 = vmatprep.mubr.bf16.mxu1 %v6848_v4 }
 0x2e5   :  { %v3021_v27 = vpop.permute.xlu0 %3020  ;;  %2560 = vmatprep.mubr.bf16.mxu0 %v6848_v4 }
 0x2e8   :  { %v3013_v18 = vpop.permute.xlu1 %3012 }
 0x2e9   :  { %v3023_v39 = vpop.permute.xlu0 %3022  ;;  %v3026_v11 = vsel %vm1380_vm10, %v3013_v18, %v3015_v61 }
 0x2ea   :  { %v3029_v34 = vsel %vm1380_vm10, %v3021_v27, %v3023_v39  ;;  %v3041_v50 = vsel %vm1380_vm10, %v3023_v39, %v3017_v6  ;;  %6229 = vmatmul.mubr.msk.bf16.gmra.mrb[8].mxu0 %vm192_vm0, %v6731_v36  ;;  %6237 = vmatmul.mubr.msk.bf16.gmra.mrb[8].mxu1 %vm192_vm0, %v6733_v32  ;;  %v3044_v26 = vmul.f32 %v7324_v57, %v3026_v11 }
 0x2eb   :  { %v3049_v5 = vmul.f32 %v7306_v21, %v3041_v50  ;;  %2734 = vmatprep.mubr.bf16.mxu0 %v6848_v4  ;;  %2971 = vmatprep.mubr.bf16.mxu1 %v6848_v4  ;;  %v3048_v53 = vmul.f32 %v7324_v57, %v3029_v34  ;;  %v6735_v57 = vld [vmem:[%s8657_s4 + $0x78] sm:$0xff]  }
 0x2ec   :  { %v3011_v43 = vpop.permute.xlu1 %3010 }
 0x2ed   :  { %v3025_v48 = vsel %vm1380_vm10, %v3011_v43, %v3013_v18  ;;  %v3019_v52 = vpop.permute.xlu0 %3018  ;;  %v3053_v12 = vpack.c.bf16 %v3049_v5, %v3045_v23  ;;  %v3052_v13 = vpack.c.bf16 %v3048_v53, %v3044_v26 }
 0x2ee   :  { %v3043_v31 = vmul.f32 %v7298_v58, %v3025_v48  ;;  %v3028_v21 = vsel %vm1380_vm10, %v3019_v52, %v3021_v27  ;;  %v3027_v14 = vsel %vm1380_vm10, %v3017_v6, %v3019_v52 }
 0x2ef   :  { %v3047_v46 = vmul.f32 %v7298_v58, %v3028_v21  ;;  %3123 = vmatprep.subr.bf16.mxu1 %v3053_v12  ;;  %v3024_v58 = vsel %vm1380_vm10, %v3009_v29, %v3011_v43  ;;  %v3046_v36 = vmul.f32 %v7318_v40, %v3027_v14 }
 0x2f0   :  { %v3042_v15 = vmul.f32 %v7318_v40, %v3024_v58 }
 0x2f1   :  { %v3051_v35 = vpack.c.bf16 %v3047_v46, %v3043_v31 }
 0x2f2   :  { %6234 = vmatmul.mubr.msk.bf16.vlgmr.msra.gmra.mrb[4].mxu0 %vm192_vm0, %v6732_v1  ;;  %6242 = vmatmul.mubr.msk.bf16.vlgmr.msra.gmra.mrb[4].mxu1 %vm192_vm0, %v6734_v41  ;;  %v3050_v45 = vpack.c.bf16 %v3046_v36, %v3042_v15 }
 0x2f3   :  { %2887 = vmatpush1.bf16.msra.mxu0 %v2866_v3  ;;  %3124 = vmatpush1.bf16.msra.mxu1 %v3052_v13 }
 0x2f4   :  { %3070 = vmatprep.subr.bf16.mxu0 %v3051_v35  ;;  %2744 = vmatprep.mubr.bf16.mxu0 %v6848_v4 }
 0x2f5   :  { %2981 = vmatprep.mubr.bf16.mxu1 %v6848_v4 }
 0x2fa   :  { %6235 = vmatmul.mubr.msk.bf16.gmra.mrb[8].mxu0 %vm192_vm0, %v6733_v32  ;;  %6243 = vmatmul.mubr.msk.bf16.gmra.mrb[8].mxu1 %vm192_vm0, %v6735_v57 }
 0x2fb   :  { %2918 = vmatprep.mubr.bf16.mxu0 %v6848_v4  ;;  %3155 = vmatprep.mubr.bf16.mxu1 %v6848_v4 }
 0x2fd   :  { %v7773_v19 = vpop.permute.xlu1 %3194 }
 0x2fe   :  { %v7777_v1 = vpop.permute.xlu0 %3199 }
 0x301   :  { %v7804_v52 = vpop.permute.xlu1 %3204 }
 0x302   :  { %6248 = vmatmul.mubr.msk.bf16.vlgmr.msra.gmra.mrb[4].mxu1 %vm192_vm0, %v6736_v8  ;;  %6240 = vmatmul.mubr.msk.bf16.vlgmr.msra.gmra.mrb[4].mxu0 %vm192_vm0, %v6734_v41  ;;  %v7813_v46 = vpop.permute.xlu0 %3209 }
 0x303   :  { %3071 = vmatpush1.bf16.msra.mxu0 %v3050_v45  ;;  %2928 = vmatprep.mubr.bf16.mxu0 %v6848_v4 }
 0x304   :  { %3165 = vmatprep.mubr.bf16.mxu1 %v6848_v4 }
 0x30a   :  { %6241 = vmatmul.mubr.msk.bf16.gmra.mrb[8].mxu0 %vm192_vm0, %v6735_v57  ;;  %6249 = vmatmul.mubr.msk.bf16.gmra.mrb[8].mxu1 %vm192_vm0, %v6737_v54 }
 0x30b   :  { %3102 = vmatprep.mubr.bf16.mxu0 %v6848_v4 }
 0x312   :  { %6246 = vmatmul.mubr.msk.bf16.vlgmr.msra.gmra.mrb[4].mxu0 %vm192_vm0, %v6736_v8 }
 0x313   :  { %3112 = vmatprep.mubr.bf16.mxu0 %v6848_v4 }
 0x31a   :  { %6247 = vmatmul.mubr.msk.bf16.gmra.mrb[8].mxu0 %vm192_vm0, %v6737_v54 }
 0x365   :  { %v1797_v40 = vpop.f32.mrb[12].mxu0 }
 0x366   :  { %v1799_v17 = vpop.f32.mrb[13].mxu0 }
 0x367   :  { %v1801_v24 = vpop.f32.mrb[14].mxu0 }
 0x368   :  { %v1803_v25 = vpop.f32.mrb[15].mxu0 }
 0x36d   :  { %v1807_v49 = vpop.f32.mrb[16].mxu0 }
 0x36e   :  { %v1809_v33 = vpop.f32.mrb[17].mxu0 }
 0x36f   :  { %v1811_v42 = vpop.f32.mrb[18].mxu0 }
 0x370   :  { %v1813_v62 = vpop.f32.mrb[19].mxu0 }
 0x3d5   :  { %v3157_v59 = vpop.f32.mrb[4].mxu1 }
 0x3d6   :  { %v6367_v20 = vadd.f32 %v3157_v59, %v1797_v40  ;;  %v3159_v10 = vpop.f32.mrb[5].mxu1 }
 0x3d7   :  { %v6368_v28 = vadd.f32 %v3159_v10, %v1799_v17  ;;  %v3161_v0 = vpop.f32.mrb[6].mxu1 }
 0x3d8   :  { %v3214_v55 = vadd.f32 %v6367_v20, %v7773_v19  ;;  %v6369_v4 = vadd.f32 %v3161_v0, %v1801_v24  ;;  %v3163_v56 = vpop.f32.mrb[7].mxu1 }
 0x3d9   :  { %v3215_v2 = vadd.f32 %v6368_v28, %v7773_v19  ;;  %v6370_v47 = vadd.f32 %v3163_v56, %v1803_v25 }
 0x3da   :  { %v7779_v51 = vmax.f32 %v3214_v55, 0.0  ;;  %v3218_v7 = vadd.f32 %v6369_v4, %v7777_v1 }
 0x3db   :  { %v7781_v29 = vmax.f32 %v3215_v2, 0.0  ;;  %v3219_v38 = vadd.f32 %v6370_v47, %v7777_v1 }
 0x3dc   :  { %v3378_v30 = vrot.slane %v7779_v51, 7  ;;  %v6252_v27 = vrot.slane %v7779_v51, 9  ;;  %v6254_v32 = vrot.slane %v7779_v51, 10  ;;  %v7789_v18 = vmax.f32 %v3218_v7, 0.0 }
 0x3dd   :  { %v3167_v61 = vpop.f32.mrb[8].mxu1  ;;  %v3379_v37 = vrot.slane %v7781_v29, 7  ;;  %v7791_v44 = vmax.f32 %v3219_v38, 0.0  ;;  %v6256_v23 = vrot.slane %v7779_v51, 11  ;;  %v6258_v5 = vrot.slane %v7779_v51, 12 }
 0x3de   :  { %v3169_v6 = vpop.f32.mrb[9].mxu1  ;;  %v6371_v39 = vadd.f32 %v3167_v61, %v1807_v49  ;;  %v6260_v16 = vrot.slane %v7779_v51, 13  ;;  %v6253_v60 = vrot.slane %v7781_v29, 9  ;;  %v7799_v43 = vrot.slane %v3378_v30, 7 }
 0x3df   :  { %v3171_v63 = vpop.f32.mrb[10].mxu1  ;;  %v6372_v11 = vadd.f32 %v3169_v6, %v1809_v33  ;;  %v6255_v26 = vrot.slane %v7781_v29, 10  ;;  %v6257_v53 = vrot.slane %v7781_v29, 11  ;;  %v6259_v48 = vrot.slane %v7781_v29, 12 }
 0x3e0   :  { %v6373_v34 = vadd.f32 %v3171_v63, %v1811_v42  ;;  %v3173_v50 = vpop.f32.mrb[11].mxu1  ;;  %v6261_v12 = vrot.slane %v7781_v29, 13  ;;  %v7809_v31 = vrot.slane %v3379_v37, 7  ;;  %v3394_v21 = vrot.slane %v7789_v18, 7 }
 0x3e1   :  { %v6264_v41 = vrot.slane %v7789_v18, 9  ;;  %v6266_v3 = vrot.slane %v7789_v18, 10  ;;  %v3395_v13 = vrot.slane %v7791_v44, 7  ;;  %v3222_v35 = vadd.f32 %v6371_v39, %v7804_v52 }
 0x3e2   :  { %v3223_v57 = vadd.f32 %v6372_v11, %v7804_v52  ;;  %v6268_v58 = vrot.slane %v7789_v18, 11  ;;  %v6270_v14 = vrot.slane %v7789_v18, 12  ;;  %v3226_v15 = vadd.f32 %v6373_v34, %v7813_v46 }
 0x3e3   :  { %v6374_v36 = vadd.f32 %v3173_v50, %v1813_v62  ;;  %v6272_v45 = vrot.slane %v7789_v18, 13  ;;  %v6265_v54 = vrot.slane %v7791_v44, 9  ;;  %v7824_v40 = vmax.f32 %v3222_v35, 0.0 }
 0x3e4   :  { %v7826_v17 = vmax.f32 %v3223_v57, 0.0  ;;  %v7830_v25 = vrot.slane %v3394_v21, 7  ;;  %v6267_v49 = vrot.slane %v7791_v44, 10  ;;  %v6269_v33 = vrot.slane %v7791_v44, 11 }
 0x3e5   :  { %v3104_v8 = vpop.f32.mrb[4].mxu0  ;;  %v7834_v42 = vmax.f32 %v3226_v15, 0.0  ;;  %v6271_v59 = vrot.slane %v7791_v44, 12  ;;  %v7840_v10 = vrot.slane %v3395_v13, 7  ;;  %v8665_v28 = vrot.slane %v7824_v40, 7 }
 0x3e6   :  { %v3106_v24 = vpop.f32.mrb[5].mxu0  ;;  %v8664_v55 = vrot.slane %v7826_v17, 7  ;;  %v3227_v4 = vadd.f32 %v6374_v36, %v7813_v46  ;;  %v3212_v56 = vadd.f32 %v7773_v19, %v3104_v8  ;;  %v8711_v22 = vrot.slane %v7826_v17, 11 }
 0x3e7   :  { %v3108_v62 = vpop.f32.mrb[6].mxu0  ;;  %v3213_v2 = vadd.f32 %v7773_v19, %v3106_v24  ;;  %v7854_v63 = vrot.slane %v8665_v28, 7  ;;  %v8666_v11 = vrot.slane %v7834_v42, 7 }
 0x3e8   :  { %v3110_v0 = vpop.f32.mrb[7].mxu0  ;;  %v7864_v57 = vrot.slane %v8664_v55, 7  ;;  %v7867_v36 = vmax.f32 %v3227_v4, 0.0  ;;  %v3228_v8 = vmax.f32 %v3212_v56, 0.0  ;;  %v3216_v15 = vadd.f32 %v7777_v1, %v3108_v62 }
 0x3e9   :  { %v7875_v35 = vrot.slane %v8666_v11, 7  ;;  %v3229_v55 = vmax.f32 %v3213_v2, 0.0  ;;  %v3217_v4 = vadd.f32 %v7777_v1, %v3110_v0 }
 0x3ea   :  { %v8667_v61 = vrot.slane %v7867_v36, 7  ;;  %v3246_v39 = vrot.slane %v3228_v8, 1  ;;  %v3250_v38 = vrot.slane %v3228_v8, 2  ;;  %v3254_v7 = vrot.slane %v3228_v8, 3 }
 0x3eb   :  { %v3258_v47 = vrot.slane %v3228_v8, 4  ;;  %v3262_v28 = vrot.slane %v3228_v8, 5  ;;  %v3266_v11 = vrot.slane %v3228_v8, 6  ;;  %v3270_v20 = vrot.slane %v3228_v8, 7 }
 0x3ec   :  { %v7885_v62 = vsel %vm234_vm1, %v3228_v8, %v3378_v30  ;;  %v7889_v1 = vsel %vm234_vm1, %v3246_v39, %v7779_v51  ;;  %v7894_v0 = vsel %vm234_vm1, %v3250_v38, %v6252_v27  ;;  %v7899_v2 = vsel %vm234_vm1, %v3254_v7, %v6254_v32 }
 0x3ed   :  { %v3114_v24 = vpop.f32.mrb[8].mxu0  ;;  %v7909_v30 = vsel %vm234_vm1, %v3262_v28, %v6258_v5  ;;  %v7914_v27 = vsel %vm234_vm1, %v3266_v11, %v6260_v16  ;;  %v7918_v38 = vsel %vm234_vm1, %v3270_v20, %v7799_v43  ;;  %v3247_v28 = vrot.slane %v3229_v55, 1 }
 0x3ee   :  { %v3116_v6 = vpop.f32.mrb[9].mxu0  ;;  %v3220_v19 = vadd.f32 %v7804_v52, %v3114_v24  ;;  %v7904_v24 = vsel %vm234_vm1, %v3258_v47, %v6256_v23  ;;  %v3251_v7 = vrot.slane %v3229_v55, 2  ;;  %v3255_v39 = vrot.slane %v3229_v55, 3 }
 0x3ef   :  { %v3118_v56 = vpop.f32.mrb[10].mxu0  ;;  %v3259_v11 = vrot.slane %v3229_v55, 4  ;;  %v3263_v8 = vrot.slane %v3229_v55, 5  ;;  %v3267_v47 = vrot.slane %v3229_v55, 6  ;;  %v3271_v23 = vrot.slane %v3229_v55, 7 }
 0x3f0   :  { %v3120_v34 = vpop.f32.mrb[11].mxu0  ;;  %v7939_v51 = vsel %vm234_vm1, %v3229_v55, %v3379_v37  ;;  %v7943_v16 = vsel %vm234_vm1, %v3247_v28, %v7781_v29  ;;  %v7948_v20 = vsel %vm234_vm1, %v3251_v7, %v6253_v60  ;;  %v7953_v43 = vsel %vm234_vm1, %v3255_v39, %v6255_v26 }
 0x3f1   :  { %v7958_v5 = vsel %vm234_vm1, %v3259_v11, %v6257_v53  ;;  %v7963_v37 = vsel %vm234_vm1, %v3263_v8, %v6259_v48  ;;  %v7968_v60 = vsel %vm234_vm1, %v3267_v47, %v6261_v12  ;;  %v7972_v55 = vsel %vm234_vm1, %v3271_v23, %v7809_v31 }
 0x3f2   :  { %v3232_v7 = vmax.f32 %v3216_v15, 0.0  ;;  %v3233_v39 = vmax.f32 %v3217_v4, 0.0  ;;  %v7991_v11 = vmax.f32 %v3220_v19, 0.0  ;;  %v7994_v8 = vadd.f32 %v7804_v52, %v3116_v6 }
 0x3f3   :  { %v7997_v29 = vadd.f32 %v7813_v46, %v3118_v56  ;;  %v8000_v12 = vadd.f32 %v7813_v46, %v3120_v34  ;;  %v8703_v4 = vrot.slane %v7824_v40, 9 }
 0x3f4   :  { %v3276_v48 = vrot.slane %v3232_v7, 1  ;;  %v3280_v31 = vrot.slane %v3232_v7, 2  ;;  %v3284_v28 = vrot.slane %v3232_v7, 3  ;;  %v3288_v53 = vrot.slane %v3232_v7, 4 }
 0x3f5   :  { %v3292_v32 = vrot.slane %v3232_v7, 5  ;;  %v3296_v26 = vrot.slane %v3232_v7, 6  ;;  %v3300_v47 = vrot.slane %v3232_v7, 7  ;;  %v8005_v19 = vsel %vm234_vm1, %v3232_v7, %v3394_v21 }
 0x3f6   :  { %v8009_v52 = vsel %vm234_vm1, %v3276_v48, %v7789_v18  ;;  %v8014_v46 = vsel %vm234_vm1, %v3280_v31, %v6264_v41  ;;  %v8019_v6 = vsel %vm234_vm1, %v3284_v28, %v6266_v3  ;;  %v8024_v34 = vsel %vm234_vm1, %v3288_v53, %v6268_v58 }
 0x3f7   :  { %8694 = vst [vmem:[#allocation19_spill] sm:$0xff] %v8024_v34  ;;  %v8029_v21 = vsel %vm234_vm1, %v3292_v32, %v6270_v14  ;;  %v8034_v41 = vsel %vm234_vm1, %v3296_v26, %v6272_v45  ;;  %v8038_v15 = vsel %vm234_vm1, %v3300_v47, %v7830_v25  ;;  %v3277_v32 = vrot.slane %v3233_v39, 1 }
 0x3f8   :  { %8695 = vst [vmem:[#allocation20_spill] sm:$0xff] %v8029_v21  ;;  %8696 = vst [vmem:[#allocation21_spill] sm:$0xff] %v8034_v41  ;;  %v3281_v26 = vrot.slane %v3233_v39, 2  ;;  %v3285_v53 = vrot.slane %v3233_v39, 3  ;;  %v3289_v28 = vrot.slane %v3233_v39, 4  ;;  %v3293_v48 = vrot.slane %v3233_v39, 5 }
 0x3f9   :  { %8697 = vst [vmem:[#allocation22_spill] sm:$0xff] %v8038_v15  ;;  %v3297_v31 = vrot.slane %v3233_v39, 6  ;;  %v3301_v47 = vrot.slane %v3233_v39, 7  ;;  %v8059_v7 = vsel %vm234_vm1, %v3233_v39, %v3395_v13  ;;  %v8063_v45 = vsel %vm234_vm1, %v3277_v32, %v7791_v44 }
 0x3fa   :  { %v8068_v56 = vsel %vm234_vm1, %v3281_v26, %v6265_v54  ;;  %v8073_v25 = vsel %vm234_vm1, %v3285_v53, %v6267_v49  ;;  %v8078_v18 = vsel %vm234_vm1, %v3289_v28, %v6269_v33  ;;  %v8083_v13 = vsel %vm234_vm1, %v3293_v48, %v6271_v59 }
 0x3fb   :  { %8698 = vst [vmem:[#allocation23_spill] sm:$0xff] %v8083_v13  ;;  %v8699_v39 = vrot.slane %v7791_v44, 13  ;;  %v8092_v32 = vsel %vm234_vm1, %v3301_v47, %v7840_v10  ;;  %v3306_v48 = vrot.slane %v7991_v11, 1  ;;  %v3314_v47 = vrot.slane %v7991_v11, 3 }
 0x3fc   :  { %8701 = vst [vmem:[#allocation25_spill] sm:$0xff] %v8092_v32  ;;  %v3322_v14 = vrot.slane %v7991_v11, 5  ;;  %v3326_v44 = vrot.slane %v7991_v11, 6  ;;  %v3330_v53 = vrot.slane %v7991_v11, 7  ;;  %v8702_v59 = vrot.slane %v7824_v40, 7 }
 0x3fd   :  { %v8088_v54 = vsel %vm234_vm1, %v3297_v31, %v8699_v39  ;;  %v3310_v31 = vrot.slane %v7991_v11, 2  ;;  %v3318_v39 = vrot.slane %v7991_v11, 4  ;;  %v8125_v28 = vsel %vm234_vm1, %v3306_v48, %v7824_v40 }
 0x3fe   :  { %8700 = vst [vmem:[#allocation24_spill] sm:$0xff] %v8088_v54  ;;  %v8121_v10 = vsel %vm234_vm1, %v7991_v11, %v8702_v59  ;;  %v8704_v58 = vrot.slane %v7824_v40, 10  ;;  %v8705_v3 = vrot.slane %v7824_v40, 11  ;;  %v8706_v11 = vrot.slane %v7824_v40, 12 }
 0x3ff   :  { %v8130_v26 = vsel %vm234_vm1, %v3310_v31, %v8703_v4  ;;  %v8707_v48 = vrot.slane %v7824_v40, 13  ;;  %v8154_v31 = vsel %vm234_vm1, %v3330_v53, %v7854_v63  ;;  %v8178_v40 = vrot.slane %v8667_v61, 7 }
 0x400   :  { %v8135_v33 = vsel %vm234_vm1, %v3314_v47, %v8704_v58  ;;  %v8140_v49 = vsel %vm234_vm1, %v3318_v39, %v8705_v3  ;;  %v8145_v59 = vsel %vm234_vm1, %v3322_v14, %v8706_v11  ;;  %v8182_v47 = vmax.f32 %v8000_v12, 0.0 }
 0x401   :  { %v8150_v4 = vsel %vm234_vm1, %v3326_v44, %v8707_v48  ;;  %v3237_v48 = vmax.f32 %v7994_v8, 0.0  ;;  %v3240_v44 = vmax.f32 %v7997_v29, 0.0  ;;  %v8708_v8 = vrot.slane %v7826_v17, 7 }
 0x402   :  { %v8709_v29 = vrot.slane %v7826_v17, 9  ;;  %v8710_v61 = vrot.slane %v7826_v17, 10  ;;  %v8716_v41 = vrot.slane %v7834_v42, 10  ;;  %v8717_v21 = vrot.slane %v7834_v42, 11 }
 0x403   :  { %v3307_v63 = vrot.slane %v3237_v48, 1  ;;  %v3311_v3 = vrot.slane %v3237_v48, 2  ;;  %v3315_v58 = vrot.slane %v3237_v48, 3  ;;  %v3319_v39 = vrot.slane %v3237_v48, 4 }
 0x404   :  { %v3323_v53 = vrot.slane %v3237_v48, 5  ;;  %v3327_v23 = vrot.slane %v3237_v48, 6  ;;  %v3331_v11 = vrot.slane %v3237_v48, 7  ;;  %v8187_v14 = vsel %vm234_vm1, %v3237_v48, %v8708_v8 }
 0x405   :  { %v8191_v50 = vsel %vm234_vm1, %v3307_v63, %v7826_v17  ;;  %v8196_v12 = vsel %vm234_vm1, %v3311_v3, %v8709_v29  ;;  %v8201_v9 = vsel %vm234_vm1, %v3315_v58, %v8710_v61  ;;  %v8206_v15 = vsel %vm234_vm1, %v3319_v39, %v8711_v22 }
 0x406   :  { %v8712_v48 = vrot.slane %v7826_v17, 12  ;;  %v8713_v8 = vrot.slane %v7826_v17, 13  ;;  %v8220_v29 = vsel %vm234_vm1, %v3331_v11, %v7864_v57  ;;  %v3645_v61 = vpack.c.bf16 %v8187_v14, %v8187_v14 }
 0x407   :  { %v3336_v39 = vrot.slane %v3240_v44, 1  ;;  %v3340_v11 = vrot.slane %v3240_v44, 2  ;;  %v3352_v58 = vrot.slane %v3240_v44, 5  ;;  %v3356_v22 = vrot.slane %v3240_v44, 6 }
 0x408   :  { %v8211_v63 = vsel %vm234_vm1, %v3323_v53, %v8712_v48  ;;  %v8216_v3 = vsel %vm234_vm1, %v3327_v23, %v8713_v8  ;;  %v3344_v48 = vrot.slane %v3240_v44, 3  ;;  %v3348_v8 = vrot.slane %v3240_v44, 4 }
 0x409   :  { %v3360_v32 = vrot.slane %v3240_v44, 7  ;;  %v8714_v53 = vrot.slane %v7834_v42, 7  ;;  %v8245_v23 = vsel %vm234_vm1, %v3336_v39, %v7834_v42  ;;  %v8715_v57 = vrot.slane %v7834_v42, 9 }
 0x40a   :  { %v8255_v54 = vsel %vm234_vm1, %v3344_v48, %v8716_v41  ;;  %v8260_v13 = vsel %vm234_vm1, %v3348_v8, %v8717_v21  ;;  %v8721_v39 = vrot.slane %v7834_v42, 13  ;;  %v3337_v8 = vrot.slane %v8182_v47, 1 }
 0x40b   :  { %v8241_v17 = vsel %vm234_vm1, %v3240_v44, %v8714_v53  ;;  %v8250_v14 = vsel %vm234_vm1, %v3340_v11, %v8715_v57  ;;  %8718 = vst [vmem:[#allocation26_spill] sm:$0xff] %v8260_v13  ;;  %v8719_v44 = vrot.slane %v7834_v42, 12  ;;  %v8274_v11 = vsel %vm234_vm1, %v3360_v32, %v7875_v35 }
 0x40c   :  { %v8270_v57 = vsel %vm234_vm1, %v3356_v22, %v8721_v39  ;;  %8723 = vst [vmem:[#allocation29_spill] sm:$0xff] %v8274_v11  ;;  %v3345_v39 = vrot.slane %v8182_v47, 3  ;;  %v3353_v48 = vrot.slane %v8182_v47, 5  ;;  %v3357_v42 = vrot.slane %v8182_v47, 6 }
 0x40d   :  { %v8265_v53 = vsel %vm234_vm1, %v3352_v58, %v8719_v44  ;;  %8722 = vst [vmem:[#allocation28_spill] sm:$0xff] %v8270_v57  ;;  %v3341_v44 = vrot.slane %v8182_v47, 2  ;;  %v3349_v58 = vrot.slane %v8182_v47, 4  ;;  %v3361_v22 = vrot.slane %v8182_v47, 7 }
 0x40e   :  { %8720 = vst [vmem:[#allocation27_spill] sm:$0xff] %v8265_v53  ;;  %v8724_v21 = vrot.slane %v7867_v36, 7  ;;  %v8307_v32 = vsel %vm234_vm1, %v3337_v8, %v7867_v36  ;;  %v8725_v41 = vrot.slane %v7867_v36, 9  ;;  %v8726_v57 = vrot.slane %v7867_v36, 10 }
 0x40f   :  { %v8727_v13 = vrot.slane %v7867_v36, 11  ;;  %v8729_v8 = vrot.slane %v7867_v36, 13 }
 0x410   :  { %v8303_v35 = vsel %vm234_vm1, %v8182_v47, %v8724_v21  ;;  %v8312_v11 = vsel %vm234_vm1, %v3341_v44, %v8725_v41  ;;  %v8317_v53 = vsel %vm234_vm1, %v3345_v39, %v8726_v57  ;;  %v8728_v47 = vrot.slane %v7867_v36, 12 }
 0x411   :  { %v8322_v34 = vsel %vm234_vm1, %v3349_v58, %v8727_v13  ;;  %v8332_v41 = vsel %vm234_vm1, %v3357_v42, %v8729_v8  ;;  %v8336_v44 = vsel %vm234_vm1, %v3361_v22, %v8178_v40 }
 0x412   :  { %v8327_v21 = vsel %vm234_vm1, %v3353_v48, %v8728_v47 }
 0x413   :  { %6830 = dma.done.wait [#allocation3], 131072 }
 0x414   :  { %6831 = vsyncadd [#allocation3], 4294836224  ;;  %v8730_v39 = vpack.c.bf16 %v7939_v51, %v7939_v51  ;;  %5404 = vmatprep.mubr.bf16.mxu0 %v3645_v61  ;;  %v3681_v47 = vld [vmem:[#allocation2 + $0x8] sm:$0xff]  ;;  %v3680_v48 = vld [vmem:[#allocation2] sm:$0xff]  ;;  %vm6139_vm11 = vcmask 25600  }
 0x415   :  { %v4193_v8 = vld [vmem:[#allocation2 + $0x1008] sm:$0xff]  ;;  %4716 = vmatprep.subr.bf16.mxu1 %v3681_v47  ;;  %v4192_v36 = vld [vmem:[#allocation2 + $0x1000] sm:$0xff]  ;;  %v3683_v42 = vld [vmem:[#allocation2 + $0x18] sm:$0xff] }
 0x416   :  { %4748 = vmatprep.mubr.bf16.mxu1 %v8730_v39  ;;  %5372 = vmatprep.subr.bf16.mxu0 %v4193_v8  ;;  %v4195_v58 = vld [vmem:[#allocation2 + $0x1018] sm:$0xff]  ;;  %v3682_v22 = vld [vmem:[#allocation2 + $0x10] sm:$0xff]  ;;  %v3685_v13 = vld [vmem:[#allocation2 + $0x28] sm:$0xff] }
 0x417   :  { %4717 = vmatpush1.bf16.msra.mxu1 %v3680_v48  ;;  %5373 = vmatpush1.bf16.msra.mxu0 %v4192_v36  ;;  %v4194_v40 = vld [vmem:[#allocation2 + $0x1010] sm:$0xff]  ;;  %v4197_v57 = vld [vmem:[#allocation2 + $0x1028] sm:$0xff]  ;;  %v3684_v51 = vld [vmem:[#allocation2 + $0x20] sm:$0xff] }
 0x418   :  { %4718 = vmatprep.subr.bf16.mxu1 %v3683_v42  ;;  %5374 = vmatprep.subr.bf16.mxu0 %v4195_v58  ;;  %v4196_v61 = vld [vmem:[#allocation2 + $0x1020] sm:$0xff]  ;;  %v3687_v39 = vld [vmem:[#allocation2 + $0x38] sm:$0xff]  ;;  %v3686_v48 = vld [vmem:[#allocation2 + $0x30] sm:$0xff] }
 0x419   :  { %v4199_v47 = vld [vmem:[#allocation2 + $0x1038] sm:$0xff]  ;;  %v4198_v36 = vld [vmem:[#allocation2 + $0x1030] sm:$0xff]  ;;  %v3689_v42 = vld [vmem:[#allocation2 + $0x48] sm:$0xff] }
 0x41a   :  { %v4201_v58 = vld [vmem:[#allocation2 + $0x1048] sm:$0xff]  ;;  %v3690_v8 = vld [vmem:[#allocation2 + $0x50] sm:$0xff] }
 0x41b   :  { %4719 = vmatpush1.bf16.msra.mxu1 %v3682_v22  ;;  %5375 = vmatpush1.bf16.msra.mxu0 %v4194_v40  ;;  %v3688_v22 = vld [vmem:[#allocation2 + $0x40] sm:$0xff] }
 0x41c   :  { %4720 = vmatprep.subr.bf16.mxu1 %v3685_v13  ;;  %5376 = vmatprep.subr.bf16.mxu0 %v4197_v57  ;;  %v4200_v40 = vld [vmem:[#allocation2 + $0x1040] sm:$0xff]  ;;  %v3691_v13 = vld [vmem:[#allocation2 + $0x58] sm:$0xff] }
 0x41d   :  { %v4203_v57 = vld [vmem:[#allocation2 + $0x1058] sm:$0xff] }
 0x41f   :  { %4721 = vmatpush1.bf16.msra.mxu1 %v3684_v51  ;;  %5377 = vmatpush1.bf16.msra.mxu0 %v4196_v61  ;;  %v4202_v51 = vld [vmem:[#allocation2 + $0x1050] sm:$0xff]  ;;  %v3693_v61 = vld [vmem:[#allocation2 + $0x68] sm:$0xff] }
 0x420   :  { %4722 = vmatprep.subr.bf16.mxu1 %v3687_v39  ;;  %5378 = vmatprep.subr.bf16.mxu0 %v4199_v47  ;;  %v4205_v39 = vld [vmem:[#allocation2 + $0x1068] sm:$0xff]  ;;  %v3692_v47 = vld [vmem:[#allocation2 + $0x60] sm:$0xff] }
 0x423   :  { %4723 = vmatpush1.bf16.msra.mxu1 %v3686_v48  ;;  %5379 = vmatpush1.bf16.msra.mxu0 %v4198_v36  ;;  %v4204_v48 = vld [vmem:[#allocation2 + $0x1060] sm:$0xff]  ;;  %v3695_v36 = vld [vmem:[#allocation2 + $0x78] sm:$0xff] }
 0x424   :  { %4724 = vmatprep.subr.bf16.mxu1 %v3689_v42  ;;  %5380 = vmatprep.subr.bf16.mxu0 %v4201_v58  ;;  %v4207_v42 = vld [vmem:[#allocation2 + $0x1078] sm:$0xff]  ;;  %v3694_v58 = vld [vmem:[#allocation2 + $0x70] sm:$0xff] }
 0x427   :  { %4725 = vmatpush1.bf16.msra.mxu1 %v3688_v22  ;;  %5381 = vmatpush1.bf16.msra.mxu0 %v4200_v40  ;;  %v4206_v22 = vld [vmem:[#allocation2 + $0x1070] sm:$0xff]  ;;  %v3697_v40 = vld [vmem:[#allocation2 + $0x88] sm:$0xff] }
 0x428   :  { %4726 = vmatprep.subr.bf16.mxu1 %v3691_v13  ;;  %5382 = vmatprep.subr.bf16.mxu0 %v4203_v57  ;;  %v4209_v13 = vld [vmem:[#allocation2 + $0x1088] sm:$0xff]  ;;  %v3696_v57 = vld [vmem:[#allocation2 + $0x80] sm:$0xff] }
 0x42b   :  { %4727 = vmatpush1.bf16.msra.mxu1 %v3690_v8  ;;  %5383 = vmatpush1.bf16.msra.mxu0 %v4202_v51  ;;  %v4208_v8 = vld [vmem:[#allocation2 + $0x1080] sm:$0xff]  ;;  %v3699_v51 = vld [vmem:[#allocation2 + $0x98] sm:$0xff] }
 0x42c   :  { %4728 = vmatprep.subr.bf16.mxu1 %v3693_v61  ;;  %5384 = vmatprep.subr.bf16.mxu0 %v4205_v39  ;;  %v4211_v61 = vld [vmem:[#allocation2 + $0x1098] sm:$0xff]  ;;  %v3698_v39 = vld [vmem:[#allocation2 + $0x90] sm:$0xff] }
 0x42f   :  { %4729 = vmatpush1.bf16.msra.mxu1 %v3692_v47  ;;  %5385 = vmatpush1.bf16.msra.mxu0 %v4204_v48  ;;  %v4210_v47 = vld [vmem:[#allocation2 + $0x1090] sm:$0xff]  ;;  %v3701_v48 = vld [vmem:[#allocation2 + $0xa8] sm:$0xff] }
 0x430   :  { %4730 = vmatprep.subr.bf16.mxu1 %v3695_v36  ;;  %5386 = vmatprep.subr.bf16.mxu0 %v4207_v42  ;;  %v4213_v36 = vld [vmem:[#allocation2 + $0x10a8] sm:$0xff]  ;;  %v3700_v42 = vld [vmem:[#allocation2 + $0xa0] sm:$0xff] }
 0x433   :  { %4731 = vmatpush1.bf16.msra.mxu1 %v3694_v58  ;;  %5387 = vmatpush1.bf16.msra.mxu0 %v4206_v22  ;;  %v4212_v58 = vld [vmem:[#allocation2 + $0x10a0] sm:$0xff]  ;;  %v3703_v22 = vld [vmem:[#allocation2 + $0xb8] sm:$0xff] }
 0x434   :  { %4732 = vmatprep.subr.bf16.mxu1 %v3697_v40  ;;  %5388 = vmatprep.subr.bf16.mxu0 %v4209_v13  ;;  %v4215_v40 = vld [vmem:[#allocation2 + $0x10b8] sm:$0xff]  ;;  %v3702_v13 = vld [vmem:[#allocation2 + $0xb0] sm:$0xff] }
 0x437   :  { %4733 = vmatpush1.bf16.msra.mxu1 %v3696_v57  ;;  %5389 = vmatpush1.bf16.msra.mxu0 %v4208_v8  ;;  %v4214_v57 = vld [vmem:[#allocation2 + $0x10b0] sm:$0xff]  ;;  %v3705_v8 = vld [vmem:[#allocation2 + $0xc8] sm:$0xff] }
 0x438   :  { %4734 = vmatprep.subr.bf16.mxu1 %v3699_v51  ;;  %5390 = vmatprep.subr.bf16.mxu0 %v4211_v61  ;;  %v4217_v51 = vld [vmem:[#allocation2 + $0x10c8] sm:$0xff]  ;;  %v3704_v61 = vld [vmem:[#allocation2 + $0xc0] sm:$0xff] }
 0x43b   :  { %4735 = vmatpush1.bf16.msra.mxu1 %v3698_v39  ;;  %5391 = vmatpush1.bf16.msra.mxu0 %v4210_v47  ;;  %v4216_v39 = vld [vmem:[#allocation2 + $0x10c0] sm:$0xff]  ;;  %v3707_v47 = vld [vmem:[#allocation2 + $0xd8] sm:$0xff] }
 0x43c   :  { %4736 = vmatprep.subr.bf16.mxu1 %v3701_v48  ;;  %5392 = vmatprep.subr.bf16.mxu0 %v4213_v36  ;;  %v4219_v48 = vld [vmem:[#allocation2 + $0x10d8] sm:$0xff]  ;;  %v3706_v36 = vld [vmem:[#allocation2 + $0xd0] sm:$0xff] }
 0x43f   :  { %4737 = vmatpush1.bf16.msra.mxu1 %v3700_v42  ;;  %5393 = vmatpush1.bf16.msra.mxu0 %v4212_v58  ;;  %v4218_v42 = vld [vmem:[#allocation2 + $0x10d0] sm:$0xff]  ;;  %v3709_v58 = vld [vmem:[#allocation2 + $0xe8] sm:$0xff] }
 0x440   :  { %4738 = vmatprep.subr.bf16.mxu1 %v3703_v22  ;;  %5394 = vmatprep.subr.bf16.mxu0 %v4215_v40  ;;  %v4221_v22 = vld [vmem:[#allocation2 + $0x10e8] sm:$0xff]  ;;  %v3708_v40 = vld [vmem:[#allocation2 + $0xe0] sm:$0xff] }
 0x443   :  { %4739 = vmatpush1.bf16.msra.mxu1 %v3702_v13  ;;  %5395 = vmatpush1.bf16.msra.mxu0 %v4214_v57  ;;  %v4220_v13 = vld [vmem:[#allocation2 + $0x10e0] sm:$0xff]  ;;  %v3711_v57 = vld [vmem:[#allocation2 + $0xf8] sm:$0xff] }
 0x444   :  { %4740 = vmatprep.subr.bf16.mxu1 %v3705_v8  ;;  %5396 = vmatprep.subr.bf16.mxu0 %v4217_v51  ;;  %v4223_v8 = vld [vmem:[#allocation2 + $0x10f8] sm:$0xff]  ;;  %v3710_v51 = vld [vmem:[#allocation2 + $0xf0] sm:$0xff] }
 0x447   :  { %4741 = vmatpush1.bf16.msra.mxu1 %v3704_v61  ;;  %5397 = vmatpush1.bf16.msra.mxu0 %v4216_v39  ;;  %v4222_v61 = vld [vmem:[#allocation2 + $0x10f0] sm:$0xff]  ;;  %v3713_v39 = vld [vmem:[#allocation2 + $0x108] sm:$0xff] }
 0x448   :  { %4742 = vmatprep.subr.bf16.mxu1 %v3707_v47  ;;  %5398 = vmatprep.subr.bf16.mxu0 %v4219_v48  ;;  %v4225_v47 = vld [vmem:[#allocation2 + $0x1108] sm:$0xff]  ;;  %v3712_v48 = vld [vmem:[#allocation2 + $0x100] sm:$0xff] }
 0x44b   :  { %4743 = vmatpush1.bf16.msra.mxu1 %v3706_v36  ;;  %5399 = vmatpush1.bf16.msra.mxu0 %v4218_v42  ;;  %v4224_v36 = vld [vmem:[#allocation2 + $0x1100] sm:$0xff]  ;;  %v3715_v42 = vld [vmem:[#allocation2 + $0x118] sm:$0xff] }
 0x44c   :  { %4744 = vmatprep.subr.bf16.mxu1 %v3709_v58  ;;  %5400 = vmatprep.subr.bf16.mxu0 %v4221_v22  ;;  %v4227_v58 = vld [vmem:[#allocation2 + $0x1118] sm:$0xff]  ;;  %v8731_v22 = vpack.c.bf16 %v7885_v62, %v7885_v62  ;;  %v8734_v62 = vpack.c.bf16 %v8191_v50, %v8191_v50  ;;  %v3720_v50 = vld [vmem:[#allocation2 + $0x140] sm:$0xff] }
 0x44f   :  { %4745 = vmatpush1.bf16.msra.mxu1 %v3708_v40  ;;  %5401 = vmatpush1.bf16.msra.mxu0 %v4220_v13  ;;  %v8732_v40 = vpack.c.bf16 %v8121_v10, %v8121_v10  ;;  %v3714_v13 = vld [vmem:[#allocation2 + $0x110] sm:$0xff]  ;;  %v3716_v10 = vld [vmem:[#allocation2 + $0x120] sm:$0xff] }
 0x450   :  { %4746 = vmatprep.subr.bf16.mxu1 %v3711_v57  ;;  %5402 = vmatprep.subr.bf16.mxu0 %v4223_v8  ;;  %v4226_v57 = vld [vmem:[#allocation2 + $0x1110] sm:$0xff]  ;;  %v3717_v8 = vld [vmem:[#allocation2 + $0x128] sm:$0xff] }
 0x453   :  { %4747 = vmatpush1.bf16.msra.mxu1 %v3710_v51  ;;  %5403 = vmatpush1.bf16.msra.mxu0 %v4222_v61  ;;  %v4229_v51 = vld [vmem:[#allocation2 + $0x1128] sm:$0xff]  ;;  %v8733_v61 = vpack.c.bf16 %v7943_v16, %v7943_v16 }
 0x454   :  { %4757 = vmatprep.subr.bf16.mxu1 %v3713_v39  ;;  %5413 = vmatprep.subr.bf16.mxu0 %v4225_v47  ;;  %v4228_v39 = vld [vmem:[#allocation2 + $0x1120] sm:$0xff]  ;;  %v3719_v47 = vld [vmem:[#allocation2 + $0x138] sm:$0xff]  ;;  %v3721_v16 = vld [vmem:[#allocation2 + $0x148] sm:$0xff] }
 0x456   :  { %4749 = vmatmul.mubr.bf16.vlgmr.msra.gmra.mrb[12].mxu1 %v8731_v22  ;;  %5405 = vmatmul.mubr.bf16.vlgmr.msra.gmra.mrb[20].mxu0 %v8732_v40  ;;  %v4232_v22 = vld [vmem:[#allocation2 + $0x1140] sm:$0xff]  ;;  %v3723_v40 = vld [vmem:[#allocation2 + $0x158] sm:$0xff] }
 0x457   :  { %4758 = vmatpush1.bf16.msra.mxu1 %v3712_v48  ;;  %5414 = vmatpush1.bf16.msra.mxu0 %v4224_v36  ;;  %v4231_v48 = vld [vmem:[#allocation2 + $0x1138] sm:$0xff]  ;;  %v3718_v36 = vld [vmem:[#allocation2 + $0x130] sm:$0xff] }
 0x458   :  { %4759 = vmatprep.subr.bf16.mxu1 %v3715_v42  ;;  %5415 = vmatprep.subr.bf16.mxu0 %v4227_v58  ;;  %v4230_v42 = vld [vmem:[#allocation2 + $0x1130] sm:$0xff]  ;;  %v4233_v58 = vld [vmem:[#allocation2 + $0x1148] sm:$0xff] }
 0x459   :  { %4789 = vmatprep.mubr.bf16.mxu1 %v8733_v61  ;;  %5445 = vmatprep.mubr.bf16.mxu0 %v8734_v62  ;;  %v4237_v61 = vld [vmem:[#allocation2 + $0x1168] sm:$0xff]  ;;  %v3724_v62 = vld [vmem:[#allocation2 + $0x160] sm:$0xff] }
 0x45b   :  { %4760 = vmatpush1.bf16.msra.mxu1 %v3714_v13  ;;  %5416 = vmatpush1.bf16.msra.mxu0 %v4226_v57  ;;  %v4235_v13 = vld [vmem:[#allocation2 + $0x1158] sm:$0xff]  ;;  %v3722_v57 = vld [vmem:[#allocation2 + $0x150] sm:$0xff] }
 0x45c   :  { %4761 = vmatprep.subr.bf16.mxu1 %v3717_v8  ;;  %5417 = vmatprep.subr.bf16.mxu0 %v4229_v51  ;;  %v4234_v8 = vld [vmem:[#allocation2 + $0x1150] sm:$0xff]  ;;  %v3725_v51 = vld [vmem:[#allocation2 + $0x168] sm:$0xff] }
 0x45f   :  { %4762 = vmatpush1.bf16.msra.mxu1 %v3716_v10  ;;  %5418 = vmatpush1.bf16.msra.mxu0 %v4228_v39  ;;  %v4236_v10 = vld [vmem:[#allocation2 + $0x1160] sm:$0xff]  ;;  %v3727_v39 = vld [vmem:[#allocation2 + $0x178] sm:$0xff] }
 0x460   :  { %4763 = vmatprep.subr.bf16.mxu1 %v3719_v47  ;;  %5419 = vmatprep.subr.bf16.mxu0 %v4231_v48  ;;  %v4239_v47 = vld [vmem:[#allocation2 + $0x1178] sm:$0xff]  ;;  %v3726_v48 = vld [vmem:[#allocation2 + $0x170] sm:$0xff] }
 0x463   :  { %4764 = vmatpush1.bf16.msra.mxu1 %v3718_v36  ;;  %5420 = vmatpush1.bf16.msra.mxu0 %v4230_v42  ;;  %v4238_v36 = vld [vmem:[#allocation2 + $0x1170] sm:$0xff]  ;;  %v3729_v42 = vld [vmem:[#allocation2 + $0x188] sm:$0xff] }
 0x464   :  { %4765 = vmatprep.subr.bf16.mxu1 %v3721_v16  ;;  %5421 = vmatprep.subr.bf16.mxu0 %v4233_v58  ;;  %v4241_v16 = vld [vmem:[#allocation2 + $0x1188] sm:$0xff]  ;;  %v3728_v58 = vld [vmem:[#allocation2 + $0x180] sm:$0xff] }
 0x467   :  { %4766 = vmatpush1.bf16.msra.mxu1 %v3720_v50  ;;  %5422 = vmatpush1.bf16.msra.mxu0 %v4232_v22  ;;  %v4240_v50 = vld [vmem:[#allocation2 + $0x1180] sm:$0xff]  ;;  %v3731_v22 = vld [vmem:[#allocation2 + $0x198] sm:$0xff] }
 0x468   :  { %4767 = vmatprep.subr.bf16.mxu1 %v3723_v40  ;;  %5423 = vmatprep.subr.bf16.mxu0 %v4235_v13  ;;  %v4243_v40 = vld [vmem:[#allocation2 + $0x1198] sm:$0xff]  ;;  %v3730_v13 = vld [vmem:[#allocation2 + $0x190] sm:$0xff] }
 0x46b   :  { %4768 = vmatpush1.bf16.msra.mxu1 %v3722_v57  ;;  %5424 = vmatpush1.bf16.msra.mxu0 %v4234_v8  ;;  %v4242_v57 = vld [vmem:[#allocation2 + $0x1190] sm:$0xff]  ;;  %v3733_v8 = vld [vmem:[#allocation2 + $0x1a8] sm:$0xff] }
 0x46c   :  { %4769 = vmatprep.subr.bf16.mxu1 %v3725_v51  ;;  %5425 = vmatprep.subr.bf16.mxu0 %v4237_v61  ;;  %v4245_v51 = vld [vmem:[#allocation2 + $0x11a8] sm:$0xff]  ;;  %v3732_v61 = vld [vmem:[#allocation2 + $0x1a0] sm:$0xff] }
 0x46f   :  { %4770 = vmatpush1.bf16.msra.mxu1 %v3724_v62  ;;  %5426 = vmatpush1.bf16.msra.mxu0 %v4236_v10  ;;  %v4244_v62 = vld [vmem:[#allocation2 + $0x11a0] sm:$0xff]  ;;  %v3735_v10 = vld [vmem:[#allocation2 + $0x1b8] sm:$0xff] }
 0x470   :  { %4771 = vmatprep.subr.bf16.mxu1 %v3727_v39  ;;  %5427 = vmatprep.subr.bf16.mxu0 %v4239_v47  ;;  %v4247_v39 = vld [vmem:[#allocation2 + $0x11b8] sm:$0xff]  ;;  %v3734_v47 = vld [vmem:[#allocation2 + $0x1b0] sm:$0xff] }
 0x473   :  { %4772 = vmatpush1.bf16.msra.mxu1 %v3726_v48  ;;  %5428 = vmatpush1.bf16.msra.mxu0 %v4238_v36  ;;  %v4246_v48 = vld [vmem:[#allocation2 + $0x11b0] sm:$0xff]  ;;  %v3737_v36 = vld [vmem:[#allocation2 + $0x1c8] sm:$0xff] }
 0x474   :  { %4773 = vmatprep.subr.bf16.mxu1 %v3729_v42  ;;  %5429 = vmatprep.subr.bf16.mxu0 %v4241_v16  ;;  %v4249_v42 = vld [vmem:[#allocation2 + $0x11c8] sm:$0xff]  ;;  %v3736_v16 = vld [vmem:[#allocation2 + $0x1c0] sm:$0xff] }
 0x477   :  { %4774 = vmatpush1.bf16.msra.mxu1 %v3728_v58  ;;  %5430 = vmatpush1.bf16.msra.mxu0 %v4240_v50  ;;  %v4248_v58 = vld [vmem:[#allocation2 + $0x11c0] sm:$0xff]  ;;  %v3739_v50 = vld [vmem:[#allocation2 + $0x1d8] sm:$0xff] }
 0x478   :  { %4775 = vmatprep.subr.bf16.mxu1 %v3731_v22  ;;  %5431 = vmatprep.subr.bf16.mxu0 %v4243_v40  ;;  %v4251_v22 = vld [vmem:[#allocation2 + $0x11d8] sm:$0xff]  ;;  %v3738_v40 = vld [vmem:[#allocation2 + $0x1d0] sm:$0xff] }
 0x47b   :  { %4776 = vmatpush1.bf16.msra.mxu1 %v3730_v13  ;;  %5432 = vmatpush1.bf16.msra.mxu0 %v4242_v57  ;;  %v4250_v13 = vld [vmem:[#allocation2 + $0x11d0] sm:$0xff]  ;;  %v3741_v57 = vld [vmem:[#allocation2 + $0x1e8] sm:$0xff] }
 0x47c   :  { %4777 = vmatprep.subr.bf16.mxu1 %v3733_v8  ;;  %5433 = vmatprep.subr.bf16.mxu0 %v4245_v51  ;;  %v4253_v8 = vld [vmem:[#allocation2 + $0x11e8] sm:$0xff]  ;;  %v3740_v51 = vld [vmem:[#allocation2 + $0x1e0] sm:$0xff] }
 0x47f   :  { %4778 = vmatpush1.bf16.msra.mxu1 %v3732_v61  ;;  %5434 = vmatpush1.bf16.msra.mxu0 %v4244_v62  ;;  %v4252_v61 = vld [vmem:[#allocation2 + $0x11e0] sm:$0xff]  ;;  %v3743_v62 = vld [vmem:[#allocation2 + $0x1f8] sm:$0xff] }
 0x480   :  { %4779 = vmatprep.subr.bf16.mxu1 %v3735_v10  ;;  %5435 = vmatprep.subr.bf16.mxu0 %v4247_v39  ;;  %v4255_v10 = vld [vmem:[#allocation2 + $0x11f8] sm:$0xff]  ;;  %v3742_v39 = vld [vmem:[#allocation2 + $0x1f0] sm:$0xff] }
 0x483   :  { %4780 = vmatpush1.bf16.msra.mxu1 %v3734_v47  ;;  %5436 = vmatpush1.bf16.msra.mxu0 %v4246_v48  ;;  %v4254_v47 = vld [vmem:[#allocation2 + $0x11f0] sm:$0xff]  ;;  %v3745_v48 = vld [vmem:[#allocation2 + $0x208] sm:$0xff] }
 0x484   :  { %4781 = vmatprep.subr.bf16.mxu1 %v3737_v36  ;;  %5437 = vmatprep.subr.bf16.mxu0 %v4249_v42  ;;  %v4257_v36 = vld [vmem:[#allocation2 + $0x1208] sm:$0xff]  ;;  %v3744_v42 = vld [vmem:[#allocation2 + $0x200] sm:$0xff] }
 0x487   :  { %4782 = vmatpush1.bf16.msra.mxu1 %v3736_v16  ;;  %5438 = vmatpush1.bf16.msra.mxu0 %v4248_v58  ;;  %v4256_v16 = vld [vmem:[#allocation2 + $0x1200] sm:$0xff]  ;;  %v3747_v58 = vld [vmem:[#allocation2 + $0x218] sm:$0xff] }
 0x488   :  { %4783 = vmatprep.subr.bf16.mxu1 %v3739_v50  ;;  %5439 = vmatprep.subr.bf16.mxu0 %v4251_v22  ;;  %v4259_v50 = vld [vmem:[#allocation2 + $0x1218] sm:$0xff]  ;;  %v8735_v22 = vpack.c.bf16 %v7889_v1, %v7889_v1  ;;  %v8738_v1 = vpack.c.bf16 %v8196_v12, %v8196_v12  ;;  %v3752_v12 = vld [vmem:[#allocation2 + $0x240] sm:$0xff] }
 0x48b   :  { %4784 = vmatpush1.bf16.msra.mxu1 %v3738_v40  ;;  %5440 = vmatpush1.bf16.msra.mxu0 %v4250_v13  ;;  %v8736_v40 = vpack.c.bf16 %v8125_v28, %v8125_v28  ;;  %v3746_v13 = vld [vmem:[#allocation2 + $0x210] sm:$0xff]  ;;  %v3748_v28 = vld [vmem:[#allocation2 + $0x220] sm:$0xff] }
 0x48c   :  { %4785 = vmatprep.subr.bf16.mxu1 %v3741_v57  ;;  %5441 = vmatprep.subr.bf16.mxu0 %v4253_v8  ;;  %v4258_v57 = vld [vmem:[#allocation2 + $0x1210] sm:$0xff]  ;;  %v3749_v8 = vld [vmem:[#allocation2 + $0x228] sm:$0xff] }
 0x48f   :  { %4786 = vmatpush1.bf16.msra.mxu1 %v3740_v51  ;;  %5442 = vmatpush1.bf16.msra.mxu0 %v4252_v61  ;;  %v4261_v51 = vld [vmem:[#allocation2 + $0x1228] sm:$0xff]  ;;  %v8737_v61 = vpack.c.bf16 %v7948_v20, %v7948_v20 }
 0x490   :  { %4787 = vmatprep.subr.bf16.mxu1 %v3743_v62  ;;  %5443 = vmatprep.subr.bf16.mxu0 %v4255_v10  ;;  %v4260_v62 = vld [vmem:[#allocation2 + $0x1220] sm:$0xff]  ;;  %v3751_v10 = vld [vmem:[#allocation2 + $0x238] sm:$0xff]  ;;  %v3753_v20 = vld [vmem:[#allocation2 + $0x248] sm:$0xff] }
 0x493   :  { %4788 = vmatpush1.bf16.msra.mxu1 %v3742_v39  ;;  %5444 = vmatpush1.bf16.msra.mxu0 %v4254_v47  ;;  %v4263_v39 = vld [vmem:[#allocation2 + $0x1238] sm:$0xff]  ;;  %v3750_v47 = vld [vmem:[#allocation2 + $0x230] sm:$0xff] }
 0x494   :  { %4798 = vmatprep.subr.bf16.mxu1 %v3745_v48  ;;  %5454 = vmatprep.subr.bf16.mxu0 %v4257_v36  ;;  %v4262_v48 = vld [vmem:[#allocation2 + $0x1230] sm:$0xff]  ;;  %v4265_v36 = vld [vmem:[#allocation2 + $0x1248] sm:$0xff] }
 0x496   :  { %4790 = vmatmul.mubr.bf16.vlgmr.msra.gmra.mrb[12].mxu1 %v8735_v22  ;;  %5446 = vmatmul.mubr.bf16.vlgmr.msra.gmra.mrb[20].mxu0 %v8736_v40  ;;  %v4266_v22 = vld [vmem:[#allocation2 + $0x1250] sm:$0xff]  ;;  %v3757_v40 = vld [vmem:[#allocation2 + $0x268] sm:$0xff] }
 0x497   :  { %4799 = vmatpush1.bf16.msra.mxu1 %v3744_v42  ;;  %5455 = vmatpush1.bf16.msra.mxu0 %v4256_v16  ;;  %v4264_v42 = vld [vmem:[#allocation2 + $0x1240] sm:$0xff]  ;;  %v3755_v16 = vld [vmem:[#allocation2 + $0x258] sm:$0xff] }
 0x498   :  { %4800 = vmatprep.subr.bf16.mxu1 %v3747_v58  ;;  %5456 = vmatprep.subr.bf16.mxu0 %v4259_v50  ;;  %v4267_v58 = vld [vmem:[#allocation2 + $0x1258] sm:$0xff]  ;;  %v3754_v50 = vld [vmem:[#allocation2 + $0x250] sm:$0xff] }
 0x499   :  { %4830 = vmatprep.mubr.bf16.mxu1 %v8737_v61  ;;  %5486 = vmatprep.mubr.bf16.mxu0 %v8738_v1  ;;  %v4271_v61 = vld [vmem:[#allocation2 + $0x1278] sm:$0xff]  ;;  %v3758_v1 = vld [vmem:[#allocation2 + $0x270] sm:$0xff] }
 0x49b   :  { %4801 = vmatpush1.bf16.msra.mxu1 %v3746_v13  ;;  %5457 = vmatpush1.bf16.msra.mxu0 %v4258_v57  ;;  %v4269_v13 = vld [vmem:[#allocation2 + $0x1268] sm:$0xff]  ;;  %v3756_v57 = vld [vmem:[#allocation2 + $0x260] sm:$0xff] }
 0x49c   :  { %4802 = vmatprep.subr.bf16.mxu1 %v3749_v8  ;;  %5458 = vmatprep.subr.bf16.mxu0 %v4261_v51  ;;  %v4268_v8 = vld [vmem:[#allocation2 + $0x1260] sm:$0xff]  ;;  %v3759_v51 = vld [vmem:[#allocation2 + $0x278] sm:$0xff] }
 0x49f   :  { %4803 = vmatpush1.bf16.msra.mxu1 %v3748_v28  ;;  %5459 = vmatpush1.bf16.msra.mxu0 %v4260_v62  ;;  %v4270_v28 = vld [vmem:[#allocation2 + $0x1270] sm:$0xff]  ;;  %v3761_v62 = vld [vmem:[#allocation2 + $0x288] sm:$0xff] }
 0x4a0   :  { %4804 = vmatprep.subr.bf16.mxu1 %v3751_v10  ;;  %5460 = vmatprep.subr.bf16.mxu0 %v4263_v39  ;;  %v4273_v10 = vld [vmem:[#allocation2 + $0x1288] sm:$0xff]  ;;  %v3760_v39 = vld [vmem:[#allocation2 + $0x280] sm:$0xff] }
 0x4a3   :  { %4805 = vmatpush1.bf16.msra.mxu1 %v3750_v47  ;;  %5461 = vmatpush1.bf16.msra.mxu0 %v4262_v48  ;;  %v4272_v47 = vld [vmem:[#allocation2 + $0x1280] sm:$0xff]  ;;  %v3763_v48 = vld [vmem:[#allocation2 + $0x298] sm:$0xff] }
 0x4a4   :  { %4806 = vmatprep.subr.bf16.mxu1 %v3753_v20  ;;  %5462 = vmatprep.subr.bf16.mxu0 %v4265_v36  ;;  %v4275_v20 = vld [vmem:[#allocation2 + $0x1298] sm:$0xff]  ;;  %v3762_v36 = vld [vmem:[#allocation2 + $0x290] sm:$0xff] }
 0x4a7   :  { %4807 = vmatpush1.bf16.msra.mxu1 %v3752_v12  ;;  %5463 = vmatpush1.bf16.msra.mxu0 %v4264_v42  ;;  %v4274_v12 = vld [vmem:[#allocation2 + $0x1290] sm:$0xff]  ;;  %v3765_v42 = vld [vmem:[#allocation2 + $0x2a8] sm:$0xff] }
 0x4a8   :  { %4808 = vmatprep.subr.bf16.mxu1 %v3755_v16  ;;  %5464 = vmatprep.subr.bf16.mxu0 %v4267_v58  ;;  %v4277_v16 = vld [vmem:[#allocation2 + $0x12a8] sm:$0xff]  ;;  %v3764_v58 = vld [vmem:[#allocation2 + $0x2a0] sm:$0xff] }
 0x4ab   :  { %4809 = vmatpush1.bf16.msra.mxu1 %v3754_v50  ;;  %5465 = vmatpush1.bf16.msra.mxu0 %v4266_v22  ;;  %v4276_v50 = vld [vmem:[#allocation2 + $0x12a0] sm:$0xff]  ;;  %v3767_v22 = vld [vmem:[#allocation2 + $0x2b8] sm:$0xff] }
 0x4ac   :  { %4810 = vmatprep.subr.bf16.mxu1 %v3757_v40  ;;  %5466 = vmatprep.subr.bf16.mxu0 %v4269_v13  ;;  %v4279_v40 = vld [vmem:[#allocation2 + $0x12b8] sm:$0xff]  ;;  %v3766_v13 = vld [vmem:[#allocation2 + $0x2b0] sm:$0xff] }
 0x4af   :  { %4811 = vmatpush1.bf16.msra.mxu1 %v3756_v57  ;;  %5467 = vmatpush1.bf16.msra.mxu0 %v4268_v8  ;;  %v4278_v57 = vld [vmem:[#allocation2 + $0x12b0] sm:$0xff]  ;;  %v3769_v8 = vld [vmem:[#allocation2 + $0x2c8] sm:$0xff] }
 0x4b0   :  { %4812 = vmatprep.subr.bf16.mxu1 %v3759_v51  ;;  %5468 = vmatprep.subr.bf16.mxu0 %v4271_v61  ;;  %v4281_v51 = vld [vmem:[#allocation2 + $0x12c8] sm:$0xff]  ;;  %v3768_v61 = vld [vmem:[#allocation2 + $0x2c0] sm:$0xff] }
 0x4b3   :  { %4813 = vmatpush1.bf16.msra.mxu1 %v3758_v1  ;;  %5469 = vmatpush1.bf16.msra.mxu0 %v4270_v28  ;;  %v4280_v1 = vld [vmem:[#allocation2 + $0x12c0] sm:$0xff]  ;;  %v3771_v28 = vld [vmem:[#allocation2 + $0x2d8] sm:$0xff] }
 0x4b4   :  { %4814 = vmatprep.subr.bf16.mxu1 %v3761_v62  ;;  %5470 = vmatprep.subr.bf16.mxu0 %v4273_v10  ;;  %v4283_v62 = vld [vmem:[#allocation2 + $0x12d8] sm:$0xff]  ;;  %v3770_v10 = vld [vmem:[#allocation2 + $0x2d0] sm:$0xff] }
 0x4b7   :  { %4815 = vmatpush1.bf16.msra.mxu1 %v3760_v39  ;;  %5471 = vmatpush1.bf16.msra.mxu0 %v4272_v47  ;;  %v4282_v39 = vld [vmem:[#allocation2 + $0x12d0] sm:$0xff]  ;;  %v3773_v47 = vld [vmem:[#allocation2 + $0x2e8] sm:$0xff] }
 0x4b8   :  { %4816 = vmatprep.subr.bf16.mxu1 %v3763_v48  ;;  %5472 = vmatprep.subr.bf16.mxu0 %v4275_v20  ;;  %v4285_v48 = vld [vmem:[#allocation2 + $0x12e8] sm:$0xff]  ;;  %v3772_v20 = vld [vmem:[#allocation2 + $0x2e0] sm:$0xff] }
 0x4bb   :  { %4817 = vmatpush1.bf16.msra.mxu1 %v3762_v36  ;;  %5473 = vmatpush1.bf16.msra.mxu0 %v4274_v12  ;;  %v4284_v36 = vld [vmem:[#allocation2 + $0x12e0] sm:$0xff]  ;;  %v3775_v12 = vld [vmem:[#allocation2 + $0x2f8] sm:$0xff] }
 0x4bc   :  { %4818 = vmatprep.subr.bf16.mxu1 %v3765_v42  ;;  %5474 = vmatprep.subr.bf16.mxu0 %v4277_v16  ;;  %v4287_v42 = vld [vmem:[#allocation2 + $0x12f8] sm:$0xff]  ;;  %v3774_v16 = vld [vmem:[#allocation2 + $0x2f0] sm:$0xff] }
 0x4bf   :  { %4819 = vmatpush1.bf16.msra.mxu1 %v3764_v58  ;;  %5475 = vmatpush1.bf16.msra.mxu0 %v4276_v50  ;;  %v4286_v58 = vld [vmem:[#allocation2 + $0x12f0] sm:$0xff]  ;;  %v3777_v50 = vld [vmem:[#allocation2 + $0x308] sm:$0xff] }
 0x4c0   :  { %4820 = vmatprep.subr.bf16.mxu1 %v3767_v22  ;;  %5476 = vmatprep.subr.bf16.mxu0 %v4279_v40  ;;  %v4289_v22 = vld [vmem:[#allocation2 + $0x1308] sm:$0xff]  ;;  %v3776_v40 = vld [vmem:[#allocation2 + $0x300] sm:$0xff] }
 0x4c3   :  { %4821 = vmatpush1.bf16.msra.mxu1 %v3766_v13  ;;  %5477 = vmatpush1.bf16.msra.mxu0 %v4278_v57  ;;  %v4288_v13 = vld [vmem:[#allocation2 + $0x1300] sm:$0xff]  ;;  %v3779_v57 = vld [vmem:[#allocation2 + $0x318] sm:$0xff] }
 0x4c4   :  { %4822 = vmatprep.subr.bf16.mxu1 %v3769_v8  ;;  %5478 = vmatprep.subr.bf16.mxu0 %v4281_v51  ;;  %v4291_v8 = vld [vmem:[#allocation2 + $0x1318] sm:$0xff]  ;;  %v8739_v51 = vpack.c.bf16 %v7894_v0, %v7894_v0  ;;  %v8742_v0 = vpack.c.bf16 %v8201_v9, %v8201_v9  ;;  %v3784_v9 = vld [vmem:[#allocation2 + $0x340] sm:$0xff] }
 0x4c7   :  { %4823 = vmatpush1.bf16.msra.mxu1 %v3768_v61  ;;  %5479 = vmatpush1.bf16.msra.mxu0 %v4280_v1  ;;  %v8740_v61 = vpack.c.bf16 %v8130_v26, %v8130_v26  ;;  %v3778_v1 = vld [vmem:[#allocation2 + $0x310] sm:$0xff]  ;;  %v3780_v26 = vld [vmem:[#allocation2 + $0x320] sm:$0xff] }
 0x4c8   :  { %4824 = vmatprep.subr.bf16.mxu1 %v3771_v28  ;;  %5480 = vmatprep.subr.bf16.mxu0 %v4283_v62  ;;  %v4290_v28 = vld [vmem:[#allocation2 + $0x1310] sm:$0xff]  ;;  %v3781_v62 = vld [vmem:[#allocation2 + $0x328] sm:$0xff] }
 0x4cb   :  { %4825 = vmatpush1.bf16.msra.mxu1 %v3770_v10  ;;  %5481 = vmatpush1.bf16.msra.mxu0 %v4282_v39  ;;  %v4293_v10 = vld [vmem:[#allocation2 + $0x1328] sm:$0xff]  ;;  %v8741_v39 = vpack.c.bf16 %v7953_v43, %v7953_v43 }
 0x4cc   :  { %4826 = vmatprep.subr.bf16.mxu1 %v3773_v47  ;;  %5482 = vmatprep.subr.bf16.mxu0 %v4285_v48  ;;  %v4292_v47 = vld [vmem:[#allocation2 + $0x1320] sm:$0xff]  ;;  %v3783_v48 = vld [vmem:[#allocation2 + $0x338] sm:$0xff]  ;;  %v3785_v43 = vld [vmem:[#allocation2 + $0x348] sm:$0xff] }
 0x4cf   :  { %4827 = vmatpush1.bf16.msra.mxu1 %v3772_v20  ;;  %5483 = vmatpush1.bf16.msra.mxu0 %v4284_v36  ;;  %v4295_v20 = vld [vmem:[#allocation2 + $0x1338] sm:$0xff]  ;;  %v3782_v36 = vld [vmem:[#allocation2 + $0x330] sm:$0xff] }
 0x4d0   :  { %4828 = vmatprep.subr.bf16.mxu1 %v3775_v12  ;;  %5484 = vmatprep.subr.bf16.mxu0 %v4287_v42  ;;  %v4294_v12 = vld [vmem:[#allocation2 + $0x1330] sm:$0xff]  ;;  %v4297_v42 = vld [vmem:[#allocation2 + $0x1348] sm:$0xff] }
 0x4d3   :  { %4829 = vmatpush1.bf16.msra.mxu1 %v3774_v16  ;;  %5485 = vmatpush1.bf16.msra.mxu0 %v4286_v58  ;;  %v4296_v16 = vld [vmem:[#allocation2 + $0x1340] sm:$0xff]  ;;  %v3787_v58 = vld [vmem:[#allocation2 + $0x358] sm:$0xff] }
 0x4d4   :  { %4839 = vmatprep.subr.bf16.mxu1 %v3777_v50  ;;  %5495 = vmatprep.subr.bf16.mxu0 %v4289_v22  ;;  %v4299_v50 = vld [vmem:[#allocation2 + $0x1358] sm:$0xff]  ;;  %v3786_v22 = vld [vmem:[#allocation2 + $0x350] sm:$0xff] }
 0x4d6   :  { %4831 = vmatmul.mubr.bf16.vlgmr.msra.gmra.mrb[12].mxu1 %v8739_v51  ;;  %5487 = vmatmul.mubr.bf16.vlgmr.msra.gmra.mrb[20].mxu0 %v8740_v61  ;;  %v4300_v51 = vld [vmem:[#allocation2 + $0x1360] sm:$0xff]  ;;  %v3791_v61 = vld [vmem:[#allocation2 + $0x378] sm:$0xff] }
 0x4d7   :  { %4840 = vmatpush1.bf16.msra.mxu1 %v3776_v40  ;;  %5496 = vmatpush1.bf16.msra.mxu0 %v4288_v13  ;;  %v4298_v40 = vld [vmem:[#allocation2 + $0x1350] sm:$0xff]  ;;  %v3789_v13 = vld [vmem:[#allocation2 + $0x368] sm:$0xff] }
 0x4d8   :  { %4841 = vmatprep.subr.bf16.mxu1 %v3779_v57  ;;  %5497 = vmatprep.subr.bf16.mxu0 %v4291_v8  ;;  %v4301_v57 = vld [vmem:[#allocation2 + $0x1368] sm:$0xff]  ;;  %v3788_v8 = vld [vmem:[#allocation2 + $0x360] sm:$0xff] }
 0x4d9   :  { %4871 = vmatprep.mubr.bf16.mxu1 %v8741_v39  ;;  %5527 = vmatprep.mubr.bf16.mxu0 %v8742_v0  ;;  %v4305_v39 = vld [vmem:[#allocation2 + $0x1388] sm:$0xff]  ;;  %v3792_v0 = vld [vmem:[#allocation2 + $0x380] sm:$0xff] }
 0x4db   :  { %4842 = vmatpush1.bf16.msra.mxu1 %v3778_v1  ;;  %5498 = vmatpush1.bf16.msra.mxu0 %v4290_v28  ;;  %v4303_v1 = vld [vmem:[#allocation2 + $0x1378] sm:$0xff]  ;;  %v3790_v28 = vld [vmem:[#allocation2 + $0x370] sm:$0xff] }
 0x4dc   :  { %4843 = vmatprep.subr.bf16.mxu1 %v3781_v62  ;;  %5499 = vmatprep.subr.bf16.mxu0 %v4293_v10  ;;  %v4302_v62 = vld [vmem:[#allocation2 + $0x1370] sm:$0xff]  ;;  %v3793_v10 = vld [vmem:[#allocation2 + $0x388] sm:$0xff] }
 0x4df   :  { %4844 = vmatpush1.bf16.msra.mxu1 %v3780_v26  ;;  %5500 = vmatpush1.bf16.msra.mxu0 %v4292_v47  ;;  %v4304_v26 = vld [vmem:[#allocation2 + $0x1380] sm:$0xff]  ;;  %v3795_v47 = vld [vmem:[#allocation2 + $0x398] sm:$0xff] }
 0x4e0   :  { %4845 = vmatprep.subr.bf16.mxu1 %v3783_v48  ;;  %5501 = vmatprep.subr.bf16.mxu0 %v4295_v20  ;;  %v4307_v48 = vld [vmem:[#allocation2 + $0x1398] sm:$0xff]  ;;  %v3794_v20 = vld [vmem:[#allocation2 + $0x390] sm:$0xff] }
 0x4e3   :  { %4846 = vmatpush1.bf16.msra.mxu1 %v3782_v36  ;;  %5502 = vmatpush1.bf16.msra.mxu0 %v4294_v12  ;;  %v4306_v36 = vld [vmem:[#allocation2 + $0x1390] sm:$0xff]  ;;  %v3797_v12 = vld [vmem:[#allocation2 + $0x3a8] sm:$0xff] }
 0x4e4   :  { %4847 = vmatprep.subr.bf16.mxu1 %v3785_v43  ;;  %5503 = vmatprep.subr.bf16.mxu0 %v4297_v42  ;;  %v4309_v43 = vld [vmem:[#allocation2 + $0x13a8] sm:$0xff]  ;;  %v3796_v42 = vld [vmem:[#allocation2 + $0x3a0] sm:$0xff] }
 0x4e7   :  { %4848 = vmatpush1.bf16.msra.mxu1 %v3784_v9  ;;  %5504 = vmatpush1.bf16.msra.mxu0 %v4296_v16  ;;  %v4308_v9 = vld [vmem:[#allocation2 + $0x13a0] sm:$0xff]  ;;  %v3799_v16 = vld [vmem:[#allocation2 + $0x3b8] sm:$0xff] }
 0x4e8   :  { %4849 = vmatprep.subr.bf16.mxu1 %v3787_v58  ;;  %5505 = vmatprep.subr.bf16.mxu0 %v4299_v50  ;;  %v4311_v58 = vld [vmem:[#allocation2 + $0x13b8] sm:$0xff]  ;;  %v3798_v50 = vld [vmem:[#allocation2 + $0x3b0] sm:$0xff] }
 0x4eb   :  { %4850 = vmatpush1.bf16.msra.mxu1 %v3786_v22  ;;  %5506 = vmatpush1.bf16.msra.mxu0 %v4298_v40  ;;  %v4310_v22 = vld [vmem:[#allocation2 + $0x13b0] sm:$0xff]  ;;  %v3801_v40 = vld [vmem:[#allocation2 + $0x3c8] sm:$0xff] }
 0x4ec   :  { %4851 = vmatprep.subr.bf16.mxu1 %v3789_v13  ;;  %5507 = vmatprep.subr.bf16.mxu0 %v4301_v57  ;;  %v4313_v13 = vld [vmem:[#allocation2 + $0x13c8] sm:$0xff]  ;;  %v3800_v57 = vld [vmem:[#allocation2 + $0x3c0] sm:$0xff] }
 0x4ef   :  { %4852 = vmatpush1.bf16.msra.mxu1 %v3788_v8  ;;  %5508 = vmatpush1.bf16.msra.mxu0 %v4300_v51  ;;  %v4312_v8 = vld [vmem:[#allocation2 + $0x13c0] sm:$0xff]  ;;  %v3803_v51 = vld [vmem:[#allocation2 + $0x3d8] sm:$0xff] }
 0x4f0   :  { %4853 = vmatprep.subr.bf16.mxu1 %v3791_v61  ;;  %5509 = vmatprep.subr.bf16.mxu0 %v4303_v1  ;;  %v4315_v61 = vld [vmem:[#allocation2 + $0x13d8] sm:$0xff]  ;;  %v3802_v1 = vld [vmem:[#allocation2 + $0x3d0] sm:$0xff] }
 0x4f3   :  { %4854 = vmatpush1.bf16.msra.mxu1 %v3790_v28  ;;  %5510 = vmatpush1.bf16.msra.mxu0 %v4302_v62  ;;  %v4314_v28 = vld [vmem:[#allocation2 + $0x13d0] sm:$0xff]  ;;  %v3805_v62 = vld [vmem:[#allocation2 + $0x3e8] sm:$0xff] }
 0x4f4   :  { %4855 = vmatprep.subr.bf16.mxu1 %v3793_v10  ;;  %5511 = vmatprep.subr.bf16.mxu0 %v4305_v39  ;;  %v4317_v10 = vld [vmem:[#allocation2 + $0x13e8] sm:$0xff]  ;;  %v3804_v39 = vld [vmem:[#allocation2 + $0x3e0] sm:$0xff] }
 0x4f7   :  { %4856 = vmatpush1.bf16.msra.mxu1 %v3792_v0  ;;  %5512 = vmatpush1.bf16.msra.mxu0 %v4304_v26  ;;  %v4316_v0 = vld [vmem:[#allocation2 + $0x13e0] sm:$0xff]  ;;  %v3807_v26 = vld [vmem:[#allocation2 + $0x3f8] sm:$0xff] }
 0x4f8   :  { %4857 = vmatprep.subr.bf16.mxu1 %v3795_v47  ;;  %5513 = vmatprep.subr.bf16.mxu0 %v4307_v48  ;;  %v4319_v47 = vld [vmem:[#allocation2 + $0x13f8] sm:$0xff]  ;;  %v3806_v48 = vld [vmem:[#allocation2 + $0x3f0] sm:$0xff] }
 0x4fb   :  { %4858 = vmatpush1.bf16.msra.mxu1 %v3794_v20  ;;  %5514 = vmatpush1.bf16.msra.mxu0 %v4306_v36  ;;  %v4318_v20 = vld [vmem:[#allocation2 + $0x13f0] sm:$0xff]  ;;  %v3809_v36 = vld [vmem:[#allocation2 + $0x408] sm:$0xff] }
 0x4fc   :  { %4859 = vmatprep.subr.bf16.mxu1 %v3797_v12  ;;  %5515 = vmatprep.subr.bf16.mxu0 %v4309_v43  ;;  %v4321_v12 = vld [vmem:[#allocation2 + $0x1408] sm:$0xff]  ;;  %v3808_v43 = vld [vmem:[#allocation2 + $0x400] sm:$0xff] }
 0x4ff   :  { %4860 = vmatpush1.bf16.msra.mxu1 %v3796_v42  ;;  %5516 = vmatpush1.bf16.msra.mxu0 %v4308_v9  ;;  %v4320_v42 = vld [vmem:[#allocation2 + $0x1400] sm:$0xff]  ;;  %v3811_v9 = vld [vmem:[#allocation2 + $0x418] sm:$0xff] }
 0x500   :  { %4861 = vmatprep.subr.bf16.mxu1 %v3799_v16  ;;  %5517 = vmatprep.subr.bf16.mxu0 %v4311_v58  ;;  %v4323_v16 = vld [vmem:[#allocation2 + $0x1418] sm:$0xff]  ;;  %v8743_v58 = vpack.c.bf16 %v7899_v2, %v7899_v2  ;;  %v8746_v2 = vpack.c.bf16 %v8206_v15, %v8206_v15  ;;  %v3816_v15 = vld [vmem:[#allocation2 + $0x440] sm:$0xff] }
 0x503   :  { %4862 = vmatpush1.bf16.msra.mxu1 %v3798_v50  ;;  %5518 = vmatpush1.bf16.msra.mxu0 %v4310_v22  ;;  %v8744_v50 = vpack.c.bf16 %v8135_v33, %v8135_v33  ;;  %v3810_v22 = vld [vmem:[#allocation2 + $0x410] sm:$0xff]  ;;  %v3812_v33 = vld [vmem:[#allocation2 + $0x420] sm:$0xff] }
 0x504   :  { %4863 = vmatprep.subr.bf16.mxu1 %v3801_v40  ;;  %5519 = vmatprep.subr.bf16.mxu0 %v4313_v13  ;;  %v4322_v40 = vld [vmem:[#allocation2 + $0x1410] sm:$0xff]  ;;  %v3813_v13 = vld [vmem:[#allocation2 + $0x428] sm:$0xff] }
 0x507   :  { %4864 = vmatpush1.bf16.msra.mxu1 %v3800_v57  ;;  %5520 = vmatpush1.bf16.msra.mxu0 %v4312_v8  ;;  %v4325_v57 = vld [vmem:[#allocation2 + $0x1428] sm:$0xff]  ;;  %v8745_v8 = vpack.c.bf16 %v7958_v5, %v7958_v5 }
 0x508   :  { %4865 = vmatprep.subr.bf16.mxu1 %v3803_v51  ;;  %5521 = vmatprep.subr.bf16.mxu0 %v4315_v61  ;;  %v4324_v51 = vld [vmem:[#allocation2 + $0x1420] sm:$0xff]  ;;  %v3815_v61 = vld [vmem:[#allocation2 + $0x438] sm:$0xff]  ;;  %v3817_v5 = vld [vmem:[#allocation2 + $0x448] sm:$0xff] }
 0x50b   :  { %4866 = vmatpush1.bf16.msra.mxu1 %v3802_v1  ;;  %5522 = vmatpush1.bf16.msra.mxu0 %v4314_v28  ;;  %v4327_v1 = vld [vmem:[#allocation2 + $0x1438] sm:$0xff]  ;;  %v3814_v28 = vld [vmem:[#allocation2 + $0x430] sm:$0xff] }
 0x50c   :  { %4867 = vmatprep.subr.bf16.mxu1 %v3805_v62  ;;  %5523 = vmatprep.subr.bf16.mxu0 %v4317_v10  ;;  %v4326_v62 = vld [vmem:[#allocation2 + $0x1430] sm:$0xff]  ;;  %v4329_v10 = vld [vmem:[#allocation2 + $0x1448] sm:$0xff] }
 0x50f   :  { %4868 = vmatpush1.bf16.msra.mxu1 %v3804_v39  ;;  %5524 = vmatpush1.bf16.msra.mxu0 %v4316_v0  ;;  %v4328_v39 = vld [vmem:[#allocation2 + $0x1440] sm:$0xff]  ;;  %v3819_v0 = vld [vmem:[#allocation2 + $0x458] sm:$0xff] }
 0x510   :  { %4869 = vmatprep.subr.bf16.mxu1 %v3807_v26  ;;  %5525 = vmatprep.subr.bf16.mxu0 %v4319_v47  ;;  %v4331_v26 = vld [vmem:[#allocation2 + $0x1458] sm:$0xff]  ;;  %v3818_v47 = vld [vmem:[#allocation2 + $0x450] sm:$0xff] }
 0x513   :  { %4870 = vmatpush1.bf16.msra.mxu1 %v3806_v48  ;;  %5526 = vmatpush1.bf16.msra.mxu0 %v4318_v20  ;;  %v4330_v48 = vld [vmem:[#allocation2 + $0x1450] sm:$0xff]  ;;  %v3821_v20 = vld [vmem:[#allocation2 + $0x468] sm:$0xff] }
 0x514   :  { %4880 = vmatprep.subr.bf16.mxu1 %v3809_v36  ;;  %5536 = vmatprep.subr.bf16.mxu0 %v4321_v12  ;;  %v4333_v36 = vld [vmem:[#allocation2 + $0x1468] sm:$0xff]  ;;  %v3820_v12 = vld [vmem:[#allocation2 + $0x460] sm:$0xff] }
 0x516   :  { %4872 = vmatmul.mubr.bf16.vlgmr.msra.gmra.mrb[12].mxu1 %v8743_v58  ;;  %5528 = vmatmul.mubr.bf16.vlgmr.msra.gmra.mrb[20].mxu0 %v8744_v50  ;;  %v4334_v58 = vld [vmem:[#allocation2 + $0x1470] sm:$0xff]  ;;  %v3825_v50 = vld [vmem:[#allocation2 + $0x488] sm:$0xff] }
 0x517   :  { %4881 = vmatpush1.bf16.msra.mxu1 %v3808_v43  ;;  %5537 = vmatpush1.bf16.msra.mxu0 %v4320_v42  ;;  %v4332_v43 = vld [vmem:[#allocation2 + $0x1460] sm:$0xff]  ;;  %v3823_v42 = vld [vmem:[#allocation2 + $0x478] sm:$0xff] }
 0x518   :  { %4882 = vmatprep.subr.bf16.mxu1 %v3811_v9  ;;  %5538 = vmatprep.subr.bf16.mxu0 %v4323_v16  ;;  %v4335_v9 = vld [vmem:[#allocation2 + $0x1478] sm:$0xff]  ;;  %v3822_v16 = vld [vmem:[#allocation2 + $0x470] sm:$0xff] }
 0x519   :  { %4912 = vmatprep.mubr.bf16.mxu1 %v8745_v8  ;;  %5568 = vmatprep.mubr.bf16.mxu0 %v8746_v2  ;;  %v4339_v8 = vld [vmem:[#allocation2 + $0x1498] sm:$0xff]  ;;  %v3826_v2 = vld [vmem:[#allocation2 + $0x490] sm:$0xff] }
 0x51b   :  { %4883 = vmatpush1.bf16.msra.mxu1 %v3810_v22  ;;  %5539 = vmatpush1.bf16.msra.mxu0 %v4322_v40  ;;  %v4337_v22 = vld [vmem:[#allocation2 + $0x1488] sm:$0xff]  ;;  %v3824_v40 = vld [vmem:[#allocation2 + $0x480] sm:$0xff] }
 0x51c   :  { %4884 = vmatprep.subr.bf16.mxu1 %v3813_v13  ;;  %5540 = vmatprep.subr.bf16.mxu0 %v4325_v57  ;;  %v4336_v13 = vld [vmem:[#allocation2 + $0x1480] sm:$0xff]  ;;  %v3827_v57 = vld [vmem:[#allocation2 + $0x498] sm:$0xff] }
 0x51f   :  { %4885 = vmatpush1.bf16.msra.mxu1 %v3812_v33  ;;  %5541 = vmatpush1.bf16.msra.mxu0 %v4324_v51  ;;  %v4338_v33 = vld [vmem:[#allocation2 + $0x1490] sm:$0xff]  ;;  %v3829_v51 = vld [vmem:[#allocation2 + $0x4a8] sm:$0xff] }
 0x520   :  { %4886 = vmatprep.subr.bf16.mxu1 %v3815_v61  ;;  %5542 = vmatprep.subr.bf16.mxu0 %v4327_v1  ;;  %v4341_v61 = vld [vmem:[#allocation2 + $0x14a8] sm:$0xff]  ;;  %v3828_v1 = vld [vmem:[#allocation2 + $0x4a0] sm:$0xff] }
 0x523   :  { %4887 = vmatpush1.bf16.msra.mxu1 %v3814_v28  ;;  %5543 = vmatpush1.bf16.msra.mxu0 %v4326_v62  ;;  %v4340_v28 = vld [vmem:[#allocation2 + $0x14a0] sm:$0xff]  ;;  %v3831_v62 = vld [vmem:[#allocation2 + $0x4b8] sm:$0xff] }
 0x524   :  { %4888 = vmatprep.subr.bf16.mxu1 %v3817_v5  ;;  %5544 = vmatprep.subr.bf16.mxu0 %v4329_v10  ;;  %v4343_v5 = vld [vmem:[#allocation2 + $0x14b8] sm:$0xff]  ;;  %v3830_v10 = vld [vmem:[#allocation2 + $0x4b0] sm:$0xff] }
 0x527   :  { %4889 = vmatpush1.bf16.msra.mxu1 %v3816_v15  ;;  %5545 = vmatpush1.bf16.msra.mxu0 %v4328_v39  ;;  %v4342_v15 = vld [vmem:[#allocation2 + $0x14b0] sm:$0xff]  ;;  %v3833_v39 = vld [vmem:[#allocation2 + $0x4c8] sm:$0xff] }
 0x528   :  { %4890 = vmatprep.subr.bf16.mxu1 %v3819_v0  ;;  %5546 = vmatprep.subr.bf16.mxu0 %v4331_v26  ;;  %v4345_v0 = vld [vmem:[#allocation2 + $0x14c8] sm:$0xff]  ;;  %v3832_v26 = vld [vmem:[#allocation2 + $0x4c0] sm:$0xff] }
 0x52b   :  { %4891 = vmatpush1.bf16.msra.mxu1 %v3818_v47  ;;  %5547 = vmatpush1.bf16.msra.mxu0 %v4330_v48  ;;  %v4344_v47 = vld [vmem:[#allocation2 + $0x14c0] sm:$0xff]  ;;  %v3835_v48 = vld [vmem:[#allocation2 + $0x4d8] sm:$0xff] }
 0x52c   :  { %4892 = vmatprep.subr.bf16.mxu1 %v3821_v20  ;;  %5548 = vmatprep.subr.bf16.mxu0 %v4333_v36  ;;  %v4347_v20 = vld [vmem:[#allocation2 + $0x14d8] sm:$0xff]  ;;  %v3834_v36 = vld [vmem:[#allocation2 + $0x4d0] sm:$0xff] }
 0x52f   :  { %4893 = vmatpush1.bf16.msra.mxu1 %v3820_v12  ;;  %5549 = vmatpush1.bf16.msra.mxu0 %v4332_v43  ;;  %v4346_v12 = vld [vmem:[#allocation2 + $0x14d0] sm:$0xff]  ;;  %v3837_v43 = vld [vmem:[#allocation2 + $0x4e8] sm:$0xff] }
 0x530   :  { %4894 = vmatprep.subr.bf16.mxu1 %v3823_v42  ;;  %5550 = vmatprep.subr.bf16.mxu0 %v4335_v9  ;;  %v4349_v42 = vld [vmem:[#allocation2 + $0x14e8] sm:$0xff]  ;;  %v3836_v9 = vld [vmem:[#allocation2 + $0x4e0] sm:$0xff] }
 0x533   :  { %4895 = vmatpush1.bf16.msra.mxu1 %v3822_v16  ;;  %5551 = vmatpush1.bf16.msra.mxu0 %v4334_v58  ;;  %v4348_v16 = vld [vmem:[#allocation2 + $0x14e0] sm:$0xff]  ;;  %v3839_v58 = vld [vmem:[#allocation2 + $0x4f8] sm:$0xff] }
 0x534   :  { %4896 = vmatprep.subr.bf16.mxu1 %v3825_v50  ;;  %5552 = vmatprep.subr.bf16.mxu0 %v4337_v22  ;;  %v4351_v50 = vld [vmem:[#allocation2 + $0x14f8] sm:$0xff]  ;;  %v3838_v22 = vld [vmem:[#allocation2 + $0x4f0] sm:$0xff] }
 0x537   :  { %4897 = vmatpush1.bf16.msra.mxu1 %v3824_v40  ;;  %5553 = vmatpush1.bf16.msra.mxu0 %v4336_v13  ;;  %v4350_v40 = vld [vmem:[#allocation2 + $0x14f0] sm:$0xff]  ;;  %v3841_v13 = vld [vmem:[#allocation2 + $0x508] sm:$0xff] }
 0x538   :  { %4898 = vmatprep.subr.bf16.mxu1 %v3827_v57  ;;  %5554 = vmatprep.subr.bf16.mxu0 %v4339_v8  ;;  %v4353_v57 = vld [vmem:[#allocation2 + $0x1508] sm:$0xff]  ;;  %v3840_v8 = vld [vmem:[#allocation2 + $0x500] sm:$0xff] }
 0x53b   :  { %4899 = vmatpush1.bf16.msra.mxu1 %v3826_v2  ;;  %5555 = vmatpush1.bf16.msra.mxu0 %v4338_v33  ;;  %v4352_v2 = vld [vmem:[#allocation2 + $0x1500] sm:$0xff]  ;;  %v3843_v33 = vld [vmem:[#allocation2 + $0x518] sm:$0xff] }
 0x53c   :  { %4900 = vmatprep.subr.bf16.mxu1 %v3829_v51  ;;  %5556 = vmatprep.subr.bf16.mxu0 %v4341_v61  ;;  %v4355_v51 = vld [vmem:[#allocation2 + $0x1518] sm:$0xff]  ;;  %v8747_v61 = vpack.c.bf16 %v7904_v24, %v7904_v24  ;;  %v8750_v24 = vpack.c.bf16 %v8211_v63, %v8211_v63  ;;  %v3848_v63 = vld [vmem:[#allocation2 + $0x540] sm:$0xff] }
 0x53f   :  { %4901 = vmatpush1.bf16.msra.mxu1 %v3828_v1  ;;  %5557 = vmatpush1.bf16.msra.mxu0 %v4340_v28  ;;  %v8748_v1 = vpack.c.bf16 %v8140_v49, %v8140_v49  ;;  %v3842_v28 = vld [vmem:[#allocation2 + $0x510] sm:$0xff]  ;;  %v3844_v49 = vld [vmem:[#allocation2 + $0x520] sm:$0xff] }
 0x540   :  { %4902 = vmatprep.subr.bf16.mxu1 %v3831_v62  ;;  %5558 = vmatprep.subr.bf16.mxu0 %v4343_v5  ;;  %v4354_v62 = vld [vmem:[#allocation2 + $0x1510] sm:$0xff]  ;;  %v3845_v5 = vld [vmem:[#allocation2 + $0x528] sm:$0xff] }
 0x543   :  { %4903 = vmatpush1.bf16.msra.mxu1 %v3830_v10  ;;  %5559 = vmatpush1.bf16.msra.mxu0 %v4342_v15  ;;  %v4357_v10 = vld [vmem:[#allocation2 + $0x1528] sm:$0xff]  ;;  %v8749_v15 = vpack.c.bf16 %v7963_v37, %v7963_v37 }
 0x544   :  { %4904 = vmatprep.subr.bf16.mxu1 %v3833_v39  ;;  %5560 = vmatprep.subr.bf16.mxu0 %v4345_v0  ;;  %v4356_v39 = vld [vmem:[#allocation2 + $0x1520] sm:$0xff]  ;;  %v3847_v0 = vld [vmem:[#allocation2 + $0x538] sm:$0xff]  ;;  %v3849_v37 = vld [vmem:[#allocation2 + $0x548] sm:$0xff] }
 0x547   :  { %4905 = vmatpush1.bf16.msra.mxu1 %v3832_v26  ;;  %5561 = vmatpush1.bf16.msra.mxu0 %v4344_v47  ;;  %v4359_v26 = vld [vmem:[#allocation2 + $0x1538] sm:$0xff]  ;;  %v3846_v47 = vld [vmem:[#allocation2 + $0x530] sm:$0xff] }
 0x548   :  { %4906 = vmatprep.subr.bf16.mxu1 %v3835_v48  ;;  %5562 = vmatprep.subr.bf16.mxu0 %v4347_v20  ;;  %v4358_v48 = vld [vmem:[#allocation2 + $0x1530] sm:$0xff]  ;;  %v4361_v20 = vld [vmem:[#allocation2 + $0x1548] sm:$0xff] }
 0x54b   :  { %4907 = vmatpush1.bf16.msra.mxu1 %v3834_v36  ;;  %5563 = vmatpush1.bf16.msra.mxu0 %v4346_v12  ;;  %v4360_v36 = vld [vmem:[#allocation2 + $0x1540] sm:$0xff]  ;;  %v3851_v12 = vld [vmem:[#allocation2 + $0x558] sm:$0xff] }
 0x54c   :  { %4908 = vmatprep.subr.bf16.mxu1 %v3837_v43  ;;  %5564 = vmatprep.subr.bf16.mxu0 %v4349_v42  ;;  %v4363_v43 = vld [vmem:[#allocation2 + $0x1558] sm:$0xff]  ;;  %v3850_v42 = vld [vmem:[#allocation2 + $0x550] sm:$0xff] }
 0x54f   :  { %4909 = vmatpush1.bf16.msra.mxu1 %v3836_v9  ;;  %5565 = vmatpush1.bf16.msra.mxu0 %v4348_v16  ;;  %v4362_v9 = vld [vmem:[#allocation2 + $0x1550] sm:$0xff]  ;;  %v3853_v16 = vld [vmem:[#allocation2 + $0x568] sm:$0xff] }
 0x550   :  { %4910 = vmatprep.subr.bf16.mxu1 %v3839_v58  ;;  %5566 = vmatprep.subr.bf16.mxu0 %v4351_v50  ;;  %v4365_v58 = vld [vmem:[#allocation2 + $0x1568] sm:$0xff]  ;;  %v3852_v50 = vld [vmem:[#allocation2 + $0x560] sm:$0xff] }
 0x553   :  { %4911 = vmatpush1.bf16.msra.mxu1 %v3838_v22  ;;  %5567 = vmatpush1.bf16.msra.mxu0 %v4350_v40  ;;  %v4364_v22 = vld [vmem:[#allocation2 + $0x1560] sm:$0xff]  ;;  %v3855_v40 = vld [vmem:[#allocation2 + $0x578] sm:$0xff] }
 0x554   :  { %4921 = vmatprep.subr.bf16.mxu1 %v3841_v13  ;;  %5577 = vmatprep.subr.bf16.mxu0 %v4353_v57  ;;  %v4367_v13 = vld [vmem:[#allocation2 + $0x1578] sm:$0xff]  ;;  %v3854_v57 = vld [vmem:[#allocation2 + $0x570] sm:$0xff] }
 0x556   :  { %4913 = vmatmul.mubr.bf16.vlgmr.msra.gmra.mrb[12].mxu1 %v8747_v61  ;;  %5569 = vmatmul.mubr.bf16.vlgmr.msra.gmra.mrb[20].mxu0 %v8748_v1  ;;  %v4368_v61 = vld [vmem:[#allocation2 + $0x1580] sm:$0xff]  ;;  %v3859_v1 = vld [vmem:[#allocation2 + $0x598] sm:$0xff] }
 0x557   :  { %4922 = vmatpush1.bf16.msra.mxu1 %v3840_v8  ;;  %5578 = vmatpush1.bf16.msra.mxu0 %v4352_v2  ;;  %v4366_v8 = vld [vmem:[#allocation2 + $0x1570] sm:$0xff]  ;;  %v3857_v2 = vld [vmem:[#allocation2 + $0x588] sm:$0xff] }
 0x558   :  { %4923 = vmatprep.subr.bf16.mxu1 %v3843_v33  ;;  %5579 = vmatprep.subr.bf16.mxu0 %v4355_v51  ;;  %v4369_v33 = vld [vmem:[#allocation2 + $0x1588] sm:$0xff]  ;;  %v3856_v51 = vld [vmem:[#allocation2 + $0x580] sm:$0xff] }
 0x559   :  { %4953 = vmatprep.mubr.bf16.mxu1 %v8749_v15  ;;  %5609 = vmatprep.mubr.bf16.mxu0 %v8750_v24  ;;  %v4373_v15 = vld [vmem:[#allocation2 + $0x15a8] sm:$0xff]  ;;  %v3860_v24 = vld [vmem:[#allocation2 + $0x5a0] sm:$0xff] }
 0x55b   :  { %4924 = vmatpush1.bf16.msra.mxu1 %v3842_v28  ;;  %5580 = vmatpush1.bf16.msra.mxu0 %v4354_v62  ;;  %v4371_v28 = vld [vmem:[#allocation2 + $0x1598] sm:$0xff]  ;;  %v3858_v62 = vld [vmem:[#allocation2 + $0x590] sm:$0xff] }
 0x55c   :  { %4925 = vmatprep.subr.bf16.mxu1 %v3845_v5  ;;  %5581 = vmatprep.subr.bf16.mxu0 %v4357_v10  ;;  %v4370_v5 = vld [vmem:[#allocation2 + $0x1590] sm:$0xff]  ;;  %v3861_v10 = vld [vmem:[#allocation2 + $0x5a8] sm:$0xff] }
 0x55f   :  { %4926 = vmatpush1.bf16.msra.mxu1 %v3844_v49  ;;  %5582 = vmatpush1.bf16.msra.mxu0 %v4356_v39  ;;  %v4372_v49 = vld [vmem:[#allocation2 + $0x15a0] sm:$0xff]  ;;  %v3863_v39 = vld [vmem:[#allocation2 + $0x5b8] sm:$0xff] }
 0x560   :  { %4927 = vmatprep.subr.bf16.mxu1 %v3847_v0  ;;  %5583 = vmatprep.subr.bf16.mxu0 %v4359_v26  ;;  %v4375_v0 = vld [vmem:[#allocation2 + $0x15b8] sm:$0xff]  ;;  %v3862_v26 = vld [vmem:[#allocation2 + $0x5b0] sm:$0xff] }
 0x563   :  { %4928 = vmatpush1.bf16.msra.mxu1 %v3846_v47  ;;  %5584 = vmatpush1.bf16.msra.mxu0 %v4358_v48  ;;  %v4374_v47 = vld [vmem:[#allocation2 + $0x15b0] sm:$0xff]  ;;  %v3865_v48 = vld [vmem:[#allocation2 + $0x5c8] sm:$0xff] }
 0x564   :  { %4929 = vmatprep.subr.bf16.mxu1 %v3849_v37  ;;  %5585 = vmatprep.subr.bf16.mxu0 %v4361_v20  ;;  %v4377_v37 = vld [vmem:[#allocation2 + $0x15c8] sm:$0xff]  ;;  %v3864_v20 = vld [vmem:[#allocation2 + $0x5c0] sm:$0xff] }
 0x567   :  { %4930 = vmatpush1.bf16.msra.mxu1 %v3848_v63  ;;  %5586 = vmatpush1.bf16.msra.mxu0 %v4360_v36  ;;  %v4376_v63 = vld [vmem:[#allocation2 + $0x15c0] sm:$0xff]  ;;  %v3867_v36 = vld [vmem:[#allocation2 + $0x5d8] sm:$0xff] }
 0x568   :  { %4931 = vmatprep.subr.bf16.mxu1 %v3851_v12  ;;  %5587 = vmatprep.subr.bf16.mxu0 %v4363_v43  ;;  %v4379_v12 = vld [vmem:[#allocation2 + $0x15d8] sm:$0xff]  ;;  %v3866_v43 = vld [vmem:[#allocation2 + $0x5d0] sm:$0xff] }
 0x56b   :  { %4932 = vmatpush1.bf16.msra.mxu1 %v3850_v42  ;;  %5588 = vmatpush1.bf16.msra.mxu0 %v4362_v9  ;;  %v4378_v42 = vld [vmem:[#allocation2 + $0x15d0] sm:$0xff]  ;;  %v3869_v9 = vld [vmem:[#allocation2 + $0x5e8] sm:$0xff] }
 0x56c   :  { %4933 = vmatprep.subr.bf16.mxu1 %v3853_v16  ;;  %5589 = vmatprep.subr.bf16.mxu0 %v4365_v58  ;;  %v4381_v16 = vld [vmem:[#allocation2 + $0x15e8] sm:$0xff]  ;;  %v3868_v58 = vld [vmem:[#allocation2 + $0x5e0] sm:$0xff] }
 0x56f   :  { %4934 = vmatpush1.bf16.msra.mxu1 %v3852_v50  ;;  %5590 = vmatpush1.bf16.msra.mxu0 %v4364_v22  ;;  %v4380_v50 = vld [vmem:[#allocation2 + $0x15e0] sm:$0xff]  ;;  %v3871_v22 = vld [vmem:[#allocation2 + $0x5f8] sm:$0xff] }
 0x570   :  { %4935 = vmatprep.subr.bf16.mxu1 %v3855_v40  ;;  %5591 = vmatprep.subr.bf16.mxu0 %v4367_v13  ;;  %v4383_v40 = vld [vmem:[#allocation2 + $0x15f8] sm:$0xff]  ;;  %v3870_v13 = vld [vmem:[#allocation2 + $0x5f0] sm:$0xff] }
 0x573   :  { %4936 = vmatpush1.bf16.msra.mxu1 %v3854_v57  ;;  %5592 = vmatpush1.bf16.msra.mxu0 %v4366_v8  ;;  %v4382_v57 = vld [vmem:[#allocation2 + $0x15f0] sm:$0xff]  ;;  %v3873_v8 = vld [vmem:[#allocation2 + $0x608] sm:$0xff] }
 0x574   :  { %4937 = vmatprep.subr.bf16.mxu1 %v3857_v2  ;;  %5593 = vmatprep.subr.bf16.mxu0 %v4369_v33  ;;  %v4385_v2 = vld [vmem:[#allocation2 + $0x1608] sm:$0xff]  ;;  %v3872_v33 = vld [vmem:[#allocation2 + $0x600] sm:$0xff] }
 0x577   :  { %4938 = vmatpush1.bf16.msra.mxu1 %v3856_v51  ;;  %5594 = vmatpush1.bf16.msra.mxu0 %v4368_v61  ;;  %v4384_v51 = vld [vmem:[#allocation2 + $0x1600] sm:$0xff]  ;;  %v3875_v61 = vld [vmem:[#allocation2 + $0x618] sm:$0xff] }
 0x578   :  { %4939 = vmatprep.subr.bf16.mxu1 %v3859_v1  ;;  %5595 = vmatprep.subr.bf16.mxu0 %v4371_v28  ;;  %v4387_v1 = vld [vmem:[#allocation2 + $0x1618] sm:$0xff]  ;;  %v8751_v28 = vpack.c.bf16 %v7909_v30, %v7909_v30  ;;  %v8754_v30 = vpack.c.bf16 %v8216_v3, %v8216_v3  ;;  %v3880_v3 = vld [vmem:[#allocation2 + $0x640] sm:$0xff] }
 0x57b   :  { %4940 = vmatpush1.bf16.msra.mxu1 %v3858_v62  ;;  %5596 = vmatpush1.bf16.msra.mxu0 %v4370_v5  ;;  %v8752_v62 = vpack.c.bf16 %v8145_v59, %v8145_v59  ;;  %v3874_v5 = vld [vmem:[#allocation2 + $0x610] sm:$0xff]  ;;  %v3876_v59 = vld [vmem:[#allocation2 + $0x620] sm:$0xff] }
 0x57c   :  { %4941 = vmatprep.subr.bf16.mxu1 %v3861_v10  ;;  %5597 = vmatprep.subr.bf16.mxu0 %v4373_v15  ;;  %v4386_v10 = vld [vmem:[#allocation2 + $0x1610] sm:$0xff]  ;;  %v3877_v15 = vld [vmem:[#allocation2 + $0x628] sm:$0xff] }
 0x57f   :  { %4942 = vmatpush1.bf16.msra.mxu1 %v3860_v24  ;;  %5598 = vmatpush1.bf16.msra.mxu0 %v4372_v49  ;;  %v4389_v24 = vld [vmem:[#allocation2 + $0x1628] sm:$0xff]  ;;  %v8753_v49 = vpack.c.bf16 %v7968_v60, %v7968_v60 }
 0x580   :  { %4943 = vmatprep.subr.bf16.mxu1 %v3863_v39  ;;  %5599 = vmatprep.subr.bf16.mxu0 %v4375_v0  ;;  %v4388_v39 = vld [vmem:[#allocation2 + $0x1620] sm:$0xff]  ;;  %v3879_v0 = vld [vmem:[#allocation2 + $0x638] sm:$0xff]  ;;  %v3881_v60 = vld [vmem:[#allocation2 + $0x648] sm:$0xff] }
 0x583   :  { %4944 = vmatpush1.bf16.msra.mxu1 %v3862_v26  ;;  %5600 = vmatpush1.bf16.msra.mxu0 %v4374_v47  ;;  %v4391_v26 = vld [vmem:[#allocation2 + $0x1638] sm:$0xff]  ;;  %v3878_v47 = vld [vmem:[#allocation2 + $0x630] sm:$0xff] }
 0x584   :  { %4945 = vmatprep.subr.bf16.mxu1 %v3865_v48  ;;  %5601 = vmatprep.subr.bf16.mxu0 %v4377_v37  ;;  %v4390_v48 = vld [vmem:[#allocation2 + $0x1630] sm:$0xff]  ;;  %v4393_v37 = vld [vmem:[#allocation2 + $0x1648] sm:$0xff] }
 0x587   :  { %4946 = vmatpush1.bf16.msra.mxu1 %v3864_v20  ;;  %5602 = vmatpush1.bf16.msra.mxu0 %v4376_v63  ;;  %v4392_v20 = vld [vmem:[#allocation2 + $0x1640] sm:$0xff]  ;;  %v3883_v63 = vld [vmem:[#allocation2 + $0x658] sm:$0xff] }
 0x588   :  { %4947 = vmatprep.subr.bf16.mxu1 %v3867_v36  ;;  %5603 = vmatprep.subr.bf16.mxu0 %v4379_v12  ;;  %v4395_v36 = vld [vmem:[#allocation2 + $0x1658] sm:$0xff]  ;;  %v3882_v12 = vld [vmem:[#allocation2 + $0x650] sm:$0xff] }
 0x58b   :  { %4948 = vmatpush1.bf16.msra.mxu1 %v3866_v43  ;;  %5604 = vmatpush1.bf16.msra.mxu0 %v4378_v42  ;;  %v4394_v43 = vld [vmem:[#allocation2 + $0x1650] sm:$0xff]  ;;  %v3885_v42 = vld [vmem:[#allocation2 + $0x668] sm:$0xff] }
 0x58c   :  { %4949 = vmatprep.subr.bf16.mxu1 %v3869_v9  ;;  %5605 = vmatprep.subr.bf16.mxu0 %v4381_v16  ;;  %v4397_v9 = vld [vmem:[#allocation2 + $0x1668] sm:$0xff]  ;;  %v3884_v16 = vld [vmem:[#allocation2 + $0x660] sm:$0xff] }
 0x58f   :  { %4950 = vmatpush1.bf16.msra.mxu1 %v3868_v58  ;;  %5606 = vmatpush1.bf16.msra.mxu0 %v4380_v50  ;;  %v4396_v58 = vld [vmem:[#allocation2 + $0x1660] sm:$0xff]  ;;  %v3887_v50 = vld [vmem:[#allocation2 + $0x678] sm:$0xff] }
 0x590   :  { %4951 = vmatprep.subr.bf16.mxu1 %v3871_v22  ;;  %5607 = vmatprep.subr.bf16.mxu0 %v4383_v40  ;;  %v4399_v22 = vld [vmem:[#allocation2 + $0x1678] sm:$0xff]  ;;  %v3886_v40 = vld [vmem:[#allocation2 + $0x670] sm:$0xff] }
 0x593   :  { %4952 = vmatpush1.bf16.msra.mxu1 %v3870_v13  ;;  %5608 = vmatpush1.bf16.msra.mxu0 %v4382_v57  ;;  %v4398_v13 = vld [vmem:[#allocation2 + $0x1670] sm:$0xff]  ;;  %v3889_v57 = vld [vmem:[#allocation2 + $0x688] sm:$0xff] }
 0x594   :  { %4962 = vmatprep.subr.bf16.mxu1 %v3873_v8  ;;  %5618 = vmatprep.subr.bf16.mxu0 %v4385_v2  ;;  %v4401_v8 = vld [vmem:[#allocation2 + $0x1688] sm:$0xff]  ;;  %v3888_v2 = vld [vmem:[#allocation2 + $0x680] sm:$0xff] }
 0x596   :  { %4954 = vmatmul.mubr.bf16.vlgmr.msra.gmra.mrb[12].mxu1 %v8751_v28  ;;  %5610 = vmatmul.mubr.bf16.vlgmr.msra.gmra.mrb[20].mxu0 %v8752_v62  ;;  %v4402_v28 = vld [vmem:[#allocation2 + $0x1690] sm:$0xff]  ;;  %v3893_v62 = vld [vmem:[#allocation2 + $0x6a8] sm:$0xff] }
 0x597   :  { %4963 = vmatpush1.bf16.msra.mxu1 %v3872_v33  ;;  %5619 = vmatpush1.bf16.msra.mxu0 %v4384_v51  ;;  %v4400_v33 = vld [vmem:[#allocation2 + $0x1680] sm:$0xff]  ;;  %v3891_v51 = vld [vmem:[#allocation2 + $0x698] sm:$0xff] }
 0x598   :  { %4964 = vmatprep.subr.bf16.mxu1 %v3875_v61  ;;  %5620 = vmatprep.subr.bf16.mxu0 %v4387_v1  ;;  %v4403_v61 = vld [vmem:[#allocation2 + $0x1698] sm:$0xff]  ;;  %v3890_v1 = vld [vmem:[#allocation2 + $0x690] sm:$0xff] }
 0x599   :  { %4994 = vmatprep.mubr.bf16.mxu1 %v8753_v49  ;;  %5650 = vmatprep.mubr.bf16.mxu0 %v8754_v30  ;;  %v4407_v49 = vld [vmem:[#allocation2 + $0x16b8] sm:$0xff]  ;;  %v3894_v30 = vld [vmem:[#allocation2 + $0x6b0] sm:$0xff] }
 0x59b   :  { %4965 = vmatpush1.bf16.msra.mxu1 %v3874_v5  ;;  %5621 = vmatpush1.bf16.msra.mxu0 %v4386_v10  ;;  %v4405_v5 = vld [vmem:[#allocation2 + $0x16a8] sm:$0xff]  ;;  %v3892_v10 = vld [vmem:[#allocation2 + $0x6a0] sm:$0xff] }
 0x59c   :  { %4966 = vmatprep.subr.bf16.mxu1 %v3877_v15  ;;  %5622 = vmatprep.subr.bf16.mxu0 %v4389_v24  ;;  %v4404_v15 = vld [vmem:[#allocation2 + $0x16a0] sm:$0xff]  ;;  %v3895_v24 = vld [vmem:[#allocation2 + $0x6b8] sm:$0xff] }
 0x59f   :  { %4967 = vmatpush1.bf16.msra.mxu1 %v3876_v59  ;;  %5623 = vmatpush1.bf16.msra.mxu0 %v4388_v39  ;;  %v4406_v59 = vld [vmem:[#allocation2 + $0x16b0] sm:$0xff]  ;;  %v3897_v39 = vld [vmem:[#allocation2 + $0x6c8] sm:$0xff] }
 0x5a0   :  { %4968 = vmatprep.subr.bf16.mxu1 %v3879_v0  ;;  %5624 = vmatprep.subr.bf16.mxu0 %v4391_v26  ;;  %v4409_v0 = vld [vmem:[#allocation2 + $0x16c8] sm:$0xff]  ;;  %v3896_v26 = vld [vmem:[#allocation2 + $0x6c0] sm:$0xff] }
 0x5a3   :  { %4969 = vmatpush1.bf16.msra.mxu1 %v3878_v47  ;;  %5625 = vmatpush1.bf16.msra.mxu0 %v4390_v48  ;;  %v4408_v47 = vld [vmem:[#allocation2 + $0x16c0] sm:$0xff]  ;;  %v3899_v48 = vld [vmem:[#allocation2 + $0x6d8] sm:$0xff] }
 0x5a4   :  { %4970 = vmatprep.subr.bf16.mxu1 %v3881_v60  ;;  %5626 = vmatprep.subr.bf16.mxu0 %v4393_v37  ;;  %v4411_v60 = vld [vmem:[#allocation2 + $0x16d8] sm:$0xff]  ;;  %v3898_v37 = vld [vmem:[#allocation2 + $0x6d0] sm:$0xff] }
 0x5a7   :  { %4971 = vmatpush1.bf16.msra.mxu1 %v3880_v3  ;;  %5627 = vmatpush1.bf16.msra.mxu0 %v4392_v20  ;;  %v4410_v3 = vld [vmem:[#allocation2 + $0x16d0] sm:$0xff]  ;;  %v3901_v20 = vld [vmem:[#allocation2 + $0x6e8] sm:$0xff] }
 0x5a8   :  { %4972 = vmatprep.subr.bf16.mxu1 %v3883_v63  ;;  %5628 = vmatprep.subr.bf16.mxu0 %v4395_v36  ;;  %v4413_v63 = vld [vmem:[#allocation2 + $0x16e8] sm:$0xff]  ;;  %v3900_v36 = vld [vmem:[#allocation2 + $0x6e0] sm:$0xff] }
 0x5ab   :  { %4973 = vmatpush1.bf16.msra.mxu1 %v3882_v12  ;;  %5629 = vmatpush1.bf16.msra.mxu0 %v4394_v43  ;;  %v4412_v12 = vld [vmem:[#allocation2 + $0x16e0] sm:$0xff]  ;;  %v3903_v43 = vld [vmem:[#allocation2 + $0x6f8] sm:$0xff] }
 0x5ac   :  { %4974 = vmatprep.subr.bf16.mxu1 %v3885_v42  ;;  %5630 = vmatprep.subr.bf16.mxu0 %v4397_v9  ;;  %v4415_v42 = vld [vmem:[#allocation2 + $0x16f8] sm:$0xff]  ;;  %v3902_v9 = vld [vmem:[#allocation2 + $0x6f0] sm:$0xff] }
 0x5af   :  { %4975 = vmatpush1.bf16.msra.mxu1 %v3884_v16  ;;  %5631 = vmatpush1.bf16.msra.mxu0 %v4396_v58  ;;  %v4414_v16 = vld [vmem:[#allocation2 + $0x16f0] sm:$0xff]  ;;  %v3905_v58 = vld [vmem:[#allocation2 + $0x708] sm:$0xff] }
 0x5b0   :  { %4976 = vmatprep.subr.bf16.mxu1 %v3887_v50  ;;  %5632 = vmatprep.subr.bf16.mxu0 %v4399_v22  ;;  %v4417_v50 = vld [vmem:[#allocation2 + $0x1708] sm:$0xff]  ;;  %v3904_v22 = vld [vmem:[#allocation2 + $0x700] sm:$0xff] }
 0x5b3   :  { %4977 = vmatpush1.bf16.msra.mxu1 %v3886_v40  ;;  %5633 = vmatpush1.bf16.msra.mxu0 %v4398_v13  ;;  %v4416_v40 = vld [vmem:[#allocation2 + $0x1700] sm:$0xff]  ;;  %v3907_v13 = vld [vmem:[#allocation2 + $0x718] sm:$0xff] }
 0x5b4   :  { %4978 = vmatprep.subr.bf16.mxu1 %v3889_v57  ;;  %5634 = vmatprep.subr.bf16.mxu0 %v4401_v8  ;;  %v4419_v57 = vld [vmem:[#allocation2 + $0x1718] sm:$0xff]  ;;  %v8755_v8 = vpack.c.bf16 %v7914_v27, %v7914_v27  ;;  %v8758_v27 = vpack.c.bf16 %v8220_v29, %v8220_v29  ;;  %v3912_v29 = vld [vmem:[#allocation2 + $0x740] sm:$0xff] }
 0x5b7   :  { %4979 = vmatpush1.bf16.msra.mxu1 %v3888_v2  ;;  %5635 = vmatpush1.bf16.msra.mxu0 %v4400_v33  ;;  %v8756_v2 = vpack.c.bf16 %v8150_v4, %v8150_v4  ;;  %v3906_v33 = vld [vmem:[#allocation2 + $0x710] sm:$0xff]  ;;  %v3908_v4 = vld [vmem:[#allocation2 + $0x720] sm:$0xff] }
 0x5b8   :  { %4980 = vmatprep.subr.bf16.mxu1 %v3891_v51  ;;  %5636 = vmatprep.subr.bf16.mxu0 %v4403_v61  ;;  %v4418_v51 = vld [vmem:[#allocation2 + $0x1710] sm:$0xff]  ;;  %v3909_v61 = vld [vmem:[#allocation2 + $0x728] sm:$0xff] }
 0x5bb   :  { %4981 = vmatpush1.bf16.msra.mxu1 %v3890_v1  ;;  %5637 = vmatpush1.bf16.msra.mxu0 %v4402_v28  ;;  %v4421_v1 = vld [vmem:[#allocation2 + $0x1728] sm:$0xff]  ;;  %v8757_v28 = vpack.c.bf16 %v7972_v55, %v7972_v55 }
 0x5bc   :  { %4982 = vmatprep.subr.bf16.mxu1 %v3893_v62  ;;  %5638 = vmatprep.subr.bf16.mxu0 %v4405_v5  ;;  %v4420_v62 = vld [vmem:[#allocation2 + $0x1720] sm:$0xff]  ;;  %v3911_v5 = vld [vmem:[#allocation2 + $0x738] sm:$0xff]  ;;  %v3913_v55 = vld [vmem:[#allocation2 + $0x748] sm:$0xff] }
 0x5bf   :  { %4983 = vmatpush1.bf16.msra.mxu1 %v3892_v10  ;;  %5639 = vmatpush1.bf16.msra.mxu0 %v4404_v15  ;;  %v4423_v10 = vld [vmem:[#allocation2 + $0x1738] sm:$0xff]  ;;  %v3910_v15 = vld [vmem:[#allocation2 + $0x730] sm:$0xff] }
 0x5c0   :  { %4984 = vmatprep.subr.bf16.mxu1 %v3895_v24  ;;  %5640 = vmatprep.subr.bf16.mxu0 %v4407_v49  ;;  %v4422_v24 = vld [vmem:[#allocation2 + $0x1730] sm:$0xff]  ;;  %v4425_v49 = vld [vmem:[#allocation2 + $0x1748] sm:$0xff] }
 0x5c3   :  { %4985 = vmatpush1.bf16.msra.mxu1 %v3894_v30  ;;  %5641 = vmatpush1.bf16.msra.mxu0 %v4406_v59  ;;  %v4424_v30 = vld [vmem:[#allocation2 + $0x1740] sm:$0xff]  ;;  %v3915_v59 = vld [vmem:[#allocation2 + $0x758] sm:$0xff] }
 0x5c4   :  { %4986 = vmatprep.subr.bf16.mxu1 %v3897_v39  ;;  %5642 = vmatprep.subr.bf16.mxu0 %v4409_v0  ;;  %v4427_v39 = vld [vmem:[#allocation2 + $0x1758] sm:$0xff]  ;;  %v3914_v0 = vld [vmem:[#allocation2 + $0x750] sm:$0xff] }
 0x5c7   :  { %4987 = vmatpush1.bf16.msra.mxu1 %v3896_v26  ;;  %5643 = vmatpush1.bf16.msra.mxu0 %v4408_v47  ;;  %v4426_v26 = vld [vmem:[#allocation2 + $0x1750] sm:$0xff]  ;;  %v3917_v47 = vld [vmem:[#allocation2 + $0x768] sm:$0xff] }
 0x5c8   :  { %4988 = vmatprep.subr.bf16.mxu1 %v3899_v48  ;;  %5644 = vmatprep.subr.bf16.mxu0 %v4411_v60  ;;  %v4429_v48 = vld [vmem:[#allocation2 + $0x1768] sm:$0xff]  ;;  %v3916_v60 = vld [vmem:[#allocation2 + $0x760] sm:$0xff] }
 0x5cb   :  { %4989 = vmatpush1.bf16.msra.mxu1 %v3898_v37  ;;  %5645 = vmatpush1.bf16.msra.mxu0 %v4410_v3  ;;  %v4428_v37 = vld [vmem:[#allocation2 + $0x1760] sm:$0xff]  ;;  %v3919_v3 = vld [vmem:[#allocation2 + $0x778] sm:$0xff] }
 0x5cc   :  { %4990 = vmatprep.subr.bf16.mxu1 %v3901_v20  ;;  %5646 = vmatprep.subr.bf16.mxu0 %v4413_v63  ;;  %v4431_v20 = vld [vmem:[#allocation2 + $0x1778] sm:$0xff]  ;;  %v3918_v63 = vld [vmem:[#allocation2 + $0x770] sm:$0xff] }
 0x5cf   :  { %4991 = vmatpush1.bf16.msra.mxu1 %v3900_v36  ;;  %5647 = vmatpush1.bf16.msra.mxu0 %v4412_v12  ;;  %v4430_v36 = vld [vmem:[#allocation2 + $0x1770] sm:$0xff]  ;;  %v3921_v12 = vld [vmem:[#allocation2 + $0x788] sm:$0xff] }
 0x5d0   :  { %4992 = vmatprep.subr.bf16.mxu1 %v3903_v43  ;;  %5648 = vmatprep.subr.bf16.mxu0 %v4415_v42  ;;  %v4433_v43 = vld [vmem:[#allocation2 + $0x1788] sm:$0xff]  ;;  %v3920_v42 = vld [vmem:[#allocation2 + $0x780] sm:$0xff] }
 0x5d3   :  { %4993 = vmatpush1.bf16.msra.mxu1 %v3902_v9  ;;  %5649 = vmatpush1.bf16.msra.mxu0 %v4414_v16  ;;  %v4432_v9 = vld [vmem:[#allocation2 + $0x1780] sm:$0xff]  ;;  %v3923_v16 = vld [vmem:[#allocation2 + $0x798] sm:$0xff] }
 0x5d4   :  { %5003 = vmatprep.subr.bf16.mxu1 %v3905_v58  ;;  %5659 = vmatprep.subr.bf16.mxu0 %v4417_v50  ;;  %v4435_v58 = vld [vmem:[#allocation2 + $0x1798] sm:$0xff]  ;;  %v3922_v50 = vld [vmem:[#allocation2 + $0x790] sm:$0xff] }
 0x5d6   :  { %4995 = vmatmul.mubr.bf16.vlgmr.msra.gmra.mrb[12].mxu1 %v8755_v8  ;;  %5651 = vmatmul.mubr.bf16.vlgmr.msra.gmra.mrb[20].mxu0 %v8756_v2  ;;  %v4436_v8 = vld [vmem:[#allocation2 + $0x17a0] sm:$0xff]  ;;  %v3927_v2 = vld [vmem:[#allocation2 + $0x7b8] sm:$0xff] }
 0x5d7   :  { %5004 = vmatpush1.bf16.msra.mxu1 %v3904_v22  ;;  %5660 = vmatpush1.bf16.msra.mxu0 %v4416_v40  ;;  %v4434_v22 = vld [vmem:[#allocation2 + $0x1790] sm:$0xff]  ;;  %v3925_v40 = vld [vmem:[#allocation2 + $0x7a8] sm:$0xff] }
 0x5d8   :  { %5005 = vmatprep.subr.bf16.mxu1 %v3907_v13  ;;  %5661 = vmatprep.subr.bf16.mxu0 %v4419_v57  ;;  %v4437_v13 = vld [vmem:[#allocation2 + $0x17a8] sm:$0xff]  ;;  %v3924_v57 = vld [vmem:[#allocation2 + $0x7a0] sm:$0xff] }
 0x5d9   :  { %5035 = vmatprep.mubr.bf16.mxu1 %v8757_v28  ;;  %5691 = vmatprep.mubr.bf16.mxu0 %v8758_v27  ;;  %v4441_v28 = vld [vmem:[#allocation2 + $0x17c8] sm:$0xff]  ;;  %v3928_v27 = vld [vmem:[#allocation2 + $0x7c0] sm:$0xff] }
 0x5db   :  { %5006 = vmatpush1.bf16.msra.mxu1 %v3906_v33  ;;  %5662 = vmatpush1.bf16.msra.mxu0 %v4418_v51  ;;  %v4439_v33 = vld [vmem:[#allocation2 + $0x17b8] sm:$0xff]  ;;  %v3926_v51 = vld [vmem:[#allocation2 + $0x7b0] sm:$0xff] }
 0x5dc   :  { %5007 = vmatprep.subr.bf16.mxu1 %v3909_v61  ;;  %5663 = vmatprep.subr.bf16.mxu0 %v4421_v1  ;;  %v4438_v61 = vld [vmem:[#allocation2 + $0x17b0] sm:$0xff]  ;;  %v3929_v1 = vld [vmem:[#allocation2 + $0x7c8] sm:$0xff] }
 0x5df   :  { %5008 = vmatpush1.bf16.msra.mxu1 %v3908_v4  ;;  %5664 = vmatpush1.bf16.msra.mxu0 %v4420_v62  ;;  %v4440_v4 = vld [vmem:[#allocation2 + $0x17c0] sm:$0xff]  ;;  %v3931_v62 = vld [vmem:[#allocation2 + $0x7d8] sm:$0xff] }
 0x5e0   :  { %5009 = vmatprep.subr.bf16.mxu1 %v3911_v5  ;;  %5665 = vmatprep.subr.bf16.mxu0 %v4423_v10  ;;  %v4443_v5 = vld [vmem:[#allocation2 + $0x17d8] sm:$0xff]  ;;  %v3930_v10 = vld [vmem:[#allocation2 + $0x7d0] sm:$0xff] }
 0x5e3   :  { %5010 = vmatpush1.bf16.msra.mxu1 %v3910_v15  ;;  %5666 = vmatpush1.bf16.msra.mxu0 %v4422_v24  ;;  %v4442_v15 = vld [vmem:[#allocation2 + $0x17d0] sm:$0xff]  ;;  %v3933_v24 = vld [vmem:[#allocation2 + $0x7e8] sm:$0xff] }
 0x5e4   :  { %5011 = vmatprep.subr.bf16.mxu1 %v3913_v55  ;;  %5667 = vmatprep.subr.bf16.mxu0 %v4425_v49  ;;  %v4445_v55 = vld [vmem:[#allocation2 + $0x17e8] sm:$0xff]  ;;  %v3932_v49 = vld [vmem:[#allocation2 + $0x7e0] sm:$0xff] }
 0x5e7   :  { %5012 = vmatpush1.bf16.msra.mxu1 %v3912_v29  ;;  %5668 = vmatpush1.bf16.msra.mxu0 %v4424_v30  ;;  %v4444_v29 = vld [vmem:[#allocation2 + $0x17e0] sm:$0xff]  ;;  %v3935_v30 = vld [vmem:[#allocation2 + $0x7f8] sm:$0xff] }
 0x5e8   :  { %5013 = vmatprep.subr.bf16.mxu1 %v3915_v59  ;;  %5669 = vmatprep.subr.bf16.mxu0 %v4427_v39  ;;  %v4447_v59 = vld [vmem:[#allocation2 + $0x17f8] sm:$0xff]  ;;  %v3934_v39 = vld [vmem:[#allocation2 + $0x7f0] sm:$0xff] }
 0x5eb   :  { %5014 = vmatpush1.bf16.msra.mxu1 %v3914_v0  ;;  %5670 = vmatpush1.bf16.msra.mxu0 %v4426_v26  ;;  %v4446_v0 = vld [vmem:[#allocation2 + $0x17f0] sm:$0xff]  ;;  %v3937_v26 = vld [vmem:[#allocation2 + $0x808] sm:$0xff] }
 0x5ec   :  { %5015 = vmatprep.subr.bf16.mxu1 %v3917_v47  ;;  %5671 = vmatprep.subr.bf16.mxu0 %v4429_v48  ;;  %v4449_v47 = vld [vmem:[#allocation2 + $0x1808] sm:$0xff]  ;;  %v3936_v48 = vld [vmem:[#allocation2 + $0x800] sm:$0xff] }
 0x5ef   :  { %5016 = vmatpush1.bf16.msra.mxu1 %v3916_v60  ;;  %5672 = vmatpush1.bf16.msra.mxu0 %v4428_v37  ;;  %v4448_v60 = vld [vmem:[#allocation2 + $0x1800] sm:$0xff]  ;;  %v3939_v37 = vld [vmem:[#allocation2 + $0x818] sm:$0xff] }
 0x5f0   :  { %5017 = vmatprep.subr.bf16.mxu1 %v3919_v3  ;;  %5673 = vmatprep.subr.bf16.mxu0 %v4431_v20  ;;  %v4451_v3 = vld [vmem:[#allocation2 + $0x1818] sm:$0xff]  ;;  %v8759_v20 = vpack.c.bf16 %v7918_v38, %v7918_v38  ;;  %v8762_v38 = vpack.c.bf16 %v8303_v35, %v8303_v35  ;;  %v3944_v35 = vld [vmem:[#allocation2 + $0x840] sm:$0xff] }
 0x5f3   :  { %5018 = vmatpush1.bf16.msra.mxu1 %v3918_v63  ;;  %5674 = vmatpush1.bf16.msra.mxu0 %v4430_v36  ;;  %v8760_v63 = vpack.c.bf16 %v8154_v31, %v8154_v31  ;;  %v3938_v36 = vld [vmem:[#allocation2 + $0x810] sm:$0xff]  ;;  %v3940_v31 = vld [vmem:[#allocation2 + $0x820] sm:$0xff] }
 0x5f4   :  { %5019 = vmatprep.subr.bf16.mxu1 %v3921_v12  ;;  %5675 = vmatprep.subr.bf16.mxu0 %v4433_v43  ;;  %v4450_v12 = vld [vmem:[#allocation2 + $0x1810] sm:$0xff]  ;;  %v3941_v43 = vld [vmem:[#allocation2 + $0x828] sm:$0xff] }
 0x5f7   :  { %5020 = vmatpush1.bf16.msra.mxu1 %v3920_v42  ;;  %5676 = vmatpush1.bf16.msra.mxu0 %v4432_v9  ;;  %v4453_v42 = vld [vmem:[#allocation2 + $0x1828] sm:$0xff]  ;;  %v8761_v9 = vpack.c.bf16 %v8059_v7, %v8059_v7 }
 0x5f8   :  { %5021 = vmatprep.subr.bf16.mxu1 %v3923_v16  ;;  %5677 = vmatprep.subr.bf16.mxu0 %v4435_v58  ;;  %v4452_v16 = vld [vmem:[#allocation2 + $0x1820] sm:$0xff]  ;;  %v3943_v58 = vld [vmem:[#allocation2 + $0x838] sm:$0xff]  ;;  %v3945_v7 = vld [vmem:[#allocation2 + $0x848] sm:$0xff] }
 0x5fb   :  { %5022 = vmatpush1.bf16.msra.mxu1 %v3922_v50  ;;  %5678 = vmatpush1.bf16.msra.mxu0 %v4434_v22  ;;  %v4455_v50 = vld [vmem:[#allocation2 + $0x1838] sm:$0xff]  ;;  %v3942_v22 = vld [vmem:[#allocation2 + $0x830] sm:$0xff] }
 0x5fc   :  { %5023 = vmatprep.subr.bf16.mxu1 %v3925_v40  ;;  %5679 = vmatprep.subr.bf16.mxu0 %v4437_v13  ;;  %v4454_v40 = vld [vmem:[#allocation2 + $0x1830] sm:$0xff]  ;;  %v4457_v13 = vld [vmem:[#allocation2 + $0x1848] sm:$0xff] }
 0x5ff   :  { %5024 = vmatpush1.bf16.msra.mxu1 %v3924_v57  ;;  %5680 = vmatpush1.bf16.msra.mxu0 %v4436_v8  ;;  %v4456_v57 = vld [vmem:[#allocation2 + $0x1840] sm:$0xff]  ;;  %v3947_v8 = vld [vmem:[#allocation2 + $0x858] sm:$0xff] }
 0x600   :  { %5025 = vmatprep.subr.bf16.mxu1 %v3927_v2  ;;  %5681 = vmatprep.subr.bf16.mxu0 %v4439_v33  ;;  %v4459_v2 = vld [vmem:[#allocation2 + $0x1858] sm:$0xff]  ;;  %v3946_v33 = vld [vmem:[#allocation2 + $0x850] sm:$0xff] }
 0x603   :  { %5026 = vmatpush1.bf16.msra.mxu1 %v3926_v51  ;;  %5682 = vmatpush1.bf16.msra.mxu0 %v4438_v61  ;;  %v4458_v51 = vld [vmem:[#allocation2 + $0x1850] sm:$0xff]  ;;  %v3949_v61 = vld [vmem:[#allocation2 + $0x868] sm:$0xff] }
 0x604   :  { %5027 = vmatprep.subr.bf16.mxu1 %v3929_v1  ;;  %5683 = vmatprep.subr.bf16.mxu0 %v4441_v28  ;;  %v4461_v1 = vld [vmem:[#allocation2 + $0x1868] sm:$0xff]  ;;  %v3948_v28 = vld [vmem:[#allocation2 + $0x860] sm:$0xff] }
 0x607   :  { %5028 = vmatpush1.bf16.msra.mxu1 %v3928_v27  ;;  %5684 = vmatpush1.bf16.msra.mxu0 %v4440_v4  ;;  %v4460_v27 = vld [vmem:[#allocation2 + $0x1860] sm:$0xff]  ;;  %v3951_v4 = vld [vmem:[#allocation2 + $0x878] sm:$0xff] }
 0x608   :  { %5029 = vmatprep.subr.bf16.mxu1 %v3931_v62  ;;  %5685 = vmatprep.subr.bf16.mxu0 %v4443_v5  ;;  %v4463_v62 = vld [vmem:[#allocation2 + $0x1878] sm:$0xff]  ;;  %v3950_v5 = vld [vmem:[#allocation2 + $0x870] sm:$0xff] }
 0x60b   :  { %5030 = vmatpush1.bf16.msra.mxu1 %v3930_v10  ;;  %5686 = vmatpush1.bf16.msra.mxu0 %v4442_v15  ;;  %v4462_v10 = vld [vmem:[#allocation2 + $0x1870] sm:$0xff]  ;;  %v3953_v15 = vld [vmem:[#allocation2 + $0x888] sm:$0xff] }
 0x60c   :  { %5031 = vmatprep.subr.bf16.mxu1 %v3933_v24  ;;  %5687 = vmatprep.subr.bf16.mxu0 %v4445_v55  ;;  %v4465_v24 = vld [vmem:[#allocation2 + $0x1888] sm:$0xff]  ;;  %v3952_v55 = vld [vmem:[#allocation2 + $0x880] sm:$0xff] }
 0x60f   :  { %5032 = vmatpush1.bf16.msra.mxu1 %v3932_v49  ;;  %5688 = vmatpush1.bf16.msra.mxu0 %v4444_v29  ;;  %v4464_v49 = vld [vmem:[#allocation2 + $0x1880] sm:$0xff]  ;;  %v3955_v29 = vld [vmem:[#allocation2 + $0x898] sm:$0xff] }
 0x610   :  { %5033 = vmatprep.subr.bf16.mxu1 %v3935_v30  ;;  %5689 = vmatprep.subr.bf16.mxu0 %v4447_v59  ;;  %v4467_v30 = vld [vmem:[#allocation2 + $0x1898] sm:$0xff]  ;;  %v3954_v59 = vld [vmem:[#allocation2 + $0x890] sm:$0xff] }
 0x613   :  { %5034 = vmatpush1.bf16.msra.mxu1 %v3934_v39  ;;  %5690 = vmatpush1.bf16.msra.mxu0 %v4446_v0  ;;  %v4466_v39 = vld [vmem:[#allocation2 + $0x1890] sm:$0xff]  ;;  %v3957_v0 = vld [vmem:[#allocation2 + $0x8a8] sm:$0xff] }
 0x614   :  { %5044 = vmatprep.subr.bf16.mxu1 %v3937_v26  ;;  %5700 = vmatprep.subr.bf16.mxu0 %v4449_v47  ;;  %v4469_v26 = vld [vmem:[#allocation2 + $0x18a8] sm:$0xff]  ;;  %v3956_v47 = vld [vmem:[#allocation2 + $0x8a0] sm:$0xff] }
 0x616   :  { %5036 = vmatmul.mubr.bf16.vlgmr.msra.gmra.mrb[12].mxu1 %v8759_v20  ;;  %5692 = vmatmul.mubr.bf16.vlgmr.msra.gmra.mrb[20].mxu0 %v8760_v63  ;;  %v4470_v20 = vld [vmem:[#allocation2 + $0x18b0] sm:$0xff]  ;;  %v3961_v63 = vld [vmem:[#allocation2 + $0x8c8] sm:$0xff] }
 0x617   :  { %5045 = vmatpush1.bf16.msra.mxu1 %v3936_v48  ;;  %5701 = vmatpush1.bf16.msra.mxu0 %v4448_v60  ;;  %v4468_v48 = vld [vmem:[#allocation2 + $0x18a0] sm:$0xff]  ;;  %v3959_v60 = vld [vmem:[#allocation2 + $0x8b8] sm:$0xff] }
 0x618   :  { %5046 = vmatprep.subr.bf16.mxu1 %v3939_v37  ;;  %5702 = vmatprep.subr.bf16.mxu0 %v4451_v3  ;;  %v4471_v37 = vld [vmem:[#allocation2 + $0x18b8] sm:$0xff]  ;;  %v3958_v3 = vld [vmem:[#allocation2 + $0x8b0] sm:$0xff] }
 0x619   :  { %5076 = vmatprep.mubr.bf16.mxu1 %v8761_v9  ;;  %5732 = vmatprep.mubr.bf16.mxu0 %v8762_v38  ;;  %v4475_v9 = vld [vmem:[#allocation2 + $0x18d8] sm:$0xff]  ;;  %v3962_v38 = vld [vmem:[#allocation2 + $0x8d0] sm:$0xff] }
 0x61b   :  { %5047 = vmatpush1.bf16.msra.mxu1 %v3938_v36  ;;  %5703 = vmatpush1.bf16.msra.mxu0 %v4450_v12  ;;  %v4473_v36 = vld [vmem:[#allocation2 + $0x18c8] sm:$0xff]  ;;  %v3960_v12 = vld [vmem:[#allocation2 + $0x8c0] sm:$0xff] }
 0x61c   :  { %5048 = vmatprep.subr.bf16.mxu1 %v3941_v43  ;;  %5704 = vmatprep.subr.bf16.mxu0 %v4453_v42  ;;  %v4472_v43 = vld [vmem:[#allocation2 + $0x18c0] sm:$0xff]  ;;  %v3963_v42 = vld [vmem:[#allocation2 + $0x8d8] sm:$0xff] }
 0x61f   :  { %5049 = vmatpush1.bf16.msra.mxu1 %v3940_v31  ;;  %5705 = vmatpush1.bf16.msra.mxu0 %v4452_v16  ;;  %v4474_v31 = vld [vmem:[#allocation2 + $0x18d0] sm:$0xff]  ;;  %v3965_v16 = vld [vmem:[#allocation2 + $0x8e8] sm:$0xff] }
 0x620   :  { %5050 = vmatprep.subr.bf16.mxu1 %v3943_v58  ;;  %5706 = vmatprep.subr.bf16.mxu0 %v4455_v50  ;;  %v4477_v58 = vld [vmem:[#allocation2 + $0x18e8] sm:$0xff]  ;;  %v3964_v50 = vld [vmem:[#allocation2 + $0x8e0] sm:$0xff] }
 0x623   :  { %5051 = vmatpush1.bf16.msra.mxu1 %v3942_v22  ;;  %5707 = vmatpush1.bf16.msra.mxu0 %v4454_v40  ;;  %v4476_v22 = vld [vmem:[#allocation2 + $0x18e0] sm:$0xff]  ;;  %v3967_v40 = vld [vmem:[#allocation2 + $0x8f8] sm:$0xff] }
 0x624   :  { %5052 = vmatprep.subr.bf16.mxu1 %v3945_v7  ;;  %5708 = vmatprep.subr.bf16.mxu0 %v4457_v13  ;;  %v4479_v7 = vld [vmem:[#allocation2 + $0x18f8] sm:$0xff]  ;;  %v3966_v13 = vld [vmem:[#allocation2 + $0x8f0] sm:$0xff] }
 0x627   :  { %5053 = vmatpush1.bf16.msra.mxu1 %v3944_v35  ;;  %5709 = vmatpush1.bf16.msra.mxu0 %v4456_v57  ;;  %v4478_v35 = vld [vmem:[#allocation2 + $0x18f0] sm:$0xff]  ;;  %v3969_v57 = vld [vmem:[#allocation2 + $0x908] sm:$0xff] }
 0x628   :  { %5054 = vmatprep.subr.bf16.mxu1 %v3947_v8  ;;  %5710 = vmatprep.subr.bf16.mxu0 %v4459_v2  ;;  %v4481_v8 = vld [vmem:[#allocation2 + $0x1908] sm:$0xff]  ;;  %v3968_v2 = vld [vmem:[#allocation2 + $0x900] sm:$0xff] }
 0x62b   :  { %5055 = vmatpush1.bf16.msra.mxu1 %v3946_v33  ;;  %5711 = vmatpush1.bf16.msra.mxu0 %v4458_v51  ;;  %v4480_v33 = vld [vmem:[#allocation2 + $0x1900] sm:$0xff]  ;;  %v3971_v51 = vld [vmem:[#allocation2 + $0x918] sm:$0xff] }
 0x62c   :  { %5056 = vmatprep.subr.bf16.mxu1 %v3949_v61  ;;  %5712 = vmatprep.subr.bf16.mxu0 %v4461_v1  ;;  %v4483_v61 = vld [vmem:[#allocation2 + $0x1918] sm:$0xff]  ;;  %v8763_v1 = vpack.c.bf16 %v8005_v19, %v8005_v19  ;;  %v8766_v19 = vpack.c.bf16 %v8307_v32, %v8307_v32  ;;  %v3976_v32 = vld [vmem:[#allocation2 + $0x940] sm:$0xff] }
 0x62f   :  { %5057 = vmatpush1.bf16.msra.mxu1 %v3948_v28  ;;  %5713 = vmatpush1.bf16.msra.mxu0 %v4460_v27  ;;  %v8764_v28 = vpack.c.bf16 %v8241_v17, %v8241_v17  ;;  %v3970_v27 = vld [vmem:[#allocation2 + $0x910] sm:$0xff]  ;;  %v3972_v17 = vld [vmem:[#allocation2 + $0x920] sm:$0xff] }
 0x630   :  { %5058 = vmatprep.subr.bf16.mxu1 %v3951_v4  ;;  %5714 = vmatprep.subr.bf16.mxu0 %v4463_v62  ;;  %v4482_v4 = vld [vmem:[#allocation2 + $0x1910] sm:$0xff]  ;;  %v3973_v62 = vld [vmem:[#allocation2 + $0x928] sm:$0xff] }
 0x633   :  { %5059 = vmatpush1.bf16.msra.mxu1 %v3950_v5  ;;  %5715 = vmatpush1.bf16.msra.mxu0 %v4462_v10  ;;  %v4485_v5 = vld [vmem:[#allocation2 + $0x1928] sm:$0xff]  ;;  %v8765_v10 = vpack.c.bf16 %v8063_v45, %v8063_v45 }
 0x634   :  { %5060 = vmatprep.subr.bf16.mxu1 %v3953_v15  ;;  %5716 = vmatprep.subr.bf16.mxu0 %v4465_v24  ;;  %v4484_v15 = vld [vmem:[#allocation2 + $0x1920] sm:$0xff]  ;;  %v3975_v24 = vld [vmem:[#allocation2 + $0x938] sm:$0xff]  ;;  %v3977_v45 = vld [vmem:[#allocation2 + $0x948] sm:$0xff] }
 0x637   :  { %5061 = vmatpush1.bf16.msra.mxu1 %v3952_v55  ;;  %5717 = vmatpush1.bf16.msra.mxu0 %v4464_v49  ;;  %v4487_v55 = vld [vmem:[#allocation2 + $0x1938] sm:$0xff]  ;;  %v3974_v49 = vld [vmem:[#allocation2 + $0x930] sm:$0xff] }
 0x638   :  { %5062 = vmatprep.subr.bf16.mxu1 %v3955_v29  ;;  %5718 = vmatprep.subr.bf16.mxu0 %v4467_v30  ;;  %v4486_v29 = vld [vmem:[#allocation2 + $0x1930] sm:$0xff]  ;;  %v4489_v30 = vld [vmem:[#allocation2 + $0x1948] sm:$0xff] }
 0x63b   :  { %5063 = vmatpush1.bf16.msra.mxu1 %v3954_v59  ;;  %5719 = vmatpush1.bf16.msra.mxu0 %v4466_v39  ;;  %v4488_v59 = vld [vmem:[#allocation2 + $0x1940] sm:$0xff]  ;;  %v3979_v39 = vld [vmem:[#allocation2 + $0x958] sm:$0xff] }
 0x63c   :  { %5064 = vmatprep.subr.bf16.mxu1 %v3957_v0  ;;  %5720 = vmatprep.subr.bf16.mxu0 %v4469_v26  ;;  %v4491_v0 = vld [vmem:[#allocation2 + $0x1958] sm:$0xff]  ;;  %v3978_v26 = vld [vmem:[#allocation2 + $0x950] sm:$0xff] }
 0x63f   :  { %5065 = vmatpush1.bf16.msra.mxu1 %v3956_v47  ;;  %5721 = vmatpush1.bf16.msra.mxu0 %v4468_v48  ;;  %v4490_v47 = vld [vmem:[#allocation2 + $0x1950] sm:$0xff]  ;;  %v3981_v48 = vld [vmem:[#allocation2 + $0x968] sm:$0xff] }
 0x640   :  { %5066 = vmatprep.subr.bf16.mxu1 %v3959_v60  ;;  %5722 = vmatprep.subr.bf16.mxu0 %v4471_v37  ;;  %v4493_v60 = vld [vmem:[#allocation2 + $0x1968] sm:$0xff]  ;;  %v3980_v37 = vld [vmem:[#allocation2 + $0x960] sm:$0xff] }
 0x643   :  { %5067 = vmatpush1.bf16.msra.mxu1 %v3958_v3  ;;  %5723 = vmatpush1.bf16.msra.mxu0 %v4470_v20  ;;  %v4492_v3 = vld [vmem:[#allocation2 + $0x1960] sm:$0xff]  ;;  %v3983_v20 = vld [vmem:[#allocation2 + $0x978] sm:$0xff] }
 0x644   :  { %5068 = vmatprep.subr.bf16.mxu1 %v3961_v63  ;;  %5724 = vmatprep.subr.bf16.mxu0 %v4473_v36  ;;  %v4495_v63 = vld [vmem:[#allocation2 + $0x1978] sm:$0xff]  ;;  %v3982_v36 = vld [vmem:[#allocation2 + $0x970] sm:$0xff] }
 0x647   :  { %5069 = vmatpush1.bf16.msra.mxu1 %v3960_v12  ;;  %5725 = vmatpush1.bf16.msra.mxu0 %v4472_v43  ;;  %v4494_v12 = vld [vmem:[#allocation2 + $0x1970] sm:$0xff]  ;;  %v3985_v43 = vld [vmem:[#allocation2 + $0x988] sm:$0xff] }
 0x648   :  { %5070 = vmatprep.subr.bf16.mxu1 %v3963_v42  ;;  %5726 = vmatprep.subr.bf16.mxu0 %v4475_v9  ;;  %v4497_v42 = vld [vmem:[#allocation2 + $0x1988] sm:$0xff]  ;;  %v3984_v9 = vld [vmem:[#allocation2 + $0x980] sm:$0xff] }
 0x64b   :  { %5071 = vmatpush1.bf16.msra.mxu1 %v3962_v38  ;;  %5727 = vmatpush1.bf16.msra.mxu0 %v4474_v31  ;;  %v4496_v38 = vld [vmem:[#allocation2 + $0x1980] sm:$0xff]  ;;  %v3987_v31 = vld [vmem:[#allocation2 + $0x998] sm:$0xff] }
 0x64c   :  { %5072 = vmatprep.subr.bf16.mxu1 %v3965_v16  ;;  %5728 = vmatprep.subr.bf16.mxu0 %v4477_v58  ;;  %v4499_v16 = vld [vmem:[#allocation2 + $0x1998] sm:$0xff]  ;;  %v3986_v58 = vld [vmem:[#allocation2 + $0x990] sm:$0xff] }
 0x64f   :  { %5073 = vmatpush1.bf16.msra.mxu1 %v3964_v50  ;;  %5729 = vmatpush1.bf16.msra.mxu0 %v4476_v22  ;;  %v4498_v50 = vld [vmem:[#allocation2 + $0x1990] sm:$0xff]  ;;  %v3989_v22 = vld [vmem:[#allocation2 + $0x9a8] sm:$0xff] }
 0x650   :  { %5074 = vmatprep.subr.bf16.mxu1 %v3967_v40  ;;  %5730 = vmatprep.subr.bf16.mxu0 %v4479_v7  ;;  %v4501_v40 = vld [vmem:[#allocation2 + $0x19a8] sm:$0xff]  ;;  %v3988_v7 = vld [vmem:[#allocation2 + $0x9a0] sm:$0xff] }
 0x653   :  { %5075 = vmatpush1.bf16.msra.mxu1 %v3966_v13  ;;  %5731 = vmatpush1.bf16.msra.mxu0 %v4478_v35  ;;  %v4500_v13 = vld [vmem:[#allocation2 + $0x19a0] sm:$0xff]  ;;  %v3991_v35 = vld [vmem:[#allocation2 + $0x9b8] sm:$0xff] }
 0x654   :  { %5085 = vmatprep.subr.bf16.mxu1 %v3969_v57  ;;  %5741 = vmatprep.subr.bf16.mxu0 %v4481_v8  ;;  %v4503_v57 = vld [vmem:[#allocation2 + $0x19b8] sm:$0xff]  ;;  %v3990_v8 = vld [vmem:[#allocation2 + $0x9b0] sm:$0xff] }
 0x656   :  { %5077 = vmatmul.mubr.bf16.vlgmr.msra.gmra.mrb[12].mxu1 %v8763_v1  ;;  %5733 = vmatmul.mubr.bf16.vlgmr.msra.gmra.mrb[20].mxu0 %v8764_v28  ;;  %v4504_v1 = vld [vmem:[#allocation2 + $0x19c0] sm:$0xff]  ;;  %v3995_v28 = vld [vmem:[#allocation2 + $0x9d8] sm:$0xff] }
 0x657   :  { %5086 = vmatpush1.bf16.msra.mxu1 %v3968_v2  ;;  %5742 = vmatpush1.bf16.msra.mxu0 %v4480_v33  ;;  %v4502_v2 = vld [vmem:[#allocation2 + $0x19b0] sm:$0xff]  ;;  %v3993_v33 = vld [vmem:[#allocation2 + $0x9c8] sm:$0xff] }
 0x658   :  { %5087 = vmatprep.subr.bf16.mxu1 %v3971_v51  ;;  %5743 = vmatprep.subr.bf16.mxu0 %v4483_v61  ;;  %v4505_v51 = vld [vmem:[#allocation2 + $0x19c8] sm:$0xff]  ;;  %v3992_v61 = vld [vmem:[#allocation2 + $0x9c0] sm:$0xff] }
 0x659   :  { %5117 = vmatprep.mubr.bf16.mxu1 %v8765_v10  ;;  %5773 = vmatprep.mubr.bf16.mxu0 %v8766_v19  ;;  %v4509_v10 = vld [vmem:[#allocation2 + $0x19e8] sm:$0xff]  ;;  %v3996_v19 = vld [vmem:[#allocation2 + $0x9e0] sm:$0xff] }
 0x65b   :  { %5088 = vmatpush1.bf16.msra.mxu1 %v3970_v27  ;;  %5744 = vmatpush1.bf16.msra.mxu0 %v4482_v4  ;;  %v4507_v27 = vld [vmem:[#allocation2 + $0x19d8] sm:$0xff]  ;;  %v3994_v4 = vld [vmem:[#allocation2 + $0x9d0] sm:$0xff] }
 0x65c   :  { %5089 = vmatprep.subr.bf16.mxu1 %v3973_v62  ;;  %5745 = vmatprep.subr.bf16.mxu0 %v4485_v5  ;;  %v4506_v62 = vld [vmem:[#allocation2 + $0x19d0] sm:$0xff]  ;;  %v3997_v5 = vld [vmem:[#allocation2 + $0x9e8] sm:$0xff] }
 0x65f   :  { %5090 = vmatpush1.bf16.msra.mxu1 %v3972_v17  ;;  %5746 = vmatpush1.bf16.msra.mxu0 %v4484_v15  ;;  %v4508_v17 = vld [vmem:[#allocation2 + $0x19e0] sm:$0xff]  ;;  %v3999_v15 = vld [vmem:[#allocation2 + $0x9f8] sm:$0xff] }
 0x660   :  { %5091 = vmatprep.subr.bf16.mxu1 %v3975_v24  ;;  %5747 = vmatprep.subr.bf16.mxu0 %v4487_v55  ;;  %v4511_v24 = vld [vmem:[#allocation2 + $0x19f8] sm:$0xff]  ;;  %v3998_v55 = vld [vmem:[#allocation2 + $0x9f0] sm:$0xff] }
 0x663   :  { %5092 = vmatpush1.bf16.msra.mxu1 %v3974_v49  ;;  %5748 = vmatpush1.bf16.msra.mxu0 %v4486_v29  ;;  %v4510_v49 = vld [vmem:[#allocation2 + $0x19f0] sm:$0xff]  ;;  %v4001_v29 = vld [vmem:[#allocation2 + $0xa08] sm:$0xff] }
 0x664   :  { %5093 = vmatprep.subr.bf16.mxu1 %v3977_v45  ;;  %5749 = vmatprep.subr.bf16.mxu0 %v4489_v30  ;;  %v4513_v45 = vld [vmem:[#allocation2 + $0x1a08] sm:$0xff]  ;;  %v4000_v30 = vld [vmem:[#allocation2 + $0xa00] sm:$0xff] }
 0x667   :  { %5094 = vmatpush1.bf16.msra.mxu1 %v3976_v32  ;;  %5750 = vmatpush1.bf16.msra.mxu0 %v4488_v59  ;;  %v4512_v32 = vld [vmem:[#allocation2 + $0x1a00] sm:$0xff]  ;;  %v4003_v59 = vld [vmem:[#allocation2 + $0xa18] sm:$0xff] }
 0x668   :  { %5095 = vmatprep.subr.bf16.mxu1 %v3979_v39  ;;  %5751 = vmatprep.subr.bf16.mxu0 %v4491_v0  ;;  %v4515_v39 = vld [vmem:[#allocation2 + $0x1a18] sm:$0xff]  ;;  %v8767_v0 = vpack.c.bf16 %v8009_v52, %v8009_v52  ;;  %v8770_v52 = vpack.c.bf16 %v8312_v11, %v8312_v11  ;;  %v4008_v11 = vld [vmem:[#allocation2 + $0xa40] sm:$0xff] }
 0x66b   :  { %5096 = vmatpush1.bf16.msra.mxu1 %v3978_v26  ;;  %5752 = vmatpush1.bf16.msra.mxu0 %v4490_v47  ;;  %v8768_v26 = vpack.c.bf16 %v8245_v23, %v8245_v23  ;;  %v4002_v47 = vld [vmem:[#allocation2 + $0xa10] sm:$0xff]  ;;  %v4004_v23 = vld [vmem:[#allocation2 + $0xa20] sm:$0xff] }
 0x66c   :  { %5097 = vmatprep.subr.bf16.mxu1 %v3981_v48  ;;  %5753 = vmatprep.subr.bf16.mxu0 %v4493_v60  ;;  %v4514_v48 = vld [vmem:[#allocation2 + $0x1a10] sm:$0xff]  ;;  %v4005_v60 = vld [vmem:[#allocation2 + $0xa28] sm:$0xff] }
 0x66f   :  { %5098 = vmatpush1.bf16.msra.mxu1 %v3980_v37  ;;  %5754 = vmatpush1.bf16.msra.mxu0 %v4492_v3  ;;  %v4517_v37 = vld [vmem:[#allocation2 + $0x1a28] sm:$0xff]  ;;  %v8769_v3 = vpack.c.bf16 %v8068_v56, %v8068_v56 }
 0x670   :  { %5099 = vmatprep.subr.bf16.mxu1 %v3983_v20  ;;  %5755 = vmatprep.subr.bf16.mxu0 %v4495_v63  ;;  %v4516_v20 = vld [vmem:[#allocation2 + $0x1a20] sm:$0xff]  ;;  %v4007_v63 = vld [vmem:[#allocation2 + $0xa38] sm:$0xff]  ;;  %v4009_v56 = vld [vmem:[#allocation2 + $0xa48] sm:$0xff] }
 0x673   :  { %5100 = vmatpush1.bf16.msra.mxu1 %v3982_v36  ;;  %5756 = vmatpush1.bf16.msra.mxu0 %v4494_v12  ;;  %v4519_v36 = vld [vmem:[#allocation2 + $0x1a38] sm:$0xff]  ;;  %v4006_v12 = vld [vmem:[#allocation2 + $0xa30] sm:$0xff] }
 0x674   :  { %5101 = vmatprep.subr.bf16.mxu1 %v3985_v43  ;;  %5757 = vmatprep.subr.bf16.mxu0 %v4497_v42  ;;  %v4518_v43 = vld [vmem:[#allocation2 + $0x1a30] sm:$0xff]  ;;  %v4521_v42 = vld [vmem:[#allocation2 + $0x1a48] sm:$0xff] }
 0x677   :  { %5102 = vmatpush1.bf16.msra.mxu1 %v3984_v9  ;;  %5758 = vmatpush1.bf16.msra.mxu0 %v4496_v38  ;;  %v4520_v9 = vld [vmem:[#allocation2 + $0x1a40] sm:$0xff]  ;;  %v4011_v38 = vld [vmem:[#allocation2 + $0xa58] sm:$0xff] }
 0x678   :  { %5103 = vmatprep.subr.bf16.mxu1 %v3987_v31  ;;  %5759 = vmatprep.subr.bf16.mxu0 %v4499_v16  ;;  %v4523_v31 = vld [vmem:[#allocation2 + $0x1a58] sm:$0xff]  ;;  %v4010_v16 = vld [vmem:[#allocation2 + $0xa50] sm:$0xff] }
 0x67b   :  { %5104 = vmatpush1.bf16.msra.mxu1 %v3986_v58  ;;  %5760 = vmatpush1.bf16.msra.mxu0 %v4498_v50  ;;  %v4522_v58 = vld [vmem:[#allocation2 + $0x1a50] sm:$0xff]  ;;  %v4013_v50 = vld [vmem:[#allocation2 + $0xa68] sm:$0xff] }
 0x67c   :  { %5105 = vmatprep.subr.bf16.mxu1 %v3989_v22  ;;  %5761 = vmatprep.subr.bf16.mxu0 %v4501_v40  ;;  %v4525_v22 = vld [vmem:[#allocation2 + $0x1a68] sm:$0xff]  ;;  %v4012_v40 = vld [vmem:[#allocation2 + $0xa60] sm:$0xff] }
 0x67f   :  { %5106 = vmatpush1.bf16.msra.mxu1 %v3988_v7  ;;  %5762 = vmatpush1.bf16.msra.mxu0 %v4500_v13  ;;  %v4524_v7 = vld [vmem:[#allocation2 + $0x1a60] sm:$0xff]  ;;  %v4015_v13 = vld [vmem:[#allocation2 + $0xa78] sm:$0xff] }
 0x680   :  { %5107 = vmatprep.subr.bf16.mxu1 %v3991_v35  ;;  %5763 = vmatprep.subr.bf16.mxu0 %v4503_v57  ;;  %v4527_v35 = vld [vmem:[#allocation2 + $0x1a78] sm:$0xff]  ;;  %v4014_v57 = vld [vmem:[#allocation2 + $0xa70] sm:$0xff] }
 0x683   :  { %5108 = vmatpush1.bf16.msra.mxu1 %v3990_v8  ;;  %5764 = vmatpush1.bf16.msra.mxu0 %v4502_v2  ;;  %v4526_v8 = vld [vmem:[#allocation2 + $0x1a70] sm:$0xff]  ;;  %v4017_v2 = vld [vmem:[#allocation2 + $0xa88] sm:$0xff] }
 0x684   :  { %5109 = vmatprep.subr.bf16.mxu1 %v3993_v33  ;;  %5765 = vmatprep.subr.bf16.mxu0 %v4505_v51  ;;  %v4529_v33 = vld [vmem:[#allocation2 + $0x1a88] sm:$0xff]  ;;  %v4016_v51 = vld [vmem:[#allocation2 + $0xa80] sm:$0xff] }
 0x687   :  { %5110 = vmatpush1.bf16.msra.mxu1 %v3992_v61  ;;  %5766 = vmatpush1.bf16.msra.mxu0 %v4504_v1  ;;  %v4528_v61 = vld [vmem:[#allocation2 + $0x1a80] sm:$0xff]  ;;  %v4019_v1 = vld [vmem:[#allocation2 + $0xa98] sm:$0xff] }
 0x688   :  { %5111 = vmatprep.subr.bf16.mxu1 %v3995_v28  ;;  %5767 = vmatprep.subr.bf16.mxu0 %v4507_v27  ;;  %v4531_v28 = vld [vmem:[#allocation2 + $0x1a98] sm:$0xff]  ;;  %v4018_v27 = vld [vmem:[#allocation2 + $0xa90] sm:$0xff] }
 0x68b   :  { %5112 = vmatpush1.bf16.msra.mxu1 %v3994_v4  ;;  %5768 = vmatpush1.bf16.msra.mxu0 %v4506_v62  ;;  %v4530_v4 = vld [vmem:[#allocation2 + $0x1a90] sm:$0xff]  ;;  %v4021_v62 = vld [vmem:[#allocation2 + $0xaa8] sm:$0xff] }
 0x68c   :  { %5113 = vmatprep.subr.bf16.mxu1 %v3997_v5  ;;  %5769 = vmatprep.subr.bf16.mxu0 %v4509_v10  ;;  %v4533_v5 = vld [vmem:[#allocation2 + $0x1aa8] sm:$0xff]  ;;  %v4020_v10 = vld [vmem:[#allocation2 + $0xaa0] sm:$0xff] }
 0x68f   :  { %5114 = vmatpush1.bf16.msra.mxu1 %v3996_v19  ;;  %5770 = vmatpush1.bf16.msra.mxu0 %v4508_v17  ;;  %v4532_v19 = vld [vmem:[#allocation2 + $0x1aa0] sm:$0xff]  ;;  %v4023_v17 = vld [vmem:[#allocation2 + $0xab8] sm:$0xff] }
 0x690   :  { %5115 = vmatprep.subr.bf16.mxu1 %v3999_v15  ;;  %5771 = vmatprep.subr.bf16.mxu0 %v4511_v24  ;;  %v4535_v15 = vld [vmem:[#allocation2 + $0x1ab8] sm:$0xff]  ;;  %v4022_v24 = vld [vmem:[#allocation2 + $0xab0] sm:$0xff] }
 0x693   :  { %5116 = vmatpush1.bf16.msra.mxu1 %v3998_v55  ;;  %5772 = vmatpush1.bf16.msra.mxu0 %v4510_v49  ;;  %v4534_v55 = vld [vmem:[#allocation2 + $0x1ab0] sm:$0xff]  ;;  %v4025_v49 = vld [vmem:[#allocation2 + $0xac8] sm:$0xff] }
 0x694   :  { %5126 = vmatprep.subr.bf16.mxu1 %v4001_v29  ;;  %5782 = vmatprep.subr.bf16.mxu0 %v4513_v45  ;;  %v4537_v29 = vld [vmem:[#allocation2 + $0x1ac8] sm:$0xff]  ;;  %v4024_v45 = vld [vmem:[#allocation2 + $0xac0] sm:$0xff] }
 0x696   :  { %5118 = vmatmul.mubr.bf16.vlgmr.msra.gmra.mrb[12].mxu1 %v8767_v0  ;;  %5774 = vmatmul.mubr.bf16.vlgmr.msra.gmra.mrb[20].mxu0 %v8768_v26  ;;  %v4538_v0 = vld [vmem:[#allocation2 + $0x1ad0] sm:$0xff]  ;;  %v4029_v26 = vld [vmem:[#allocation2 + $0xae8] sm:$0xff] }
 0x697   :  { %5127 = vmatpush1.bf16.msra.mxu1 %v4000_v30  ;;  %5783 = vmatpush1.bf16.msra.mxu0 %v4512_v32  ;;  %v4536_v30 = vld [vmem:[#allocation2 + $0x1ac0] sm:$0xff]  ;;  %v4027_v32 = vld [vmem:[#allocation2 + $0xad8] sm:$0xff] }
 0x698   :  { %5128 = vmatprep.subr.bf16.mxu1 %v4003_v59  ;;  %5784 = vmatprep.subr.bf16.mxu0 %v4515_v39  ;;  %v4539_v59 = vld [vmem:[#allocation2 + $0x1ad8] sm:$0xff]  ;;  %v4026_v39 = vld [vmem:[#allocation2 + $0xad0] sm:$0xff] }
 0x699   :  { %5158 = vmatprep.mubr.bf16.mxu1 %v8769_v3  ;;  %5814 = vmatprep.mubr.bf16.mxu0 %v8770_v52  ;;  %v4543_v3 = vld [vmem:[#allocation2 + $0x1af8] sm:$0xff]  ;;  %v4030_v52 = vld [vmem:[#allocation2 + $0xaf0] sm:$0xff] }
 0x69b   :  { %5129 = vmatpush1.bf16.msra.mxu1 %v4002_v47  ;;  %5785 = vmatpush1.bf16.msra.mxu0 %v4514_v48  ;;  %v4541_v47 = vld [vmem:[#allocation2 + $0x1ae8] sm:$0xff]  ;;  %v4028_v48 = vld [vmem:[#allocation2 + $0xae0] sm:$0xff] }
 0x69c   :  { %5130 = vmatprep.subr.bf16.mxu1 %v4005_v60  ;;  %5786 = vmatprep.subr.bf16.mxu0 %v4517_v37  ;;  %v4540_v60 = vld [vmem:[#allocation2 + $0x1ae0] sm:$0xff]  ;;  %v4031_v37 = vld [vmem:[#allocation2 + $0xaf8] sm:$0xff] }
 0x69f   :  { %5131 = vmatpush1.bf16.msra.mxu1 %v4004_v23  ;;  %5787 = vmatpush1.bf16.msra.mxu0 %v4516_v20  ;;  %v4542_v23 = vld [vmem:[#allocation2 + $0x1af0] sm:$0xff]  ;;  %v4033_v20 = vld [vmem:[#allocation2 + $0xb08] sm:$0xff] }
 0x6a0   :  { %5132 = vmatprep.subr.bf16.mxu1 %v4007_v63  ;;  %5788 = vmatprep.subr.bf16.mxu0 %v4519_v36  ;;  %v4545_v63 = vld [vmem:[#allocation2 + $0x1b08] sm:$0xff]  ;;  %v4032_v36 = vld [vmem:[#allocation2 + $0xb00] sm:$0xff] }
 0x6a3   :  { %5133 = vmatpush1.bf16.msra.mxu1 %v4006_v12  ;;  %5789 = vmatpush1.bf16.msra.mxu0 %v4518_v43  ;;  %v4544_v12 = vld [vmem:[#allocation2 + $0x1b00] sm:$0xff]  ;;  %v4035_v43 = vld [vmem:[#allocation2 + $0xb18] sm:$0xff] }
 0x6a4   :  { %5134 = vmatprep.subr.bf16.mxu1 %v4009_v56  ;;  %5790 = vmatprep.subr.bf16.mxu0 %v4521_v42  ;;  %v4547_v56 = vld [vmem:[#allocation2 + $0x1b18] sm:$0xff]  ;;  %v8771_v42 = vpack.c.bf16 %v8014_v46, %v8014_v46  ;;  %v8774_v46 = vpack.c.bf16 %v8317_v53, %v8317_v53  ;;  %v4040_v53 = vld [vmem:[#allocation2 + $0xb40] sm:$0xff] }
 0x6a7   :  { %5135 = vmatpush1.bf16.msra.mxu1 %v4008_v11  ;;  %5791 = vmatpush1.bf16.msra.mxu0 %v4520_v9  ;;  %v8772_v11 = vpack.c.bf16 %v8250_v14, %v8250_v14  ;;  %v4034_v9 = vld [vmem:[#allocation2 + $0xb10] sm:$0xff]  ;;  %v4036_v14 = vld [vmem:[#allocation2 + $0xb20] sm:$0xff] }
 0x6a8   :  { %5136 = vmatprep.subr.bf16.mxu1 %v4011_v38  ;;  %5792 = vmatprep.subr.bf16.mxu0 %v4523_v31  ;;  %v4546_v38 = vld [vmem:[#allocation2 + $0x1b10] sm:$0xff]  ;;  %v4037_v31 = vld [vmem:[#allocation2 + $0xb28] sm:$0xff] }
 0x6ab   :  { %5137 = vmatpush1.bf16.msra.mxu1 %v4010_v16  ;;  %5793 = vmatpush1.bf16.msra.mxu0 %v4522_v58  ;;  %v4549_v16 = vld [vmem:[#allocation2 + $0x1b28] sm:$0xff]  ;;  %v8773_v58 = vpack.c.bf16 %v8073_v25, %v8073_v25 }
 0x6ac   :  { %5138 = vmatprep.subr.bf16.mxu1 %v4013_v50  ;;  %5794 = vmatprep.subr.bf16.mxu0 %v4525_v22  ;;  %v4548_v50 = vld [vmem:[#allocation2 + $0x1b20] sm:$0xff]  ;;  %v4039_v22 = vld [vmem:[#allocation2 + $0xb38] sm:$0xff]  ;;  %v4041_v25 = vld [vmem:[#allocation2 + $0xb48] sm:$0xff] }
 0x6af   :  { %5139 = vmatpush1.bf16.msra.mxu1 %v4012_v40  ;;  %5795 = vmatpush1.bf16.msra.mxu0 %v4524_v7  ;;  %v4551_v40 = vld [vmem:[#allocation2 + $0x1b38] sm:$0xff]  ;;  %v4038_v7 = vld [vmem:[#allocation2 + $0xb30] sm:$0xff] }
 0x6b0   :  { %5140 = vmatprep.subr.bf16.mxu1 %v4015_v13  ;;  %5796 = vmatprep.subr.bf16.mxu0 %v4527_v35  ;;  %v4550_v13 = vld [vmem:[#allocation2 + $0x1b30] sm:$0xff]  ;;  %v4553_v35 = vld [vmem:[#allocation2 + $0x1b48] sm:$0xff] }
 0x6b3   :  { %5141 = vmatpush1.bf16.msra.mxu1 %v4014_v57  ;;  %5797 = vmatpush1.bf16.msra.mxu0 %v4526_v8  ;;  %v4552_v57 = vld [vmem:[#allocation2 + $0x1b40] sm:$0xff]  ;;  %v4043_v8 = vld [vmem:[#allocation2 + $0xb58] sm:$0xff] }
 0x6b4   :  { %5142 = vmatprep.subr.bf16.mxu1 %v4017_v2  ;;  %5798 = vmatprep.subr.bf16.mxu0 %v4529_v33  ;;  %v4555_v2 = vld [vmem:[#allocation2 + $0x1b58] sm:$0xff]  ;;  %v4042_v33 = vld [vmem:[#allocation2 + $0xb50] sm:$0xff] }
 0x6b7   :  { %5143 = vmatpush1.bf16.msra.mxu1 %v4016_v51  ;;  %5799 = vmatpush1.bf16.msra.mxu0 %v4528_v61  ;;  %v4554_v51 = vld [vmem:[#allocation2 + $0x1b50] sm:$0xff]  ;;  %v4045_v61 = vld [vmem:[#allocation2 + $0xb68] sm:$0xff] }
 0x6b8   :  { %5144 = vmatprep.subr.bf16.mxu1 %v4019_v1  ;;  %5800 = vmatprep.subr.bf16.mxu0 %v4531_v28  ;;  %v4557_v1 = vld [vmem:[#allocation2 + $0x1b68] sm:$0xff]  ;;  %v4044_v28 = vld [vmem:[#allocation2 + $0xb60] sm:$0xff] }
 0x6bb   :  { %5145 = vmatpush1.bf16.msra.mxu1 %v4018_v27  ;;  %5801 = vmatpush1.bf16.msra.mxu0 %v4530_v4  ;;  %v4556_v27 = vld [vmem:[#allocation2 + $0x1b60] sm:$0xff]  ;;  %v4047_v4 = vld [vmem:[#allocation2 + $0xb78] sm:$0xff] }
 0x6bc   :  { %5146 = vmatprep.subr.bf16.mxu1 %v4021_v62  ;;  %5802 = vmatprep.subr.bf16.mxu0 %v4533_v5  ;;  %v4559_v62 = vld [vmem:[#allocation2 + $0x1b78] sm:$0xff]  ;;  %v4046_v5 = vld [vmem:[#allocation2 + $0xb70] sm:$0xff] }
 0x6bf   :  { %5147 = vmatpush1.bf16.msra.mxu1 %v4020_v10  ;;  %5803 = vmatpush1.bf16.msra.mxu0 %v4532_v19  ;;  %v4558_v10 = vld [vmem:[#allocation2 + $0x1b70] sm:$0xff]  ;;  %v4049_v19 = vld [vmem:[#allocation2 + $0xb88] sm:$0xff] }
 0x6c0   :  { %5148 = vmatprep.subr.bf16.mxu1 %v4023_v17  ;;  %5804 = vmatprep.subr.bf16.mxu0 %v4535_v15  ;;  %v4561_v17 = vld [vmem:[#allocation2 + $0x1b88] sm:$0xff]  ;;  %v4048_v15 = vld [vmem:[#allocation2 + $0xb80] sm:$0xff] }
 0x6c3   :  { %5149 = vmatpush1.bf16.msra.mxu1 %v4022_v24  ;;  %5805 = vmatpush1.bf16.msra.mxu0 %v4534_v55  ;;  %v4560_v24 = vld [vmem:[#allocation2 + $0x1b80] sm:$0xff]  ;;  %v4051_v55 = vld [vmem:[#allocation2 + $0xb98] sm:$0xff] }
 0x6c4   :  { %5150 = vmatprep.subr.bf16.mxu1 %v4025_v49  ;;  %5806 = vmatprep.subr.bf16.mxu0 %v4537_v29  ;;  %v4563_v49 = vld [vmem:[#allocation2 + $0x1b98] sm:$0xff]  ;;  %v4050_v29 = vld [vmem:[#allocation2 + $0xb90] sm:$0xff] }
 0x6c7   :  { %5151 = vmatpush1.bf16.msra.mxu1 %v4024_v45  ;;  %5807 = vmatpush1.bf16.msra.mxu0 %v4536_v30  ;;  %v4562_v45 = vld [vmem:[#allocation2 + $0x1b90] sm:$0xff]  ;;  %v4053_v30 = vld [vmem:[#allocation2 + $0xba8] sm:$0xff] }
 0x6c8   :  { %5152 = vmatprep.subr.bf16.mxu1 %v4027_v32  ;;  %5808 = vmatprep.subr.bf16.mxu0 %v4539_v59  ;;  %v4565_v32 = vld [vmem:[#allocation2 + $0x1ba8] sm:$0xff]  ;;  %v4052_v59 = vld [vmem:[#allocation2 + $0xba0] sm:$0xff] }
 0x6cb   :  { %5153 = vmatpush1.bf16.msra.mxu1 %v4026_v39  ;;  %5809 = vmatpush1.bf16.msra.mxu0 %v4538_v0  ;;  %v4564_v39 = vld [vmem:[#allocation2 + $0x1ba0] sm:$0xff]  ;;  %v4055_v0 = vld [vmem:[#allocation2 + $0xbb8] sm:$0xff] }
 0x6cc   :  { %5154 = vmatprep.subr.bf16.mxu1 %v4029_v26  ;;  %5810 = vmatprep.subr.bf16.mxu0 %v4541_v47  ;;  %v4567_v26 = vld [vmem:[#allocation2 + $0x1bb8] sm:$0xff]  ;;  %v4054_v47 = vld [vmem:[#allocation2 + $0xbb0] sm:$0xff] }
 0x6cf   :  { %5155 = vmatpush1.bf16.msra.mxu1 %v4028_v48  ;;  %5811 = vmatpush1.bf16.msra.mxu0 %v4540_v60  ;;  %v4566_v48 = vld [vmem:[#allocation2 + $0x1bb0] sm:$0xff]  ;;  %v4057_v60 = vld [vmem:[#allocation2 + $0xbc8] sm:$0xff] }
 0x6d0   :  { %5156 = vmatprep.subr.bf16.mxu1 %v4031_v37  ;;  %5812 = vmatprep.subr.bf16.mxu0 %v4543_v3  ;;  %v4569_v37 = vld [vmem:[#allocation2 + $0x1bc8] sm:$0xff]  ;;  %v4056_v3 = vld [vmem:[#allocation2 + $0xbc0] sm:$0xff] }
 0x6d3   :  { %5157 = vmatpush1.bf16.msra.mxu1 %v4030_v52  ;;  %5813 = vmatpush1.bf16.msra.mxu0 %v4542_v23  ;;  %v4568_v52 = vld [vmem:[#allocation2 + $0x1bc0] sm:$0xff]  ;;  %v4059_v23 = vld [vmem:[#allocation2 + $0xbd8] sm:$0xff] }
 0x6d4   :  { %5167 = vmatprep.subr.bf16.mxu1 %v4033_v20  ;;  %5823 = vmatprep.subr.bf16.mxu0 %v4545_v63  ;;  %v4571_v20 = vld [vmem:[#allocation2 + $0x1bd8] sm:$0xff]  ;;  %v4058_v63 = vld [vmem:[#allocation2 + $0xbd0] sm:$0xff] }
 0x6d6   :  { %5159 = vmatmul.mubr.bf16.vlgmr.msra.gmra.mrb[12].mxu1 %v8771_v42  ;;  %5815 = vmatmul.mubr.bf16.vlgmr.msra.gmra.mrb[20].mxu0 %v8772_v11  ;;  %v4572_v42 = vld [vmem:[#allocation2 + $0x1be0] sm:$0xff]  ;;  %v4063_v11 = vld [vmem:[#allocation2 + $0xbf8] sm:$0xff] }
 0x6d7   :  { %5168 = vmatpush1.bf16.msra.mxu1 %v4032_v36  ;;  %5824 = vmatpush1.bf16.msra.mxu0 %v4544_v12  ;;  %v4570_v36 = vld [vmem:[#allocation2 + $0x1bd0] sm:$0xff]  ;;  %v4061_v12 = vld [vmem:[#allocation2 + $0xbe8] sm:$0xff] }
 0x6d8   :  { %5169 = vmatprep.subr.bf16.mxu1 %v4035_v43  ;;  %5825 = vmatprep.subr.bf16.mxu0 %v4547_v56  ;;  %v4573_v43 = vld [vmem:[#allocation2 + $0x1be8] sm:$0xff]  ;;  %v4060_v56 = vld [vmem:[#allocation2 + $0xbe0] sm:$0xff] }
 0x6d9   :  { %5199 = vmatprep.mubr.bf16.mxu1 %v8773_v58  ;;  %5855 = vmatprep.mubr.bf16.mxu0 %v8774_v46  ;;  %v4577_v58 = vld [vmem:[#allocation2 + $0x1c08] sm:$0xff]  ;;  %v4064_v46 = vld [vmem:[#allocation2 + $0xc00] sm:$0xff] }
 0x6db   :  { %5170 = vmatpush1.bf16.msra.mxu1 %v4034_v9  ;;  %5826 = vmatpush1.bf16.msra.mxu0 %v4546_v38  ;;  %v4575_v9 = vld [vmem:[#allocation2 + $0x1bf8] sm:$0xff]  ;;  %v4062_v38 = vld [vmem:[#allocation2 + $0xbf0] sm:$0xff] }
 0x6dc   :  { %5171 = vmatprep.subr.bf16.mxu1 %v4037_v31  ;;  %5827 = vmatprep.subr.bf16.mxu0 %v4549_v16  ;;  %v4574_v31 = vld [vmem:[#allocation2 + $0x1bf0] sm:$0xff]  ;;  %v4065_v16 = vld [vmem:[#allocation2 + $0xc08] sm:$0xff] }
 0x6df   :  { %5172 = vmatpush1.bf16.msra.mxu1 %v4036_v14  ;;  %5828 = vmatpush1.bf16.msra.mxu0 %v4548_v50  ;;  %v4576_v14 = vld [vmem:[#allocation2 + $0x1c00] sm:$0xff]  ;;  %v4067_v50 = vld [vmem:[#allocation2 + $0xc18] sm:$0xff] }
 0x6e0   :  { %5173 = vmatprep.subr.bf16.mxu1 %v4039_v22  ;;  %5829 = vmatprep.subr.bf16.mxu0 %v4551_v40  ;;  %v4579_v22 = vld [vmem:[#allocation2 + $0x1c18] sm:$0xff]  ;;  %v8775_v40 = vpack.c.bf16 %v8019_v6, %v8019_v6  ;;  %v8778_v6 = vpack.c.bf16 %v8322_v34, %v8322_v34  ;;  %v4072_v34 = vld [vmem:[#allocation2 + $0xc40] sm:$0xff] }
 0x6e3   :  { %5174 = vmatpush1.bf16.msra.mxu1 %v4038_v7  ;;  %5830 = vmatpush1.bf16.msra.mxu0 %v4550_v13  ;;  %v8776_v7 = vpack.c.bf16 %v8255_v54, %v8255_v54  ;;  %v4066_v13 = vld [vmem:[#allocation2 + $0xc10] sm:$0xff]  ;;  %v4068_v54 = vld [vmem:[#allocation2 + $0xc20] sm:$0xff] }
 0x6e4   :  { %5175 = vmatprep.subr.bf16.mxu1 %v4041_v25  ;;  %5831 = vmatprep.subr.bf16.mxu0 %v4553_v35  ;;  %v4578_v25 = vld [vmem:[#allocation2 + $0x1c10] sm:$0xff]  ;;  %v4069_v35 = vld [vmem:[#allocation2 + $0xc28] sm:$0xff] }
 0x6e7   :  { %5176 = vmatpush1.bf16.msra.mxu1 %v4040_v53  ;;  %5832 = vmatpush1.bf16.msra.mxu0 %v4552_v57  ;;  %v4581_v53 = vld [vmem:[#allocation2 + $0x1c28] sm:$0xff]  ;;  %v8777_v57 = vpack.c.bf16 %v8078_v18, %v8078_v18 }
 0x6e8   :  { %5177 = vmatprep.subr.bf16.mxu1 %v4043_v8  ;;  %5833 = vmatprep.subr.bf16.mxu0 %v4555_v2  ;;  %v4580_v8 = vld [vmem:[#allocation2 + $0x1c20] sm:$0xff]  ;;  %v4071_v2 = vld [vmem:[#allocation2 + $0xc38] sm:$0xff]  ;;  %v4073_v18 = vld [vmem:[#allocation2 + $0xc48] sm:$0xff] }
 0x6eb   :  { %5178 = vmatpush1.bf16.msra.mxu1 %v4042_v33  ;;  %5834 = vmatpush1.bf16.msra.mxu0 %v4554_v51  ;;  %v4583_v33 = vld [vmem:[#allocation2 + $0x1c38] sm:$0xff]  ;;  %v4070_v51 = vld [vmem:[#allocation2 + $0xc30] sm:$0xff] }
 0x6ec   :  { %5179 = vmatprep.subr.bf16.mxu1 %v4045_v61  ;;  %5835 = vmatprep.subr.bf16.mxu0 %v4557_v1  ;;  %v4582_v61 = vld [vmem:[#allocation2 + $0x1c30] sm:$0xff]  ;;  %v4585_v1 = vld [vmem:[#allocation2 + $0x1c48] sm:$0xff] }
 0x6ef   :  { %5180 = vmatpush1.bf16.msra.mxu1 %v4044_v28  ;;  %5836 = vmatpush1.bf16.msra.mxu0 %v4556_v27  ;;  %v4584_v28 = vld [vmem:[#allocation2 + $0x1c40] sm:$0xff]  ;;  %v4075_v27 = vld [vmem:[#allocation2 + $0xc58] sm:$0xff] }
 0x6f0   :  { %5181 = vmatprep.subr.bf16.mxu1 %v4047_v4  ;;  %5837 = vmatprep.subr.bf16.mxu0 %v4559_v62  ;;  %v4587_v4 = vld [vmem:[#allocation2 + $0x1c58] sm:$0xff]  ;;  %v4074_v62 = vld [vmem:[#allocation2 + $0xc50] sm:$0xff] }
 0x6f3   :  { %5182 = vmatpush1.bf16.msra.mxu1 %v4046_v5  ;;  %5838 = vmatpush1.bf16.msra.mxu0 %v4558_v10  ;;  %v4586_v5 = vld [vmem:[#allocation2 + $0x1c50] sm:$0xff]  ;;  %v4077_v10 = vld [vmem:[#allocation2 + $0xc68] sm:$0xff] }
 0x6f4   :  { %5183 = vmatprep.subr.bf16.mxu1 %v4049_v19  ;;  %5839 = vmatprep.subr.bf16.mxu0 %v4561_v17  ;;  %v4589_v19 = vld [vmem:[#allocation2 + $0x1c68] sm:$0xff]  ;;  %v4076_v17 = vld [vmem:[#allocation2 + $0xc60] sm:$0xff] }
 0x6f7   :  { %5184 = vmatpush1.bf16.msra.mxu1 %v4048_v15  ;;  %5840 = vmatpush1.bf16.msra.mxu0 %v4560_v24  ;;  %v4588_v15 = vld [vmem:[#allocation2 + $0x1c60] sm:$0xff]  ;;  %v4079_v24 = vld [vmem:[#allocation2 + $0xc78] sm:$0xff] }
 0x6f8   :  { %5185 = vmatprep.subr.bf16.mxu1 %v4051_v55  ;;  %5841 = vmatprep.subr.bf16.mxu0 %v4563_v49  ;;  %v4591_v55 = vld [vmem:[#allocation2 + $0x1c78] sm:$0xff]  ;;  %v4078_v49 = vld [vmem:[#allocation2 + $0xc70] sm:$0xff] }
 0x6fb   :  { %5186 = vmatpush1.bf16.msra.mxu1 %v4050_v29  ;;  %5842 = vmatpush1.bf16.msra.mxu0 %v4562_v45  ;;  %v4590_v29 = vld [vmem:[#allocation2 + $0x1c70] sm:$0xff]  ;;  %v4081_v45 = vld [vmem:[#allocation2 + $0xc88] sm:$0xff] }
 0x6fc   :  { %5187 = vmatprep.subr.bf16.mxu1 %v4053_v30  ;;  %5843 = vmatprep.subr.bf16.mxu0 %v4565_v32  ;;  %v4593_v30 = vld [vmem:[#allocation2 + $0x1c88] sm:$0xff]  ;;  %v4080_v32 = vld [vmem:[#allocation2 + $0xc80] sm:$0xff] }
 0x6ff   :  { %5188 = vmatpush1.bf16.msra.mxu1 %v4052_v59  ;;  %5844 = vmatpush1.bf16.msra.mxu0 %v4564_v39  ;;  %v4592_v59 = vld [vmem:[#allocation2 + $0x1c80] sm:$0xff]  ;;  %v4083_v39 = vld [vmem:[#allocation2 + $0xc98] sm:$0xff] }
 0x700   :  { %5189 = vmatprep.subr.bf16.mxu1 %v4055_v0  ;;  %5845 = vmatprep.subr.bf16.mxu0 %v4567_v26  ;;  %v4595_v0 = vld [vmem:[#allocation2 + $0x1c98] sm:$0xff]  ;;  %v4082_v26 = vld [vmem:[#allocation2 + $0xc90] sm:$0xff] }
 0x703   :  { %5190 = vmatpush1.bf16.msra.mxu1 %v4054_v47  ;;  %5846 = vmatpush1.bf16.msra.mxu0 %v4566_v48  ;;  %v4594_v47 = vld [vmem:[#allocation2 + $0x1c90] sm:$0xff]  ;;  %v4085_v48 = vld [vmem:[#allocation2 + $0xca8] sm:$0xff] }
 0x704   :  { %5191 = vmatprep.subr.bf16.mxu1 %v4057_v60  ;;  %5847 = vmatprep.subr.bf16.mxu0 %v4569_v37  ;;  %v4597_v60 = vld [vmem:[#allocation2 + $0x1ca8] sm:$0xff]  ;;  %v4084_v37 = vld [vmem:[#allocation2 + $0xca0] sm:$0xff] }
 0x707   :  { %5192 = vmatpush1.bf16.msra.mxu1 %v4056_v3  ;;  %5848 = vmatpush1.bf16.msra.mxu0 %v4568_v52  ;;  %v4596_v3 = vld [vmem:[#allocation2 + $0x1ca0] sm:$0xff]  ;;  %v4087_v52 = vld [vmem:[#allocation2 + $0xcb8] sm:$0xff] }
 0x708   :  { %5193 = vmatprep.subr.bf16.mxu1 %v4059_v23  ;;  %5849 = vmatprep.subr.bf16.mxu0 %v4571_v20  ;;  %v4599_v23 = vld [vmem:[#allocation2 + $0x1cb8] sm:$0xff]  ;;  %v4086_v20 = vld [vmem:[#allocation2 + $0xcb0] sm:$0xff] }
 0x70b   :  { %5194 = vmatpush1.bf16.msra.mxu1 %v4058_v63  ;;  %5850 = vmatpush1.bf16.msra.mxu0 %v4570_v36  ;;  %v4598_v63 = vld [vmem:[#allocation2 + $0x1cb0] sm:$0xff]  ;;  %v4089_v36 = vld [vmem:[#allocation2 + $0xcc8] sm:$0xff] }
 0x70c   :  { %5195 = vmatprep.subr.bf16.mxu1 %v4061_v12  ;;  %5851 = vmatprep.subr.bf16.mxu0 %v4573_v43  ;;  %v4601_v12 = vld [vmem:[#allocation2 + $0x1cc8] sm:$0xff]  ;;  %v4088_v43 = vld [vmem:[#allocation2 + $0xcc0] sm:$0xff] }
 0x70f   :  { %5196 = vmatpush1.bf16.msra.mxu1 %v4060_v56  ;;  %5852 = vmatpush1.bf16.msra.mxu0 %v4572_v42  ;;  %v4600_v56 = vld [vmem:[#allocation2 + $0x1cc0] sm:$0xff]  ;;  %v4091_v42 = vld [vmem:[#allocation2 + $0xcd8] sm:$0xff] }
 0x710   :  { %5197 = vmatprep.subr.bf16.mxu1 %v4063_v11  ;;  %5853 = vmatprep.subr.bf16.mxu0 %v4575_v9  ;;  %v4603_v11 = vld [vmem:[#allocation2 + $0x1cd8] sm:$0xff]  ;;  %v4090_v9 = vld [vmem:[#allocation2 + $0xcd0] sm:$0xff] }
 0x713   :  { %5198 = vmatpush1.bf16.msra.mxu1 %v4062_v38  ;;  %5854 = vmatpush1.bf16.msra.mxu0 %v4574_v31  ;;  %v4602_v38 = vld [vmem:[#allocation2 + $0x1cd0] sm:$0xff]  ;;  %v4093_v31 = vld [vmem:[#allocation2 + $0xce8] sm:$0xff] }
 0x714   :  { %5208 = vmatprep.subr.bf16.mxu1 %v4065_v16  ;;  %5864 = vmatprep.subr.bf16.mxu0 %v4577_v58  ;;  %v4605_v16 = vld [vmem:[#allocation2 + $0x1ce8] sm:$0xff]  ;;  %v4092_v58 = vld [vmem:[#allocation2 + $0xce0] sm:$0xff] }
 0x716   :  { %5200 = vmatmul.mubr.bf16.vlgmr.msra.gmra.mrb[12].mxu1 %v8775_v40  ;;  %5856 = vmatmul.mubr.bf16.vlgmr.msra.gmra.mrb[20].mxu0 %v8776_v7  ;;  %v4606_v40 = vld [vmem:[#allocation2 + $0x1cf0] sm:$0xff]  ;;  %v4097_v7 = vld [vmem:[#allocation2 + $0xd08] sm:$0xff] }
 0x717   :  { %5209 = vmatpush1.bf16.msra.mxu1 %v4064_v46  ;;  %5865 = vmatpush1.bf16.msra.mxu0 %v4576_v14  ;;  %v4604_v46 = vld [vmem:[#allocation2 + $0x1ce0] sm:$0xff]  ;;  %v4095_v14 = vld [vmem:[#allocation2 + $0xcf8] sm:$0xff] }
 0x718   :  { %5210 = vmatprep.subr.bf16.mxu1 %v4067_v50  ;;  %5866 = vmatprep.subr.bf16.mxu0 %v4579_v22  ;;  %v4607_v50 = vld [vmem:[#allocation2 + $0x1cf8] sm:$0xff]  ;;  %v4094_v22 = vld [vmem:[#allocation2 + $0xcf0] sm:$0xff] }
 0x719   :  { %5240 = vmatprep.mubr.bf16.mxu1 %v8777_v57  ;;  %5896 = vmatprep.mubr.bf16.mxu0 %v8778_v6  ;;  %v4611_v57 = vld [vmem:[#allocation2 + $0x1d18] sm:$0xff] }
 0x71a   :  { %v8779_v6 = vld [vmem:[#allocation19_spill] sm:$0xff] }
 0x71b   :  { %5211 = vmatpush1.bf16.msra.mxu1 %v4066_v13  ;;  %5867 = vmatpush1.bf16.msra.mxu0 %v4578_v25  ;;  %v4609_v13 = vld [vmem:[#allocation2 + $0x1d08] sm:$0xff]  ;;  %v4096_v25 = vld [vmem:[#allocation2 + $0xd00] sm:$0xff] }
 0x71c   :  { %5212 = vmatprep.subr.bf16.mxu1 %v4069_v35  ;;  %5868 = vmatprep.subr.bf16.mxu0 %v4581_v53  ;;  %v4608_v35 = vld [vmem:[#allocation2 + $0x1d00] sm:$0xff]  ;;  %v4099_v53 = vld [vmem:[#allocation2 + $0xd18] sm:$0xff] }
 0x71f   :  { %5213 = vmatpush1.bf16.msra.mxu1 %v4068_v54  ;;  %5869 = vmatpush1.bf16.msra.mxu0 %v4580_v8  ;;  %v8780_v54 = vpack.c.bf16 %v8779_v6, %v8779_v6  ;;  %v8781_v8 = vld [vmem:[#allocation26_spill] sm:$0xff]  ;;  %v4639_v6 = vld [vmem:[#allocation2 + $0x1df8] sm:$0xff] }
 0x720   :  { %5214 = vmatprep.subr.bf16.mxu1 %v4071_v2  ;;  %5870 = vmatprep.subr.bf16.mxu0 %v4583_v33  ;;  %v8782_v2 = vpack.c.bf16 %v8781_v8, %v8781_v8  ;;  %v4098_v33 = vld [vmem:[#allocation2 + $0xd10] sm:$0xff] }
 0x721   :  { %v4638_v8 = vld [vmem:[#allocation2 + $0x1df0] sm:$0xff] }
 0x723   :  { %5215 = vmatpush1.bf16.msra.mxu1 %v4070_v51  ;;  %5871 = vmatpush1.bf16.msra.mxu0 %v4582_v61  ;;  %v4610_v51 = vld [vmem:[#allocation2 + $0x1d10] sm:$0xff]  ;;  %v4101_v61 = vld [vmem:[#allocation2 + $0xd28] sm:$0xff] }
 0x724   :  { %5216 = vmatprep.subr.bf16.mxu1 %v4073_v18  ;;  %5872 = vmatprep.subr.bf16.mxu0 %v4585_v1  ;;  %v4613_v18 = vld [vmem:[#allocation2 + $0x1d28] sm:$0xff]  ;;  %v8783_v1 = vld [vmem:[#allocation23_spill] sm:$0xff] }
 0x727   :  { %5217 = vmatpush1.bf16.msra.mxu1 %v4072_v34  ;;  %5873 = vmatpush1.bf16.msra.mxu0 %v4584_v28  ;;  %v8784_v34 = vpack.c.bf16 %v8783_v1, %v8783_v1  ;;  %v8785_v28 = vpack.c.bf16 %v8327_v21, %v8327_v21  ;;  %v4104_v21 = vld [vmem:[#allocation2 + $0xd40] sm:$0xff]  ;;  %v4643_v1 = vld [vmem:[#allocation2 + $0x1e18] sm:$0xff] }
 0x728   :  { %5218 = vmatprep.subr.bf16.mxu1 %v4075_v27  ;;  %5874 = vmatprep.subr.bf16.mxu0 %v4587_v4  ;;  %v4100_v27 = vld [vmem:[#allocation2 + $0xd20] sm:$0xff] }
 0x729   :  { %v4612_v4 = vld [vmem:[#allocation2 + $0x1d20] sm:$0xff] }
 0x72b   :  { %5219 = vmatpush1.bf16.msra.mxu1 %v4074_v62  ;;  %5875 = vmatpush1.bf16.msra.mxu0 %v4586_v5  ;;  %v4103_v62 = vld [vmem:[#allocation2 + $0xd38] sm:$0xff] }
 0x72c   :  { %5220 = vmatprep.subr.bf16.mxu1 %v4077_v10  ;;  %5876 = vmatprep.subr.bf16.mxu0 %v4589_v19  ;;  %v4615_v5 = vld [vmem:[#allocation2 + $0x1d38] sm:$0xff]  ;;  %v4102_v10 = vld [vmem:[#allocation2 + $0xd30] sm:$0xff] }
 0x72d   :  { %v4614_v19 = vld [vmem:[#allocation2 + $0x1d30] sm:$0xff] }
 0x72f   :  { %5221 = vmatpush1.bf16.msra.mxu1 %v4076_v17  ;;  %5877 = vmatpush1.bf16.msra.mxu0 %v4588_v15  ;;  %v4105_v17 = vld [vmem:[#allocation2 + $0xd48] sm:$0xff] }
 0x730   :  { %5222 = vmatprep.subr.bf16.mxu1 %v4079_v24  ;;  %5878 = vmatprep.subr.bf16.mxu0 %v4591_v55  ;;  %v4617_v15 = vld [vmem:[#allocation2 + $0x1d48] sm:$0xff]  ;;  %v4616_v24 = vld [vmem:[#allocation2 + $0x1d40] sm:$0xff]  ;;  %v4107_v55 = vld [vmem:[#allocation2 + $0xd58] sm:$0xff] }
 0x733   :  { %5223 = vmatpush1.bf16.msra.mxu1 %v4078_v49  ;;  %5879 = vmatpush1.bf16.msra.mxu0 %v4590_v29  ;;  %v4619_v49 = vld [vmem:[#allocation2 + $0x1d58] sm:$0xff]  ;;  %v4106_v29 = vld [vmem:[#allocation2 + $0xd50] sm:$0xff] }
 0x734   :  { %5224 = vmatprep.subr.bf16.mxu1 %v4081_v45  ;;  %5880 = vmatprep.subr.bf16.mxu0 %v4593_v30  ;;  %v4618_v45 = vld [vmem:[#allocation2 + $0x1d50] sm:$0xff]  ;;  %v4109_v30 = vld [vmem:[#allocation2 + $0xd68] sm:$0xff] }
 0x737   :  { %5225 = vmatpush1.bf16.msra.mxu1 %v4080_v32  ;;  %5881 = vmatpush1.bf16.msra.mxu0 %v4592_v59  ;;  %v4621_v32 = vld [vmem:[#allocation2 + $0x1d68] sm:$0xff]  ;;  %v4108_v59 = vld [vmem:[#allocation2 + $0xd60] sm:$0xff] }
 0x738   :  { %5226 = vmatprep.subr.bf16.mxu1 %v4083_v39  ;;  %5882 = vmatprep.subr.bf16.mxu0 %v4595_v0  ;;  %v4620_v39 = vld [vmem:[#allocation2 + $0x1d60] sm:$0xff]  ;;  %v4111_v0 = vld [vmem:[#allocation2 + $0xd78] sm:$0xff] }
 0x73b   :  { %5227 = vmatpush1.bf16.msra.mxu1 %v4082_v26  ;;  %5883 = vmatpush1.bf16.msra.mxu0 %v4594_v47  ;;  %v4623_v26 = vld [vmem:[#allocation2 + $0x1d78] sm:$0xff]  ;;  %v4110_v47 = vld [vmem:[#allocation2 + $0xd70] sm:$0xff] }
 0x73c   :  { %5228 = vmatprep.subr.bf16.mxu1 %v4085_v48  ;;  %5884 = vmatprep.subr.bf16.mxu0 %v4597_v60  ;;  %v4622_v48 = vld [vmem:[#allocation2 + $0x1d70] sm:$0xff]  ;;  %v4113_v60 = vld [vmem:[#allocation2 + $0xd88] sm:$0xff] }
 0x73f   :  { %5229 = vmatpush1.bf16.msra.mxu1 %v4084_v37  ;;  %5885 = vmatpush1.bf16.msra.mxu0 %v4596_v3  ;;  %v4625_v37 = vld [vmem:[#allocation2 + $0x1d88] sm:$0xff]  ;;  %v4112_v3 = vld [vmem:[#allocation2 + $0xd80] sm:$0xff] }
 0x740   :  { %5230 = vmatprep.subr.bf16.mxu1 %v4087_v52  ;;  %5886 = vmatprep.subr.bf16.mxu0 %v4599_v23  ;;  %v4624_v52 = vld [vmem:[#allocation2 + $0x1d80] sm:$0xff]  ;;  %v4115_v23 = vld [vmem:[#allocation2 + $0xd98] sm:$0xff] }
 0x743   :  { %5231 = vmatpush1.bf16.msra.mxu1 %v4086_v20  ;;  %5887 = vmatpush1.bf16.msra.mxu0 %v4598_v63  ;;  %v4627_v20 = vld [vmem:[#allocation2 + $0x1d98] sm:$0xff]  ;;  %v4114_v63 = vld [vmem:[#allocation2 + $0xd90] sm:$0xff] }
 0x744   :  { %5232 = vmatprep.subr.bf16.mxu1 %v4089_v36  ;;  %5888 = vmatprep.subr.bf16.mxu0 %v4601_v12  ;;  %v4626_v36 = vld [vmem:[#allocation2 + $0x1d90] sm:$0xff]  ;;  %v4117_v12 = vld [vmem:[#allocation2 + $0xda8] sm:$0xff] }
 0x747   :  { %5233 = vmatpush1.bf16.msra.mxu1 %v4088_v43  ;;  %5889 = vmatpush1.bf16.msra.mxu0 %v4600_v56  ;;  %v4629_v43 = vld [vmem:[#allocation2 + $0x1da8] sm:$0xff]  ;;  %v4116_v56 = vld [vmem:[#allocation2 + $0xda0] sm:$0xff] }
 0x748   :  { %5234 = vmatprep.subr.bf16.mxu1 %v4091_v42  ;;  %5890 = vmatprep.subr.bf16.mxu0 %v4603_v11  ;;  %v4628_v42 = vld [vmem:[#allocation2 + $0x1da0] sm:$0xff]  ;;  %v4119_v11 = vld [vmem:[#allocation2 + $0xdb8] sm:$0xff] }
 0x74b   :  { %5235 = vmatpush1.bf16.msra.mxu1 %v4090_v9  ;;  %5891 = vmatpush1.bf16.msra.mxu0 %v4602_v38  ;;  %v4631_v9 = vld [vmem:[#allocation2 + $0x1db8] sm:$0xff]  ;;  %v4118_v38 = vld [vmem:[#allocation2 + $0xdb0] sm:$0xff] }
 0x74c   :  { %5236 = vmatprep.subr.bf16.mxu1 %v4093_v31  ;;  %5892 = vmatprep.subr.bf16.mxu0 %v4605_v16  ;;  %v4630_v31 = vld [vmem:[#allocation2 + $0x1db0] sm:$0xff]  ;;  %v4121_v16 = vld [vmem:[#allocation2 + $0xdc8] sm:$0xff] }
 0x74f   :  { %5237 = vmatpush1.bf16.msra.mxu1 %v4092_v58  ;;  %5893 = vmatpush1.bf16.msra.mxu0 %v4604_v46  ;;  %v4633_v58 = vld [vmem:[#allocation2 + $0x1dc8] sm:$0xff]  ;;  %v4120_v46 = vld [vmem:[#allocation2 + $0xdc0] sm:$0xff] }
 0x750   :  { %5238 = vmatprep.subr.bf16.mxu1 %v4095_v14  ;;  %5894 = vmatprep.subr.bf16.mxu0 %v4607_v50  ;;  %v4632_v14 = vld [vmem:[#allocation2 + $0x1dc0] sm:$0xff]  ;;  %v4123_v50 = vld [vmem:[#allocation2 + $0xdd8] sm:$0xff] }
 0x753   :  { %5239 = vmatpush1.bf16.msra.mxu1 %v4094_v22  ;;  %5895 = vmatpush1.bf16.msra.mxu0 %v4606_v40  ;;  %v4635_v22 = vld [vmem:[#allocation2 + $0x1dd8] sm:$0xff]  ;;  %v4122_v40 = vld [vmem:[#allocation2 + $0xdd0] sm:$0xff] }
 0x754   :  { %5249 = vmatprep.subr.bf16.mxu1 %v4097_v7  ;;  %5905 = vmatprep.subr.bf16.mxu0 %v4609_v13  ;;  %v4634_v7 = vld [vmem:[#allocation2 + $0x1dd0] sm:$0xff]  ;;  %v4125_v13 = vld [vmem:[#allocation2 + $0xde8] sm:$0xff] }
 0x756   :  { %5241 = vmatmul.mubr.bf16.vlgmr.msra.gmra.mrb[12].mxu1 %v8780_v54  ;;  %5897 = vmatmul.mubr.bf16.vlgmr.msra.gmra.mrb[20].mxu0 %v8782_v2  ;;  %v4126_v54 = vld [vmem:[#allocation2 + $0xdf0] sm:$0xff]  ;;  %v4129_v2 = vld [vmem:[#allocation2 + $0xe08] sm:$0xff] }
 0x757   :  { %5250 = vmatpush1.bf16.msra.mxu1 %v4096_v25  ;;  %5906 = vmatpush1.bf16.msra.mxu0 %v4608_v35  ;;  %v4637_v25 = vld [vmem:[#allocation2 + $0x1de8] sm:$0xff]  ;;  %v4124_v35 = vld [vmem:[#allocation2 + $0xde0] sm:$0xff] }
 0x758   :  { %5251 = vmatprep.subr.bf16.mxu1 %v4099_v53  ;;  %5907 = vmatprep.subr.bf16.mxu0 %v4611_v57  ;;  %v4636_v53 = vld [vmem:[#allocation2 + $0x1de0] sm:$0xff]  ;;  %v4127_v57 = vld [vmem:[#allocation2 + $0xdf8] sm:$0xff] }
 0x759   :  { %5281 = vmatprep.mubr.bf16.mxu1 %v8784_v34  ;;  %5937 = vmatprep.mubr.bf16.mxu0 %v8785_v28  ;;  %v8786_v34 = vld [vmem:[#allocation20_spill] sm:$0xff] }
 0x75a   :  { %v8787_v28 = vpack.c.bf16 %v8786_v34, %v8786_v34  ;;  %v4158_v34 = vld [vmem:[#allocation2 + $0xef0] sm:$0xff] }
 0x75b   :  { %5252 = vmatpush1.bf16.msra.mxu1 %v4098_v33  ;;  %5908 = vmatpush1.bf16.msra.mxu0 %v4610_v51  ;;  %v4641_v33 = vld [vmem:[#allocation2 + $0x1e08] sm:$0xff]  ;;  %v4128_v51 = vld [vmem:[#allocation2 + $0xe00] sm:$0xff] }
 0x75c   :  { %5253 = vmatprep.subr.bf16.mxu1 %v4101_v61  ;;  %5909 = vmatprep.subr.bf16.mxu0 %v4613_v18  ;;  %v4640_v61 = vld [vmem:[#allocation2 + $0x1e00] sm:$0xff]  ;;  %v4131_v18 = vld [vmem:[#allocation2 + $0xe18] sm:$0xff] }
 0x75f   :  { %5254 = vmatpush1.bf16.msra.mxu1 %v4100_v27  ;;  %5910 = vmatpush1.bf16.msra.mxu0 %v4612_v4  ;;  %v8788_v27 = vld [vmem:[#allocation27_spill] sm:$0xff] }
 0x760   :  { %5255 = vmatprep.subr.bf16.mxu1 %v4103_v62  ;;  %5911 = vmatprep.subr.bf16.mxu0 %v4615_v5  ;;  %v8789_v4 = vpack.c.bf16 %v8788_v27, %v8788_v27  ;;  %v4130_v62 = vld [vmem:[#allocation2 + $0xe10] sm:$0xff]  ;;  %v4161_v27 = vld [vmem:[#allocation2 + $0xf08] sm:$0xff] }
 0x761   :  { %v4642_v5 = vld [vmem:[#allocation2 + $0x1e10] sm:$0xff] }
 0x763   :  { %5256 = vmatpush1.bf16.msra.mxu1 %v4102_v10  ;;  %5912 = vmatpush1.bf16.msra.mxu0 %v4614_v19  ;;  %v4133_v10 = vld [vmem:[#allocation2 + $0xe28] sm:$0xff] }
 0x764   :  { %5257 = vmatprep.subr.bf16.mxu1 %v4105_v17  ;;  %5913 = vmatprep.subr.bf16.mxu0 %v4617_v15  ;;  %v4645_v19 = vld [vmem:[#allocation2 + $0x1e28] sm:$0xff]  ;;  %v8790_v17 = vld [vmem:[#allocation24_spill] sm:$0xff] }
 0x765   :  { %v8791_v15 = vpack.c.bf16 %v8790_v17, %v8790_v17  ;;  %v8793_v17 = vld [vmem:[#allocation21_spill] sm:$0xff] }
 0x767   :  { %5258 = vmatpush1.bf16.msra.mxu1 %v4104_v21  ;;  %5914 = vmatpush1.bf16.msra.mxu0 %v4616_v24  ;;  %v8792_v21 = vpack.c.bf16 %v8332_v41, %v8332_v41  ;;  %v4132_v24 = vld [vmem:[#allocation2 + $0xe20] sm:$0xff] }
 0x768   :  { %5259 = vmatprep.subr.bf16.mxu1 %v4107_v55  ;;  %5915 = vmatprep.subr.bf16.mxu0 %v4619_v49  ;;  %v4644_v55 = vld [vmem:[#allocation2 + $0x1e20] sm:$0xff]  ;;  %v4135_v49 = vld [vmem:[#allocation2 + $0xe38] sm:$0xff] }
 0x769   :  { %v4136_v41 = vld [vmem:[#allocation2 + $0xe40] sm:$0xff] }
 0x76b   :  { %5260 = vmatpush1.bf16.msra.mxu1 %v4106_v29  ;;  %5916 = vmatpush1.bf16.msra.mxu0 %v4618_v45  ;;  %v4647_v29 = vld [vmem:[#allocation2 + $0x1e38] sm:$0xff]  ;;  %v4134_v45 = vld [vmem:[#allocation2 + $0xe30] sm:$0xff] }
 0x76c   :  { %5261 = vmatprep.subr.bf16.mxu1 %v4109_v30  ;;  %5917 = vmatprep.subr.bf16.mxu0 %v4621_v32  ;;  %v4646_v30 = vld [vmem:[#allocation2 + $0x1e30] sm:$0xff]  ;;  %v4137_v32 = vld [vmem:[#allocation2 + $0xe48] sm:$0xff] }
 0x76f   :  { %5262 = vmatpush1.bf16.msra.mxu1 %v4108_v59  ;;  %5918 = vmatpush1.bf16.msra.mxu0 %v4620_v39  ;;  %v4649_v59 = vld [vmem:[#allocation2 + $0x1e48] sm:$0xff]  ;;  %v4648_v39 = vld [vmem:[#allocation2 + $0x1e40] sm:$0xff] }
 0x770   :  { %5263 = vmatprep.subr.bf16.mxu1 %v4111_v0  ;;  %5919 = vmatprep.subr.bf16.mxu0 %v4623_v26  ;;  %v4139_v0 = vld [vmem:[#allocation2 + $0xe58] sm:$0xff] }
 0x771   :  { %v4651_v26 = vld [vmem:[#allocation2 + $0x1e58] sm:$0xff] }
 0x773   :  { %5264 = vmatpush1.bf16.msra.mxu1 %v4110_v47  ;;  %5920 = vmatpush1.bf16.msra.mxu0 %v4622_v48  ;;  %v4138_v47 = vld [vmem:[#allocation2 + $0xe50] sm:$0xff] }
 0x774   :  { %5265 = vmatprep.subr.bf16.mxu1 %v4113_v60  ;;  %5921 = vmatprep.subr.bf16.mxu0 %v4625_v37  ;;  %v4650_v48 = vld [vmem:[#allocation2 + $0x1e50] sm:$0xff]  ;;  %v4141_v60 = vld [vmem:[#allocation2 + $0xe68] sm:$0xff] }
 0x775   :  { %v4653_v37 = vld [vmem:[#allocation2 + $0x1e68] sm:$0xff] }
 0x777   :  { %5266 = vmatpush1.bf16.msra.mxu1 %v4112_v3  ;;  %5922 = vmatpush1.bf16.msra.mxu0 %v4624_v52  ;;  %v4140_v3 = vld [vmem:[#allocation2 + $0xe60] sm:$0xff] }
 0x778   :  { %5267 = vmatprep.subr.bf16.mxu1 %v4115_v23  ;;  %5923 = vmatprep.subr.bf16.mxu0 %v4627_v20  ;;  %v4652_v52 = vld [vmem:[#allocation2 + $0x1e60] sm:$0xff]  ;;  %v4143_v23 = vld [vmem:[#allocation2 + $0xe78] sm:$0xff] }
 0x779   :  { %v4655_v20 = vld [vmem:[#allocation2 + $0x1e78] sm:$0xff] }
 0x77b   :  { %5268 = vmatpush1.bf16.msra.mxu1 %v4114_v63  ;;  %5924 = vmatpush1.bf16.msra.mxu0 %v4626_v36  ;;  %v4142_v63 = vld [vmem:[#allocation2 + $0xe70] sm:$0xff] }
 0x77c   :  { %5269 = vmatprep.subr.bf16.mxu1 %v4117_v12  ;;  %5925 = vmatprep.subr.bf16.mxu0 %v4629_v43  ;;  %v4654_v36 = vld [vmem:[#allocation2 + $0x1e70] sm:$0xff]  ;;  %v4145_v12 = vld [vmem:[#allocation2 + $0xe88] sm:$0xff] }
 0x77d   :  { %v4657_v43 = vld [vmem:[#allocation2 + $0x1e88] sm:$0xff] }
 0x77f   :  { %5270 = vmatpush1.bf16.msra.mxu1 %v4116_v56  ;;  %5926 = vmatpush1.bf16.msra.mxu0 %v4628_v42  ;;  %v4144_v56 = vld [vmem:[#allocation2 + $0xe80] sm:$0xff] }
 0x780   :  { %5271 = vmatprep.subr.bf16.mxu1 %v4119_v11  ;;  %5927 = vmatprep.subr.bf16.mxu0 %v4631_v9  ;;  %v4656_v42 = vld [vmem:[#allocation2 + $0x1e80] sm:$0xff]  ;;  %v4147_v11 = vld [vmem:[#allocation2 + $0xe98] sm:$0xff] }
 0x781   :  { %v4659_v9 = vld [vmem:[#allocation2 + $0x1e98] sm:$0xff] }
 0x783   :  { %5272 = vmatpush1.bf16.msra.mxu1 %v4118_v38  ;;  %5928 = vmatpush1.bf16.msra.mxu0 %v4630_v31  ;;  %v4146_v38 = vld [vmem:[#allocation2 + $0xe90] sm:$0xff] }
 0x784   :  { %5273 = vmatprep.subr.bf16.mxu1 %v4121_v16  ;;  %5929 = vmatprep.subr.bf16.mxu0 %v4633_v58  ;;  %v4658_v31 = vld [vmem:[#allocation2 + $0x1e90] sm:$0xff]  ;;  %v4149_v16 = vld [vmem:[#allocation2 + $0xea8] sm:$0xff] }
 0x785   :  { %v4661_v58 = vld [vmem:[#allocation2 + $0x1ea8] sm:$0xff] }
 0x787   :  { %5274 = vmatpush1.bf16.msra.mxu1 %v4120_v46  ;;  %5930 = vmatpush1.bf16.msra.mxu0 %v4632_v14  ;;  %v4148_v46 = vld [vmem:[#allocation2 + $0xea0] sm:$0xff] }
 0x788   :  { %5275 = vmatprep.subr.bf16.mxu1 %v4123_v50  ;;  %5931 = vmatprep.subr.bf16.mxu0 %v4635_v22  ;;  %v4660_v14 = vld [vmem:[#allocation2 + $0x1ea0] sm:$0xff]  ;;  %v4151_v50 = vld [vmem:[#allocation2 + $0xeb8] sm:$0xff] }
 0x789   :  { %v4663_v22 = vld [vmem:[#allocation2 + $0x1eb8] sm:$0xff] }
 0x78b   :  { %5276 = vmatpush1.bf16.msra.mxu1 %v4122_v40  ;;  %5932 = vmatpush1.bf16.msra.mxu0 %v4634_v7  ;;  %v4150_v40 = vld [vmem:[#allocation2 + $0xeb0] sm:$0xff] }
 0x78c   :  { %5277 = vmatprep.subr.bf16.mxu1 %v4125_v13  ;;  %5933 = vmatprep.subr.bf16.mxu0 %v4637_v25  ;;  %v4662_v7 = vld [vmem:[#allocation2 + $0x1eb0] sm:$0xff]  ;;  %v4153_v13 = vld [vmem:[#allocation2 + $0xec8] sm:$0xff] }
 0x78d   :  { %v4665_v25 = vld [vmem:[#allocation2 + $0x1ec8] sm:$0xff] }
 0x78f   :  { %5278 = vmatpush1.bf16.msra.mxu1 %v4124_v35  ;;  %5934 = vmatpush1.bf16.msra.mxu0 %v4636_v53  ;;  %v4152_v35 = vld [vmem:[#allocation2 + $0xec0] sm:$0xff] }
 0x790   :  { %5279 = vmatprep.subr.bf16.mxu1 %v4127_v57  ;;  %5935 = vmatprep.subr.bf16.mxu0 %v4639_v6  ;;  %v4664_v53 = vld [vmem:[#allocation2 + $0x1ec0] sm:$0xff]  ;;  %v4155_v57 = vld [vmem:[#allocation2 + $0xed8] sm:$0xff] }
 0x791   :  { %v4667_v6 = vld [vmem:[#allocation2 + $0x1ed8] sm:$0xff] }
 0x793   :  { %5280 = vmatpush1.bf16.msra.mxu1 %v4126_v54  ;;  %5936 = vmatpush1.bf16.msra.mxu0 %v4638_v8  ;;  %v4154_v54 = vld [vmem:[#allocation2 + $0xed0] sm:$0xff] }
 0x794   :  { %5290 = vmatprep.subr.bf16.mxu1 %v4129_v2  ;;  %5946 = vmatprep.subr.bf16.mxu0 %v4641_v33  ;;  %v4666_v8 = vld [vmem:[#allocation2 + $0x1ed0] sm:$0xff]  ;;  %v4157_v2 = vld [vmem:[#allocation2 + $0xee8] sm:$0xff] }
 0x795   :  { %v4669_v33 = vld [vmem:[#allocation2 + $0x1ee8] sm:$0xff] }
 0x796   :  { %5282 = vmatmul.mubr.bf16.vlgmr.msra.gmra.mrb[12].mxu1 %v8787_v28  ;;  %5938 = vmatmul.mubr.bf16.vlgmr.msra.gmra.mrb[20].mxu0 %v8789_v4  ;;  %v4670_v28 = vld [vmem:[#allocation2 + $0x1ef0] sm:$0xff]  ;;  %v4673_v4 = vld [vmem:[#allocation2 + $0x1f08] sm:$0xff] }
 0x797   :  { %5291 = vmatpush1.bf16.msra.mxu1 %v4128_v51  ;;  %5947 = vmatpush1.bf16.msra.mxu0 %v4640_v61  ;;  %v4156_v51 = vld [vmem:[#allocation2 + $0xee0] sm:$0xff] }
 0x798   :  { %5292 = vmatprep.subr.bf16.mxu1 %v4131_v18  ;;  %5948 = vmatprep.subr.bf16.mxu0 %v4643_v1  ;;  %v4668_v61 = vld [vmem:[#allocation2 + $0x1ee0] sm:$0xff]  ;;  %v4159_v18 = vld [vmem:[#allocation2 + $0xef8] sm:$0xff] }
 0x799   :  { %5322 = vmatprep.mubr.bf16.mxu1 %v8791_v15  ;;  %5978 = vmatprep.mubr.bf16.mxu0 %v8792_v21  ;;  %v4671_v1 = vld [vmem:[#allocation2 + $0x1ef8] sm:$0xff]  ;;  %v8794_v15 = vpack.c.bf16 %v8793_v17, %v8793_v17  ;;  %v6047_v17 = vld [vmem:[%s8661_s8 + $0x88] sm:$0xff] }
 0x79a   :  { %v8795_v21 = vld [vmem:[#allocation28_spill] sm:$0xff] }
 0x79b   :  { %5293 = vmatpush1.bf16.msra.mxu1 %v4130_v62  ;;  %5949 = vmatpush1.bf16.msra.mxu0 %v4642_v5  ;;  %v4160_v62 = vld [vmem:[#allocation2 + $0xf00] sm:$0xff] }
 0x79c   :  { %5294 = vmatprep.subr.bf16.mxu1 %v4133_v10  ;;  %5950 = vmatprep.subr.bf16.mxu0 %v4645_v19  ;;  %v4672_v5 = vld [vmem:[#allocation2 + $0x1f00] sm:$0xff]  ;;  %v4163_v10 = vld [vmem:[#allocation2 + $0xf18] sm:$0xff] }
 0x79d   :  { %v4675_v19 = vld [vmem:[#allocation2 + $0x1f18] sm:$0xff] }
 0x79f   :  { %5295 = vmatpush1.bf16.msra.mxu1 %v4132_v24  ;;  %5951 = vmatpush1.bf16.msra.mxu0 %v4644_v55  ;;  %v8796_v24 = vpack.c.bf16 %v8795_v21, %v8795_v21  ;;  %v4162_v55 = vld [vmem:[#allocation2 + $0xf10] sm:$0xff] }
 0x7a0   :  { %5296 = vmatprep.subr.bf16.mxu1 %v4135_v49  ;;  %5952 = vmatprep.subr.bf16.mxu0 %v4647_v29  ;;  %v4674_v49 = vld [vmem:[#allocation2 + $0x1f10] sm:$0xff]  ;;  %v4165_v29 = vld [vmem:[#allocation2 + $0xf28] sm:$0xff] }
 0x7a1   :  { %v4702_v21 = vld [vmem:[#allocation2 + $0x1ff0] sm:$0xff] }
 0x7a3   :  { %5297 = vmatpush1.bf16.msra.mxu1 %v4134_v45  ;;  %5953 = vmatpush1.bf16.msra.mxu0 %v4646_v30  ;;  %v4677_v45 = vld [vmem:[#allocation2 + $0x1f28] sm:$0xff] }
 0x7a4   :  { %5298 = vmatprep.subr.bf16.mxu1 %v4137_v32  ;;  %5954 = vmatprep.subr.bf16.mxu0 %v4649_v59  ;;  %v8797_v30 = vld [vmem:[#allocation25_spill] sm:$0xff]  ;;  %v8799_v59 = vpack.c.bf16 %v8336_v44, %v8336_v44 }
 0x7a5   :  { %v8798_v32 = vpack.c.bf16 %v8797_v30, %v8797_v30  ;;  %v4168_v44 = vld [vmem:[#allocation2 + $0xf40] sm:$0xff] }
 0x7a7   :  { %5299 = vmatpush1.bf16.msra.mxu1 %v4136_v41  ;;  %5955 = vmatpush1.bf16.msra.mxu0 %v4648_v39  ;;  %v4164_v41 = vld [vmem:[#allocation2 + $0xf20] sm:$0xff] }
 0x7a8   :  { %5300 = vmatprep.subr.bf16.mxu1 %v4139_v0  ;;  %5956 = vmatprep.subr.bf16.mxu0 %v4651_v26  ;;  %v4676_v39 = vld [vmem:[#allocation2 + $0x1f20] sm:$0xff]  ;;  %v4167_v0 = vld [vmem:[#allocation2 + $0xf38] sm:$0xff] }
 0x7a9   :  { %v4679_v26 = vld [vmem:[#allocation2 + $0x1f38] sm:$0xff] }
 0x7ab   :  { %5301 = vmatpush1.bf16.msra.mxu1 %v4138_v47  ;;  %5957 = vmatpush1.bf16.msra.mxu0 %v4650_v48  ;;  %v4166_v47 = vld [vmem:[#allocation2 + $0xf30] sm:$0xff] }
 0x7ac   :  { %5302 = vmatprep.subr.bf16.mxu1 %v4141_v60  ;;  %5958 = vmatprep.subr.bf16.mxu0 %v4653_v37  ;;  %v4678_v48 = vld [vmem:[#allocation2 + $0x1f30] sm:$0xff]  ;;  %v4169_v60 = vld [vmem:[#allocation2 + $0xf48] sm:$0xff] }
 0x7ad   :  { %v4681_v37 = vld [vmem:[#allocation2 + $0x1f48] sm:$0xff] }
 0x7af   :  { %5303 = vmatpush1.bf16.msra.mxu1 %v4140_v3  ;;  %5959 = vmatpush1.bf16.msra.mxu0 %v4652_v52  ;;  %v4680_v3 = vld [vmem:[#allocation2 + $0x1f40] sm:$0xff]  ;;  %v4171_v52 = vld [vmem:[#allocation2 + $0xf58] sm:$0xff] }
 0x7b0   :  { %5304 = vmatprep.subr.bf16.mxu1 %v4143_v23  ;;  %5960 = vmatprep.subr.bf16.mxu0 %v4655_v20  ;;  %v4683_v23 = vld [vmem:[#allocation2 + $0x1f58] sm:$0xff]  ;;  %v4170_v20 = vld [vmem:[#allocation2 + $0xf50] sm:$0xff] }
 0x7b3   :  { %5305 = vmatpush1.bf16.msra.mxu1 %v4142_v63  ;;  %5961 = vmatpush1.bf16.msra.mxu0 %v4654_v36  ;;  %v4682_v63 = vld [vmem:[#allocation2 + $0x1f50] sm:$0xff]  ;;  %v4173_v36 = vld [vmem:[#allocation2 + $0xf68] sm:$0xff] }
 0x7b4   :  { %5306 = vmatprep.subr.bf16.mxu1 %v4145_v12  ;;  %5962 = vmatprep.subr.bf16.mxu0 %v4657_v43  ;;  %v4685_v12 = vld [vmem:[#allocation2 + $0x1f68] sm:$0xff]  ;;  %v4172_v43 = vld [vmem:[#allocation2 + $0xf60] sm:$0xff] }
 0x7b7   :  { %5307 = vmatpush1.bf16.msra.mxu1 %v4144_v56  ;;  %5963 = vmatpush1.bf16.msra.mxu0 %v4656_v42  ;;  %v4684_v56 = vld [vmem:[#allocation2 + $0x1f60] sm:$0xff]  ;;  %v4175_v42 = vld [vmem:[#allocation2 + $0xf78] sm:$0xff] }
 0x7b8   :  { %5308 = vmatprep.subr.bf16.mxu1 %v4147_v11  ;;  %5964 = vmatprep.subr.bf16.mxu0 %v4659_v9  ;;  %v4687_v11 = vld [vmem:[#allocation2 + $0x1f78] sm:$0xff]  ;;  %v4174_v9 = vld [vmem:[#allocation2 + $0xf70] sm:$0xff] }
 0x7bb   :  { %5309 = vmatpush1.bf16.msra.mxu1 %v4146_v38  ;;  %5965 = vmatpush1.bf16.msra.mxu0 %v4658_v31  ;;  %v4686_v38 = vld [vmem:[#allocation2 + $0x1f70] sm:$0xff]  ;;  %v4177_v31 = vld [vmem:[#allocation2 + $0xf88] sm:$0xff] }
 0x7bc   :  { %5310 = vmatprep.subr.bf16.mxu1 %v4149_v16  ;;  %5966 = vmatprep.subr.bf16.mxu0 %v4661_v58  ;;  %v4689_v16 = vld [vmem:[#allocation2 + $0x1f88] sm:$0xff]  ;;  %v4176_v58 = vld [vmem:[#allocation2 + $0xf80] sm:$0xff] }
 0x7bf   :  { %5311 = vmatpush1.bf16.msra.mxu1 %v4148_v46  ;;  %5967 = vmatpush1.bf16.msra.mxu0 %v4660_v14  ;;  %v4688_v46 = vld [vmem:[#allocation2 + $0x1f80] sm:$0xff]  ;;  %v4179_v14 = vld [vmem:[#allocation2 + $0xf98] sm:$0xff] }
 0x7c0   :  { %5312 = vmatprep.subr.bf16.mxu1 %v4151_v50  ;;  %5968 = vmatprep.subr.bf16.mxu0 %v4663_v22  ;;  %v4691_v50 = vld [vmem:[#allocation2 + $0x1f98] sm:$0xff]  ;;  %v4178_v22 = vld [vmem:[#allocation2 + $0xf90] sm:$0xff] }
 0x7c3   :  { %5313 = vmatpush1.bf16.msra.mxu1 %v4150_v40  ;;  %5969 = vmatpush1.bf16.msra.mxu0 %v4662_v7  ;;  %v4690_v40 = vld [vmem:[#allocation2 + $0x1f90] sm:$0xff]  ;;  %v4181_v7 = vld [vmem:[#allocation2 + $0xfa8] sm:$0xff] }
 0x7c4   :  { %5314 = vmatprep.subr.bf16.mxu1 %v4153_v13  ;;  %5970 = vmatprep.subr.bf16.mxu0 %v4665_v25  ;;  %v4693_v13 = vld [vmem:[#allocation2 + $0x1fa8] sm:$0xff]  ;;  %v4180_v25 = vld [vmem:[#allocation2 + $0xfa0] sm:$0xff] }
 0x7c7   :  { %5315 = vmatpush1.bf16.msra.mxu1 %v4152_v35  ;;  %5971 = vmatpush1.bf16.msra.mxu0 %v4664_v53  ;;  %v4692_v35 = vld [vmem:[#allocation2 + $0x1fa0] sm:$0xff]  ;;  %v4183_v53 = vld [vmem:[#allocation2 + $0xfb8] sm:$0xff] }
 0x7c8   :  { %5316 = vmatprep.subr.bf16.mxu1 %v4155_v57  ;;  %5972 = vmatprep.subr.bf16.mxu0 %v4667_v6  ;;  %v4695_v57 = vld [vmem:[#allocation2 + $0x1fb8] sm:$0xff]  ;;  %v4182_v6 = vld [vmem:[#allocation2 + $0xfb0] sm:$0xff] }
 0x7cb   :  { %5317 = vmatpush1.bf16.msra.mxu1 %v4154_v54  ;;  %5973 = vmatpush1.bf16.msra.mxu0 %v4666_v8  ;;  %v4694_v54 = vld [vmem:[#allocation2 + $0x1fb0] sm:$0xff]  ;;  %v4185_v8 = vld [vmem:[#allocation2 + $0xfc8] sm:$0xff] }
 0x7cc   :  { %5318 = vmatprep.subr.bf16.mxu1 %v4157_v2  ;;  %5974 = vmatprep.subr.bf16.mxu0 %v4669_v33  ;;  %v4697_v2 = vld [vmem:[#allocation2 + $0x1fc8] sm:$0xff]  ;;  %v4184_v33 = vld [vmem:[#allocation2 + $0xfc0] sm:$0xff] }
 0x7cf   :  { %5319 = vmatpush1.bf16.msra.mxu1 %v4156_v51  ;;  %5975 = vmatpush1.bf16.msra.mxu0 %v4668_v61  ;;  %v4696_v51 = vld [vmem:[#allocation2 + $0x1fc0] sm:$0xff]  ;;  %v4187_v61 = vld [vmem:[#allocation2 + $0xfd8] sm:$0xff] }
 0x7d0   :  { %5320 = vmatprep.subr.bf16.mxu1 %v4159_v18  ;;  %5976 = vmatprep.subr.bf16.mxu0 %v4671_v1  ;;  %v4699_v18 = vld [vmem:[#allocation2 + $0x1fd8] sm:$0xff]  ;;  %v4186_v1 = vld [vmem:[#allocation2 + $0xfd0] sm:$0xff] }
 0x7d3   :  { %5321 = vmatpush1.bf16.msra.mxu1 %v4158_v34  ;;  %5977 = vmatpush1.bf16.msra.mxu0 %v4670_v28  ;;  %v4698_v34 = vld [vmem:[#allocation2 + $0x1fd0] sm:$0xff]  ;;  %v4189_v28 = vld [vmem:[#allocation2 + $0xfe8] sm:$0xff] }
 0x7d4   :  { %5331 = vmatprep.subr.bf16.mxu1 %v4161_v27  ;;  %5987 = vmatprep.subr.bf16.mxu0 %v4673_v4  ;;  %v4701_v27 = vld [vmem:[#allocation2 + $0x1fe8] sm:$0xff]  ;;  %v4188_v4 = vld [vmem:[#allocation2 + $0xfe0] sm:$0xff] }
 0x7d6   :  { %5323 = vmatmul.mubr.bf16.vlgmr.msra.gmra.mrb[12].mxu1 %v8794_v15  ;;  %5979 = vmatmul.mubr.bf16.vlgmr.msra.gmra.mrb[20].mxu0 %v8796_v24  ;;  %v4190_v15 = vld [vmem:[#allocation2 + $0xff0] sm:$0xff] }
 0x7d7   :  { %5332 = vmatpush1.bf16.msra.mxu1 %v4160_v62  ;;  %5988 = vmatpush1.bf16.msra.mxu0 %v4672_v5  ;;  %v4700_v62 = vld [vmem:[#allocation2 + $0x1fe0] sm:$0xff]  ;;  %v4191_v5 = vld [vmem:[#allocation2 + $0xff8] sm:$0xff] }
 0x7d8   :  { %5333 = vmatprep.subr.bf16.mxu1 %v4163_v10  ;;  %5989 = vmatprep.subr.bf16.mxu0 %v4675_v19  ;;  %v4703_v10 = vld [vmem:[#allocation2 + $0x1ff8] sm:$0xff]  ;;  %v6046_v19 = vld [vmem:[%s8661_s8 + $0x80] sm:$0xff] }
 0x7d9   :  { %5363 = vmatprep.mubr.bf16.mxu1 %v8798_v32  ;;  %6019 = vmatprep.mubr.bf16.mxu0 %v8799_v59  ;;  %v6335_v24 = vpack.c.bf16 %v6047_v17, %v6046_v19  ;;  %v6032_v59 = vld [vmem:[%s8661_s8 + $0x10] sm:$0xff] }
 0x7db   :  { %5334 = vmatpush1.bf16.msra.mxu1 %v4162_v55  ;;  %5990 = vmatpush1.bf16.msra.mxu0 %v4674_v49  ;;  %v6030_v55 = vld [vmem:[%s8661_s8] sm:$0xff]  ;;  %v6031_v49 = vld [vmem:[%s8661_s8 + $0x8] sm:$0xff] }
 0x7dc   :  { %5335 = vmatprep.subr.bf16.mxu1 %v4165_v29  ;;  %5991 = vmatprep.subr.bf16.mxu0 %v4677_v45  ;;  %v6048_v29 = vld [vmem:[%s8661_s8 + $0x90] sm:$0xff]  ;;  %v6049_v45 = vld [vmem:[%s8661_s8 + $0x98] sm:$0xff]  ;;  %v6337_v30 = vpack.c.bf16 %v6031_v49, %v6030_v55 }
 0x7dd   :  { %v6339_v32 = vpack.c.bf16 %v6049_v45, %v6048_v29 }
 0x7df   :  { %5336 = vmatpush1.bf16.msra.mxu1 %v4164_v41  ;;  %5992 = vmatpush1.bf16.msra.mxu0 %v4676_v39  ;;  %v6033_v41 = vld [vmem:[%s8661_s8 + $0x18] sm:$0xff]  ;;  %v6050_v39 = vld [vmem:[%s8661_s8 + $0xa0] sm:$0xff] }
 0x7e0   :  { %5337 = vmatprep.subr.bf16.mxu1 %v4167_v0  ;;  %5993 = vmatprep.subr.bf16.mxu0 %v4679_v26  ;;  %v6051_v0 = vld [vmem:[%s8661_s8 + $0xa8] sm:$0xff] }
 0x7e1   :  { %v8800_v26 = vld [vmem:[#allocation22_spill] sm:$0xff] }
 0x7e3   :  { %5338 = vmatpush1.bf16.msra.mxu1 %v4166_v47  ;;  %5994 = vmatpush1.bf16.msra.mxu0 %v4678_v48  ;;  %v8801_v47 = vpack.c.bf16 %v8800_v26, %v8800_v26  ;;  %v8802_v48 = vld [vmem:[#allocation29_spill] sm:$0xff] }
 0x7e4   :  { %5339 = vmatprep.subr.bf16.mxu1 %v4169_v60  ;;  %5995 = vmatprep.subr.bf16.mxu0 %v4681_v37  ;;  %v8803_v60 = vpack.c.bf16 %v8802_v48, %v8802_v48  ;;  %v6341_v37 = vpack.c.bf16 %v6033_v41, %v6032_v59 }
 0x7e7   :  { %5340 = vmatpush1.bf16.msra.mxu1 %v4168_v44  ;;  %5996 = vmatpush1.bf16.msra.mxu0 %v4680_v3  ;;  %v6343_v44 = vpack.c.bf16 %v6051_v0, %v6050_v39  ;;  %v6034_v3 = vld [vmem:[%s8661_s8 + $0x20] sm:$0xff] }
 0x7e8   :  { %5341 = vmatprep.subr.bf16.mxu1 %v4171_v52  ;;  %5997 = vmatprep.subr.bf16.mxu0 %v4683_v23  ;;  %v6035_v52 = vld [vmem:[%s8661_s8 + $0x28] sm:$0xff]  ;;  %v6052_v23 = vld [vmem:[%s8661_s8 + $0xb0] sm:$0xff] }
 0x7eb   :  { %5342 = vmatpush1.bf16.msra.mxu1 %v4170_v20  ;;  %5998 = vmatpush1.bf16.msra.mxu0 %v4682_v63  ;;  %v6053_v20 = vld [vmem:[%s8661_s8 + $0xb8] sm:$0xff]  ;;  %v6345_v63 = vpack.c.bf16 %v6035_v52, %v6034_v3 }
 0x7ec   :  { %5343 = vmatprep.subr.bf16.mxu1 %v4173_v36  ;;  %5999 = vmatprep.subr.bf16.mxu0 %v4685_v12  ;;  %v6347_v36 = vpack.c.bf16 %v6053_v20, %v6052_v23  ;;  %v6036_v12 = vld [vmem:[%s8661_s8 + $0x30] sm:$0xff] }
 0x7ef   :  { %5344 = vmatpush1.bf16.msra.mxu1 %v4172_v43  ;;  %6000 = vmatpush1.bf16.msra.mxu0 %v4684_v56  ;;  %v6037_v43 = vld [vmem:[%s8661_s8 + $0x38] sm:$0xff]  ;;  %v6054_v56 = vld [vmem:[%s8661_s8 + $0xc0] sm:$0xff] }
 0x7f0   :  { %5345 = vmatprep.subr.bf16.mxu1 %v4175_v42  ;;  %6001 = vmatprep.subr.bf16.mxu0 %v4687_v11  ;;  %v6055_v42 = vld [vmem:[%s8661_s8 + $0xc8] sm:$0xff]  ;;  %v6349_v11 = vpack.c.bf16 %v6037_v43, %v6036_v12 }
 0x7f3   :  { %5346 = vmatpush1.bf16.msra.mxu1 %v4174_v9  ;;  %6002 = vmatpush1.bf16.msra.mxu0 %v4686_v38  ;;  %v6351_v9 = vpack.c.bf16 %v6055_v42, %v6054_v56  ;;  %v6038_v38 = vld [vmem:[%s8661_s8 + $0x40] sm:$0xff] }
 0x7f4   :  { %5347 = vmatprep.subr.bf16.mxu1 %v4177_v31  ;;  %6003 = vmatprep.subr.bf16.mxu0 %v4689_v16  ;;  %v6039_v31 = vld [vmem:[%s8661_s8 + $0x48] sm:$0xff]  ;;  %v6056_v16 = vld [vmem:[%s8661_s8 + $0xd0] sm:$0xff] }
 0x7f7   :  { %5348 = vmatpush1.bf16.msra.mxu1 %v4176_v58  ;;  %6004 = vmatpush1.bf16.msra.mxu0 %v4688_v46  ;;  %v6057_v58 = vld [vmem:[%s8661_s8 + $0xd8] sm:$0xff]  ;;  %v6353_v46 = vpack.c.bf16 %v6039_v31, %v6038_v38 }
 0x7f8   :  { %5349 = vmatprep.subr.bf16.mxu1 %v4179_v14  ;;  %6005 = vmatprep.subr.bf16.mxu0 %v4691_v50  ;;  %v6355_v14 = vpack.c.bf16 %v6057_v58, %v6056_v16  ;;  %v6040_v50 = vld [vmem:[%s8661_s8 + $0x50] sm:$0xff] }
 0x7fb   :  { %5350 = vmatpush1.bf16.msra.mxu1 %v4178_v22  ;;  %6006 = vmatpush1.bf16.msra.mxu0 %v4690_v40  ;;  %v6041_v22 = vld [vmem:[%s8661_s8 + $0x58] sm:$0xff] }
 0x7fc   :  { %5351 = vmatprep.subr.bf16.mxu1 %v4181_v7  ;;  %6007 = vmatprep.subr.bf16.mxu0 %v4693_v13  ;;  %v6357_v40 = vpack.c.bf16 %v6041_v22, %v6040_v50  ;;  %v6058_v7 = vld [vmem:[%s8661_s8 + $0xe0] sm:$0xff]  ;;  %v6059_v13 = vld [vmem:[%s8661_s8 + $0xe8] sm:$0xff] }
 0x7ff   :  { %5352 = vmatpush1.bf16.msra.mxu1 %v4180_v25  ;;  %6008 = vmatpush1.bf16.msra.mxu0 %v4692_v35  ;;  %v6359_v25 = vpack.c.bf16 %v6059_v13, %v6058_v7  ;;  %v6042_v35 = vld [vmem:[%s8661_s8 + $0x60] sm:$0xff] }
 0x800   :  { %5353 = vmatprep.subr.bf16.mxu1 %v4183_v53  ;;  %6009 = vmatprep.subr.bf16.mxu0 %v4695_v57  ;;  %v6043_v53 = vld [vmem:[%s8661_s8 + $0x68] sm:$0xff] }
 0x801   :  { %v6361_v57 = vpack.c.bf16 %v6043_v53, %v6042_v35 }
 0x803   :  { %5354 = vmatpush1.bf16.msra.mxu1 %v4182_v6  ;;  %6010 = vmatpush1.bf16.msra.mxu0 %v4694_v54  ;;  %v6060_v6 = vld [vmem:[%s8661_s8 + $0xf0] sm:$0xff]  ;;  %v6061_v54 = vld [vmem:[%s8661_s8 + $0xf8] sm:$0xff] }
 0x804   :  { %5355 = vmatprep.subr.bf16.mxu1 %v4185_v8  ;;  %6011 = vmatprep.subr.bf16.mxu0 %v4697_v2  ;;  %v6363_v8 = vpack.c.bf16 %v6061_v54, %v6060_v6  ;;  %v6044_v2 = vld [vmem:[%s8661_s8 + $0x70] sm:$0xff] }
 0x807   :  { %5356 = vmatpush1.bf16.msra.mxu1 %v4184_v33  ;;  %6012 = vmatpush1.bf16.msra.mxu0 %v4696_v51  ;;  %v6045_v33 = vld [vmem:[%s8661_s8 + $0x78] sm:$0xff]  ;;  %s6857_s8 = smov [#allocation10]  }
 0x808   :  { %5357 = vmatprep.subr.bf16.mxu1 %v4187_v61  ;;  %6013 = vmatprep.subr.bf16.mxu0 %v4699_v18  ;;  %v6365_v51 = vpack.c.bf16 %v6045_v33, %v6044_v2  ;;  %v4704_v61 = vld [vmem:[#allocation7] sm:$0x3]  ;;  %v8804_v18 = vld [vmem:[#allocation18_spill] sm:$0xff]  ;;  %s6147_s24 = sshll.u32 %s6857_s8, 4  ;;  %s6148_s24 = int_to_ptr.vmem [resolvable:$true] %s6147_s24 }
 0x809   :  { %s6804_s25 = scalar_lea.vmem %s6148_s24, 32  ;;  %p6809_p11 = scmp.lt.s32.totalorder %s6148_s24, %s6148_s24 }
 0x80a   :  { %p6805_p10 = scmp.ne.s32.totalorder %s6148_s24, %s6804_s25  ;;  %p6810_p12 = scmp.lt.s32.totalorder %s6804_s25, %s6804_s25 }
 0x80b   :  { %5358 = vmatpush1.bf16.msra.mxu1 %v4186_v1  ;;  %6014 = vmatpush1.bf16.msra.mxu0 %v4698_v34  ;;  %v4709_v1 = vrot.slane %v4704_v61, %v8804_v18  ;;  %v8805_v34 = vld [vmem:[#allocation17_spill] sm:$0xff] }
 0x80c   :  { %5359 = vmatprep.subr.bf16.mxu1 %v4189_v28  ;;  %6015 = vmatprep.subr.bf16.mxu0 %v4701_v27  ;;  %v4713_v28 = vrot.slane %v4704_v61, %v8805_v34  ;;  %p6811_p13 = por %p6810_p12, %p6809_p11 }
 0x80e   :  { %p6812_p0 = pnand %p6811_p13, %p6805_p10 }
 0x80f   :  { %5360 = vmatpush1.bf16.msra.mxu1 %v4188_v4  ;;  %6016 = vmatpush1.bf16.msra.mxu0 %v4700_v62 }
 0x810   :  { %5361 = vmatprep.subr.bf16.mxu1 %v4191_v5  ;;  %6017 = vmatprep.subr.bf16.mxu0 %v4703_v10 }
 0x813   :  { %5362 = vmatpush1.bf16.msra.mxu1 %v4190_v15  ;;  %6018 = vmatpush1.bf16.msra.mxu0 %v4702_v21 }
 0x814   :  { %6336 = vmatprep.subr.bf16.mxu1 %v6335_v24 }
 0x816   :  { %5364 = vmatmul.mubr.bf16.vlgmr.msra.gmra.mrb[12].mxu1 %v8801_v47  ;;  %6020 = vmatmul.mubr.bf16.vlgmr.msra.gmra.mrb[20].mxu0 %v8803_v60 }
 0x817   :  { %6338 = vmatpush3.bf16.msra.mxu1 %v6337_v30 }
 0x818   :  { %6340 = vmatprep.subr.bf16.mxu1 %v6339_v32  ;;  %v6298_v32 = vld [vmem:[#allocation9] ss:$0 sm:$0xff] }
 0x81b   :  { %6342 = vmatpush3.bf16.msra.mxu1 %v6341_v37 }
 0x81c   :  { %6344 = vmatprep.subr.bf16.mxu1 %v6343_v44 }
 0x81f   :  { %6346 = vmatpush3.bf16.msra.mxu1 %v6345_v63 }
 0x820   :  { %6348 = vmatprep.subr.bf16.mxu1 %v6347_v36 }
 0x823   :  { %6350 = vmatpush3.bf16.msra.mxu1 %v6349_v11 }
 0x824   :  { %6352 = vmatprep.subr.bf16.mxu1 %v6351_v9 }
 0x827   :  { %6354 = vmatpush3.bf16.msra.mxu1 %v6353_v46 }
 0x828   :  { %6356 = vmatprep.subr.bf16.mxu1 %v6355_v14 }
 0x82b   :  { %6358 = vmatpush3.bf16.msra.mxu1 %v6357_v40 }
 0x82c   :  { %6360 = vmatprep.subr.bf16.mxu1 %v6359_v25 }
 0x82f   :  { %6362 = vmatpush3.bf16.msra.mxu1 %v6361_v57 }
 0x830   :  { %6364 = vmatprep.subr.bf16.mxu1 %v6363_v8 }
 0x833   :  { %6366 = vmatpush3.bf16.msra.mxu1 %v6365_v51 }
 0x8e9   :  { %v5365_v27 = vpop.f32.mrb[12].mxu1  ;;  %v6021_v4 = vpop.f32.mrb[20].mxu0 }
 0x8ea   :  { %v6375_v62 = vadd.f32 %v5365_v27, %v4709_v1  ;;  %v5367_v5 = vpop.f32.mrb[13].mxu1  ;;  %v6023_v10 = vpop.f32.mrb[21].mxu0 }
 0x8eb   :  { %v6377_v19 = vadd.f32 %v5367_v5, %v4713_v28  ;;  %v5369_v17 = vpop.f32.mrb[14].mxu1  ;;  %v6025_v15 = vpop.f32.mrb[22].mxu0 }
 0x8ec   :  { %v6376_v21 = vadd.f32 %v6375_v62, %v6021_v4  ;;  %v5370_v24 = vpop.f32.mrb[15].mxu1  ;;  %v6026_v55 = vpop.f32.mrb[23].mxu0 }
 0x8ed   :  { %v6378_v49 = vadd.f32 %v6377_v19, %v6023_v10 }
 0x8ee   :  { %v6028_v45 = vmax.f32 %v6376_v21, 0.0 }
 0x8ef   :  { %v6029_v29 = vmax.f32 %v6378_v49, 0.0 }
 0x8f1   :  { %6133 = vmatprep.mubr.f32.mxu1 %v6029_v29 }
 0x8f2   :  { %6134 = vmatmul.mubr.f32.vlgmr.msra.gmra.mrb[16].mxu1 %v6028_v45 }
 0x9c5   :  { %v6332_v30 = vpop.f32.mrb[16].mxu1 }
 0x9c6   :  { %v6333_v59 = vpop.f32.mrb[17].mxu1 }
 0x9c7   :  { %v6334_v41 = vadd.f32 %v6333_v59, %v6332_v30 }
 0x9c9   :  { %v6136_v39 = vadd.f32 %v6334_v41, %v6298_v32 }
 0x9cb   :  { %6140 = vst.msk [vmem:[#allocation10] sm:$0x3] %vm6139_vm11, %v6136_v39 }
 0x9cc   :  { %6815 = shalt.err (!%p6812_p0)
}
 0x9cd   :  { %s6816_s12 = scalar_lea.hbm %s8663_s10, 32 }
 0x9ce   :  { %p6817_p1 = scmp.ne.s32.totalorder %s8663_s10, %s6816_s12  ;;  %p6820_p2 = scmp.lt.u32.totalorder %s6816_s12, %s8663_s10 }
 0x9d0   :  { %p6822_p3 = pnand %p6820_p2, %p6817_p1 }
 0x9d2   :  { %6825 = shalt.err (!%p6822_p3)
}
 0x9d3   :  { %6150 = dma.vmem_to_hbm [thread:$0]  %s6148_s24, 32, %s8663_s10, [#allocation6]  }
 0x9d4   :  { %6832 = dma.done.wait [#allocation6], 32  }
 0x9d5   :  { %6833 = vsyncadd [#allocation6], 4294967264 }
 0x9d6   :  { %6154 = vsyncpa [#allocation5], 1 }
 0x9d7   :  { %6155 = vsyncpa [#allocation8], 1 }
 0x9d8   :  { %6156 = vsyncpa [#allocation6], 1 }
 0x9d9   :  { %6157 = vsyncmov [#allocation3] }
 0x9dc   :  { %s6158_s28 = vpop.sfrf %6157 }
 0x9dd   :  { %p6299_p4 = scmp.ne.s32.totalorder %s6158_s28, 0 }
 0x9df   :  { %6162 = shalt.err (%p6299_p4)  }

</bundles_post_ra>
